<compile_context>
chip_gen: v7x
topology: tpu7x:2x2x1
jax: 0.10.0
libtpu: 0.0.40
codegen_flags: <defaults>
</compile_context>

<pallas_src>
import functools

import jax
import jax.numpy as jnp
from jax.experimental import pallas as pl
from jax.experimental.pallas import tpu as pltpu


CONV_TM = 256     # M-tile for the conv matmuls (megacore-parallel axis)
FC1_TK = 2304     # K-tile for fc1 (9216 / 2304 = 4 K steps)


# ----------------------------- Pallas kernels ------------------------------ #

def _matmul_bias_direct_kernel(a_ref, b_ref, bias_ref, o_ref, *, relu):
    """Single-K-step matmul: dot + bias (+ReLU) straight to the output block."""
    a = a_ref[...]
    if a.dtype != b_ref.dtype:          # bf16 weight path: cast activations
        a = a.astype(b_ref.dtype)
    r = jnp.dot(a, b_ref[...], preferred_element_type=jnp.float32) + bias_ref[...]
    if relu:
        r = jnp.maximum(r, 0.0)
    o_ref[...] = r.astype(o_ref.dtype)


def _matmul_bias_acc_kernel(a_ref, b_ref, bias_ref, o_ref, acc_ref, *, relu):
    """Tiled-K matmul with f32 accumulator; bias(+ReLU) on the last K step."""
    @pl.when(pl.program_id(1) == 0)
    def _():
        acc_ref[...] = jnp.zeros_like(acc_ref)

    a = a_ref[...]
    if a.dtype != b_ref.dtype:          # bf16 weight path: cast activations
        a = a.astype(b_ref.dtype)
    acc_ref[...] += jnp.dot(a, b_ref[...], preferred_element_type=jnp.float32)

    @pl.when(pl.program_id(1) == pl.num_programs(1) - 1)
    def _():
        r = acc_ref[...] + bias_ref[...]
        if relu:
            r = jnp.maximum(r, 0.0)
        o_ref[...] = r.astype(o_ref.dtype)


def matmul_bias(a, w, bias, *, relu=False, tm=None, tk=None):
    """out = [relu](a @ w + bias).  a:[M,K] f32, w:[K,N] (f32 or bf16), bias:[N]."""
    M, K = a.shape
    K2, N = w.shape
    assert K == K2
    if tm is None or tm >= M:
        tm, nm = M, 1
    else:
        nm = pl.cdiv(M, tm)
    if tk is None or tk >= K:
        tk, nk = K, 1
    else:
        assert K % tk == 0
        nk = K // tk
    bias2 = bias.reshape(1, N)

    if nk == 1:
        # No accumulator scratch, no extra VMEM->VMEM copy; M axis is parallel
        # so v7x's two TensorCores split the conv matmuls.
        kern = functools.partial(_matmul_bias_direct_kernel, relu=relu)
        return pl.pallas_call(
            kern,
            out_shape=jax.ShapeDtypeStruct((M, N), jnp.float32),
            grid_spec=pltpu.PrefetchScalarGridSpec(
                num_scalar_prefetch=0,
                grid=(nm,),
                in_specs=[pl.BlockSpec((tm, K), lambda i: (i, 0)),
                          pl.BlockSpec((K, N), lambda i: (0, 0)),
                          pl.BlockSpec((1, N), lambda i: (0, 0))],
                out_specs=pl.BlockSpec((tm, N), lambda i: (i, 0))),
            compiler_params=pltpu.CompilerParams(
                dimension_semantics=("parallel",)),
        )(a, w, bias2)

    kern = functools.partial(_matmul_bias_acc_kernel, relu=relu)
    return pl.pallas_call(
        kern,
        out_shape=jax.ShapeDtypeStruct((M, N), jnp.float32),
        grid_spec=pltpu.PrefetchScalarGridSpec(
            num_scalar_prefetch=0,
            grid=(nm, nk),
            in_specs=[pl.BlockSpec((tm, tk), lambda i, k: (i, k)),
                      pl.BlockSpec((tk, N), lambda i, k: (k, 0)),
                      pl.BlockSpec((1, N), lambda i, k: (0, 0))],
            out_specs=pl.BlockSpec((tm, N), lambda i, k: (i, 0)),
            scratch_shapes=[pltpu.VMEM((tm, N), jnp.float32)]),
        compiler_params=pltpu.CompilerParams(
            dimension_semantics=("parallel", "arbitrary")),
    )(a, w, bias2)


def _max4_kernel(a_ref, b_ref, c_ref, d_ref, o_ref):
    """Elementwise 4-way max == 2x2 max-pool reduction."""
    o_ref[...] = jnp.maximum(jnp.maximum(a_ref[...], b_ref[...]),
                             jnp.maximum(c_ref[...], d_ref[...]))


def maxpool2x2_nhwc(x):
    B, H, W, C = x.shape
    Ho, Wo = H // 2, W // 2
    # Lane-dense layout: [B*Ho, Wo*C] keeps the kernel's last dim a multiple of
    # 128 (768 here), so the stores are full-width instead of masked vst.msk.
    M, N = B * Ho, Wo * C
    a = x[:, 0::2, 0::2, :].reshape(M, N)
    b = x[:, 0::2, 1::2, :].reshape(M, N)
    c = x[:, 1::2, 0::2, :].reshape(M, N)
    d = x[:, 1::2, 1::2, :].reshape(M, N)
    out = pl.pallas_call(
        _max4_kernel,
        out_shape=jax.ShapeDtypeStruct((M, N), jnp.float32),
        grid=(1,),
        in_specs=[pl.BlockSpec((M, N), lambda i: (0, 0))] * 4,
        out_specs=pl.BlockSpec((M, N), lambda i: (0, 0)),
    )(a, b, c, d)
    return out.reshape(B, Ho, Wo, C)


def _fc_tail_kernel(x_ref, w2_ref, b2_ref, w3_ref, b3_ref, out_ref, lin2_ref):
    """Fused fc2(+ReLU) -> fc3 -> log_softmax.  All weights live in VMEM."""
    lin2 = jnp.dot(x_ref[...], w2_ref[...], preferred_element_type=jnp.float32)
    lin2 = jnp.maximum(lin2 + b2_ref[...], 0.0)
    lin2_ref[...] = lin2
    lin3 = jnp.dot(lin2, w3_ref[...], preferred_element_type=jnp.float32)
    lin3 = lin3 + b3_ref[...]
    m = jnp.max(lin3, axis=-1, keepdims=True)
    s = lin3 - m
    lse = jnp.log(jnp.sum(jnp.exp(s), axis=-1, keepdims=True))
    out_ref[...] = s - lse


def fc_tail(lin1, w2, b2, w3, b3):
    B, H = lin1.shape
    H2, N2 = w2.shape
    N2b, N3 = w3.shape
    assert H == H2 and N2 == N2b
    return pl.pallas_call(
        _fc_tail_kernel,
        out_shape=(jax.ShapeDtypeStruct((B, N3), jnp.float32),   # log_softmax
                   jax.ShapeDtypeStruct((B, N2), jnp.float32)),  # lin2
        grid=(1,),
        in_specs=[pl.BlockSpec((B, H), lambda i: (0, 0)),
                  pl.BlockSpec((H, N2), lambda i: (0, 0)),
                  pl.BlockSpec((1, N2), lambda i: (0, 0)),
                  pl.BlockSpec((N2, N3), lambda i: (0, 0)),
                  pl.BlockSpec((1, N3), lambda i: (0, 0))],
        out_specs=[pl.BlockSpec((B, N3), lambda i: (0, 0)),
                   pl.BlockSpec((B, N2), lambda i: (0, 0))],
    )(lin1, w2, b2.reshape(1, N2), w3, b3.reshape(1, N3))


# --------------------------------- glue ------------------------------------ #

def im2col_nhwc(x, kh=3, kw=3):
    """NHWC valid-conv patches -> [B*Ho*Wo, kh*kw*C] (K order = (dh, dw, c))."""
    B, H, W, C = x.shape
    Ho, Wo = H - kh + 1, W - kw + 1
    cols = []
    for dh in range(kh):
        for dw in range(kw):
            cols.append(x[:, dh:dh + Ho, dw:dw + Wo, :])   # [B, Ho, Wo, C]
    p = jnp.stack(cols, axis=3)                            # [B, Ho, Wo, kh*kw, C]
    return p.reshape(B * Ho * Wo, kh * kw * C), (Ho, Wo)


def conv_w_to_mat(w):
    """torch conv weight [Cout, Cin, kh, kw] -> [(kh*kw*Cin), Cout] matching im2col."""
    Cout, Cin, kh, kw = w.shape
    return jnp.transpose(w, (2, 3, 1, 0)).reshape(kh * kw * Cin, Cout)


def init_params(key):
    """Parameters in the original torch layouts (conv [Cout,Cin,kh,kw], fc [out,in])."""
    ks = jax.random.split(key, 10)
    s = 0.05
    return {
        "conv1_w": jax.random.normal(ks[0], (32, 1, 3, 3), jnp.float32) * s,
        "conv1_b": jax.random.normal(ks[1], (32,), jnp.float32) * s,
        "conv2_w": jax.random.normal(ks[2], (64, 32, 3, 3), jnp.float32) * s,
        "conv2_b": jax.random.normal(ks[3], (64,), jnp.float32) * s,
        "fc1_w": jax.random.normal(ks[4], (512, 9216), jnp.float32) * s,
        "fc1_b": jax.random.normal(ks[5], (512,), jnp.float32) * s,
        "fc2_w": jax.random.normal(ks[6], (64, 512), jnp.float32) * s,
        "fc2_b": jax.random.normal(ks[7], (64,), jnp.float32) * s,
        "fc3_w": jax.random.normal(ks[8], (10, 64), jnp.float32) * s,
        "fc3_b": jax.random.normal(ks[9], (10,), jnp.float32) * s,
    }


def prepare_params(p):
    """ONE-TIME conversion of torch-layout params to kernel-friendly layouts:
       conv weights -> im2col matmul layout, fc weights pre-transposed to
       [in, out] (no per-forward .T), fc1 weight stored as bf16 (the layer is
       purely weight-streaming bound; accumulation stays f32)."""
    return {
        "conv1_wm": conv_w_to_mat(p["conv1_w"]),                 # [9, 32]
        "conv1_b": p["conv1_b"],
        "conv2_wm": conv_w_to_mat(p["conv2_w"]),                 # [288, 64]
        "conv2_b": p["conv2_b"],
        "fc1_wt": p["fc1_w"].T.astype(jnp.bfloat16),             # [9216, 512] bf16
        "fc1_b": p["fc1_b"],
        "fc2_wt": p["fc2_w"].T,                                  # [512, 64]
        "fc2_b": p["fc2_b"],
        "fc3_wt": p["fc3_w"].T,                                  # [64, 10]
        "fc3_b": p["fc3_b"],
    }


def net_forward(p, x_nchw):
    B = x_nchw.shape[0]
    x = jnp.transpose(x_nchw, (0, 2, 3, 1))                 # NCHW -> NHWC

    # conv1 (1->32, 3x3, valid) + ReLU
    # TODO(synk): fuse im2col into the conv kernel (K grid axis over the 9
    # taps via shifted-window index_map) to avoid the 9x patch expansion in HBM.
    p1, (H1, W1) = im2col_nhwc(x)                           # [B*26*26, 9]
    h1 = matmul_bias(p1, p["conv1_wm"], p["conv1_b"], relu=True, tm=CONV_TM)
    h1 = h1.reshape(B, H1, W1, 32)                          # [B, 26, 26, 32]

    # conv2 (32->64, 3x3, valid) + ReLU
    p2, (H2, W2) = im2col_nhwc(h1)                          # [B*24*24, 288]
    h2 = matmul_bias(p2, p["conv2_wm"], p["conv2_b"], relu=True, tm=CONV_TM)
    h2 = h2.reshape(B, H2, W2, 64)                          # [B, 24, 24, 64]

    # max_pool2d(2)
    pooled = maxpool2x2_nhwc(h2)                            # [B, 12, 12, 64]

    # dropout1: eval mode -> identity
    # flatten in NCHW order to match torch.flatten(x, 1) on an NCHW tensor
    x_flat = jnp.transpose(pooled, (0, 3, 1, 2)).reshape(B, -1)   # [B, 9216]

    # fc1 (+ReLU): bf16 weight streaming, f32 accumulation, 4 K steps
    lin1 = matmul_bias(x_flat, p["fc1_wt"], p["fc1_b"], relu=True, tk=FC1_TK)
    # dropout2 / dropout3: eval mode -> identity
    # fused fc2(+ReLU) -> fc3 -> log_softmax
    output, lin2 = fc_tail(lin1, p["fc2_wt"], p["fc2_b"],
                           p["fc3_wt"], p["fc3_b"])
    return output, x_flat, lin1, lin2


if __name__ == "__main__":
    key = jax.random.PRNGKey(0)
    pkey, xkey = jax.random.split(key)
    params = init_params(pkey)
    prep = prepare_params(params)       # one-time weight layout conversion
    # batch=2, 1 channel, 28x28 (fc1 in_features=9216 = 64*12*12 fixes spatial=28)
    x = jax.random.normal(xkey, (2, 1, 28, 28), jnp.float32)

    fwd = jax.jit(net_forward)
    out = fwd(prep, x)
    out = jax.block_until_ready(out)

    assert out[0].shape == (2, 10)       # log_softmax output
    assert out[1].shape == (2, 9216)     # flattened post-pool activation
    assert out[2].shape == (2, 512)      # lin1
    assert out[3].shape == (2, 64)       # lin2
    print("KERNEL_OK")
</pallas_src>

<mosaic_0001>
module attributes {stable_mosaic.version = 11 : i64} {
  func.func @_matmul_bias_direct_kernel(%arg0: i32, %arg1: memref<256x9xf32, #tpu.memory_space<vmem>>, %arg2: memref<9x32xf32, #tpu.memory_space<vmem>>, %arg3: memref<1x32xf32, #tpu.memory_space<vmem>>, %arg4: memref<256x32xf32, #tpu.memory_space<vmem>>) attributes {dimension_semantics = [#tpu.dimension_semantics<parallel>], iteration_bounds = array<i64: 6>, scalar_prefetch = 0 : i64, scratch_operands = 0 : i64, tpu.core_type = #tpu.core_type<tc>, window_params = [{transform_indices = @transform_0, window_bounds = array<i64: 256, 9>}, {pipeline_mode = #tpu.pipeline_mode<synchronous>, transform_indices = @transform_1, window_bounds = array<i64: 9, 32>}, {pipeline_mode = #tpu.pipeline_mode<synchronous>, transform_indices = @transform_2, window_bounds = array<i64: 1, 32>}, {transform_indices = @transform_3, window_bounds = array<i64: 256, 32>}]} {
    %c0 = arith.constant 0 : index
    %c0_0 = arith.constant 0 : index
    %0 = vector.load %arg1[%c0, %c0_0] : memref<256x9xf32, #tpu.memory_space<vmem>>, vector<256x9xf32>
    %c0_1 = arith.constant 0 : index
    %c0_2 = arith.constant 0 : index
    %1 = vector.load %arg2[%c0_1, %c0_2] : memref<9x32xf32, #tpu.memory_space<vmem>>, vector<9x32xf32>
    %cst = arith.constant dense<0.000000e+00> : vector<256x32xf32>
    %2 = tpu.matmul %0, %1, %cst {dimension_numbers = #tpu.dot_dimension_numbers<[1], [0], [0], [1], [0, 0, 1, 1], [], []>} : vector<256x9xf32>, vector<9x32xf32>, vector<256x32xf32> -> vector<256x32xf32>
    %c0_3 = arith.constant 0 : index
    %c0_4 = arith.constant 0 : index
    %3 = vector.load %arg3[%c0_3, %c0_4] : memref<1x32xf32, #tpu.memory_space<vmem>>, vector<1x32xf32>
    %4 = vector.broadcast %3 : vector<1x32xf32> to vector<256x32xf32>
    %5 = arith.addf %2, %4 : vector<256x32xf32>
    %cst_5 = arith.constant 0.000000e+00 : f32
    %6 = vector.broadcast %cst_5 : f32 to vector<256x32xf32>
    %7 = arith.maximumf %5, %6 : vector<256x32xf32>
    %c0_6 = arith.constant 0 : index
    %c0_7 = arith.constant 0 : index
    %8 = vector.load %arg4[%c0_6, %c0_7] : memref<256x32xf32, #tpu.memory_space<vmem>>, vector<256x32xf32>
    tpu.vector_store %arg4[%c0_6, %c0_7], %7 {strides = array<i32>} : memref<256x32xf32, #tpu.memory_space<vmem>>, vector<256x32xf32>,
    return
  }
  func.func @transform_0(%arg0: i32) -> (i32, i32) {
    %c0_i32 = arith.constant 0 : i32
    %c0_i32_0 = arith.constant 0 : i32
    return %arg0, %c0_i32 : i32, i32
  }
  func.func @transform_1(%arg0: i32) -> (i32, i32) {
    %c0_i32 = arith.constant 0 : i32
    %c0_i32_0 = arith.constant 0 : i32
    %c0_i32_1 = arith.constant 0 : i32
    return %c0_i32, %c0_i32_0 : i32, i32
  }
  func.func @transform_2(%arg0: i32) -> (i32, i32) {
    %c0_i32 = arith.constant 0 : i32
    %c0_i32_0 = arith.constant 0 : i32
    %c0_i32_1 = arith.constant 0 : i32
    return %c0_i32, %c0_i32_0 : i32, i32
  }
  func.func @transform_3(%arg0: i32) -> (i32, i32) {
    %c0_i32 = arith.constant 0 : i32
    %c0_i32_0 = arith.constant 0 : i32
    return %arg0, %c0_i32 : i32, i32
  }
}

module attributes {stable_mosaic.version = 11 : i64} {
  func.func @_matmul_bias_direct_kernel(%arg0: i32, %arg1: memref<256x288xf32, #tpu.memory_space<vmem>>, %arg2: memref<288x64xf32, #tpu.memory_space<vmem>>, %arg3: memref<1x64xf32, #tpu.memory_space<vmem>>, %arg4: memref<256x64xf32, #tpu.memory_space<vmem>>) attributes {dimension_semantics = [#tpu.dimension_semantics<parallel>], iteration_bounds = array<i64: 5>, scalar_prefetch = 0 : i64, scratch_operands = 0 : i64, tpu.core_type = #tpu.core_type<tc>, window_params = [{transform_indices = @transform_0, window_bounds = array<i64: 256, 288>}, {pipeline_mode = #tpu.pipeline_mode<synchronous>, transform_indices = @transform_1, window_bounds = array<i64: 288, 64>}, {pipeline_mode = #tpu.pipeline_mode<synchronous>, transform_indices = @transform_2, window_bounds = array<i64: 1, 64>}, {transform_indices = @transform_3, window_bounds = array<i64: 256, 64>}]} {
    %c0 = arith.constant 0 : index
    %c0_0 = arith.constant 0 : index
    %0 = vector.load %arg1[%c0, %c0_0] : memref<256x288xf32, #tpu.memory_space<vmem>>, vector<256x288xf32>
    %c0_1 = arith.constant 0 : index
    %c0_2 = arith.constant 0 : index
    %1 = vector.load %arg2[%c0_1, %c0_2] : memref<288x64xf32, #tpu.memory_space<vmem>>, vector<288x64xf32>
    %cst = arith.constant dense<0.000000e+00> : vector<256x64xf32>
    %2 = tpu.matmul %0, %1, %cst {dimension_numbers = #tpu.dot_dimension_numbers<[1], [0], [0], [1], [0, 0, 1, 1], [], []>} : vector<256x288xf32>, vector<288x64xf32>, vector<256x64xf32> -> vector<256x64xf32>
    %c0_3 = arith.constant 0 : index
    %c0_4 = arith.constant 0 : index
    %3 = vector.load %arg3[%c0_3, %c0_4] : memref<1x64xf32, #tpu.memory_space<vmem>>, vector<1x64xf32>
    %4 = vector.broadcast %3 : vector<1x64xf32> to vector<256x64xf32>
    %5 = arith.addf %2, %4 : vector<256x64xf32>
    %cst_5 = arith.constant 0.000000e+00 : f32
    %6 = vector.broadcast %cst_5 : f32 to vector<256x64xf32>
    %7 = arith.maximumf %5, %6 : vector<256x64xf32>
    %c0_6 = arith.constant 0 : index
    %c0_7 = arith.constant 0 : index
    %8 = vector.load %arg4[%c0_6, %c0_7] : memref<256x64xf32, #tpu.memory_space<vmem>>, vector<256x64xf32>
    tpu.vector_store %arg4[%c0_6, %c0_7], %7 {strides = array<i32>} : memref<256x64xf32, #tpu.memory_space<vmem>>, vector<256x64xf32>,
    return
  }
  func.func @transform_0(%arg0: i32) -> (i32, i32) {
    %c0_i32 = arith.constant 0 : i32
    %c0_i32_0 = arith.constant 0 : i32
    return %arg0, %c0_i32 : i32, i32
  }
  func.func @transform_1(%arg0: i32) -> (i32, i32) {
    %c0_i32 = arith.constant 0 : i32
    %c0_i32_0 = arith.constant 0 : i32
    %c0_i32_1 = arith.constant 0 : i32
    return %c0_i32, %c0_i32_0 : i32, i32
  }
  func.func @transform_2(%arg0: i32) -> (i32, i32) {
    %c0_i32 = arith.constant 0 : i32
    %c0_i32_0 = arith.constant 0 : i32
    %c0_i32_1 = arith.constant 0 : i32
    return %c0_i32, %c0_i32_0 : i32, i32
  }
  func.func @transform_3(%arg0: i32) -> (i32, i32) {
    %c0_i32 = arith.constant 0 : i32
    %c0_i32_0 = arith.constant 0 : i32
    return %arg0, %c0_i32 : i32, i32
  }
}

module attributes {stable_mosaic.version = 11 : i64} {
  func.func @_max4_kernel(%arg0: i32, %arg1: memref<24x768xf32, #tpu.memory_space<vmem>>, %arg2: memref<24x768xf32, #tpu.memory_space<vmem>>, %arg3: memref<24x768xf32, #tpu.memory_space<vmem>>, %arg4: memref<24x768xf32, #tpu.memory_space<vmem>>, %arg5: memref<24x768xf32, #tpu.memory_space<vmem>>) attributes {dimension_semantics = [#tpu.dimension_semantics<arbitrary>], iteration_bounds = array<i64: 1>, scalar_prefetch = 0 : i64, scratch_operands = 0 : i64, tpu.core_type = #tpu.core_type<tc>, window_params = [{pipeline_mode = #tpu.pipeline_mode<synchronous>, transform_indices = @transform_0, window_bounds = array<i64: 24, 768>}, {pipeline_mode = #tpu.pipeline_mode<synchronous>, transform_indices = @transform_1, window_bounds = array<i64: 24, 768>}, {pipeline_mode = #tpu.pipeline_mode<synchronous>, transform_indices = @transform_2, window_bounds = array<i64: 24, 768>}, {pipeline_mode = #tpu.pipeline_mode<synchronous>, transform_indices = @transform_3, window_bounds = array<i64: 24, 768>}, {pipeline_mode = #tpu.pipeline_mode<synchronous>, transform_indices = @transform_4, window_bounds = array<i64: 24, 768>}]} {
    %c0 = arith.constant 0 : index
    %c0_0 = arith.constant 0 : index
    %0 = vector.load %arg1[%c0, %c0_0] : memref<24x768xf32, #tpu.memory_space<vmem>>, vector<24x768xf32>
    %c0_1 = arith.constant 0 : index
    %c0_2 = arith.constant 0 : index
    %1 = vector.load %arg2[%c0_1, %c0_2] : memref<24x768xf32, #tpu.memory_space<vmem>>, vector<24x768xf32>
    %2 = arith.maximumf %0, %1 : vector<24x768xf32>
    %c0_3 = arith.constant 0 : index
    %c0_4 = arith.constant 0 : index
    %3 = vector.load %arg3[%c0_3, %c0_4] : memref<24x768xf32, #tpu.memory_space<vmem>>, vector<24x768xf32>
    %c0_5 = arith.constant 0 : index
    %c0_6 = arith.constant 0 : index
    %4 = vector.load %arg4[%c0_5, %c0_6] : memref<24x768xf32, #tpu.memory_space<vmem>>, vector<24x768xf32>
    %5 = arith.maximumf %3, %4 : vector<24x768xf32>
    %6 = arith.maximumf %2, %5 : vector<24x768xf32>
    %c0_7 = arith.constant 0 : index
    %c0_8 = arith.constant 0 : index
    %7 = vector.load %arg5[%c0_7, %c0_8] : memref<24x768xf32, #tpu.memory_space<vmem>>, vector<24x768xf32>
    tpu.vector_store %arg5[%c0_7, %c0_8], %6 {strides = array<i32>} : memref<24x768xf32, #tpu.memory_space<vmem>>, vector<24x768xf32>,
    return
  }
  func.func @transform_0(%arg0: i32) -> (i32, i32) {
    %c0_i32 = arith.constant 0 : i32
    %c0_i32_0 = arith.constant 0 : i32
    %c0_i32_1 = arith.constant 0 : i32
    return %c0_i32, %c0_i32_0 : i32, i32
  }
  func.func @transform_1(%arg0: i32) -> (i32, i32) {
    %c0_i32 = arith.constant 0 : i32
    %c0_i32_0 = arith.constant 0 : i32
    %c0_i32_1 = arith.constant 0 : i32
    return %c0_i32, %c0_i32_0 : i32, i32
  }
  func.func @transform_2(%arg0: i32) -> (i32, i32) {
    %c0_i32 = arith.constant 0 : i32
    %c0_i32_0 = arith.constant 0 : i32
    %c0_i32_1 = arith.constant 0 : i32
    return %c0_i32, %c0_i32_0 : i32, i32
  }
  func.func @transform_3(%arg0: i32) -> (i32, i32) {
    %c0_i32 = arith.constant 0 : i32
    %c0_i32_0 = arith.constant 0 : i32
    %c0_i32_1 = arith.constant 0 : i32
    return %c0_i32, %c0_i32_0 : i32, i32
  }
  func.func @transform_4(%arg0: i32) -> (i32, i32) {
    %c0_i32 = arith.constant 0 : i32
    %c0_i32_0 = arith.constant 0 : i32
    %c0_i32_1 = arith.constant 0 : i32
    return %c0_i32, %c0_i32_0 : i32, i32
  }
}

module attributes {stable_mosaic.version = 11 : i64} {
  func.func @_matmul_bias_acc_kernel(%arg0: i32, %arg1: i32, %arg2: memref<2x2304xf32, #tpu.memory_space<vmem>>, %arg3: memref<2304x512xbf16, #tpu.memory_space<vmem>>, %arg4: memref<1x512xf32, #tpu.memory_space<vmem>>, %arg5: memref<2x512xf32, #tpu.memory_space<vmem>>, %arg6: memref<2x512xf32, #tpu.memory_space<vmem>>) attributes {dimension_semantics = [#tpu.dimension_semantics<parallel>, #tpu.dimension_semantics<arbitrary>], iteration_bounds = array<i64: 1, 4>, scalar_prefetch = 0 : i64, scratch_operands = 1 : i64, tpu.core_type = #tpu.core_type<tc>, window_params = [{transform_indices = @transform_0, window_bounds = array<i64: 2, 2304>}, {transform_indices = @transform_1, window_bounds = array<i64: 2304, 512>}, {pipeline_mode = #tpu.pipeline_mode<synchronous>, transform_indices = @transform_2, window_bounds = array<i64: 1, 512>}, {transform_indices = @transform_3, window_bounds = array<i64: 2, 512>}]} {
    %c0_i32 = arith.constant 0 : i32
    %0 = arith.cmpi eq, %arg1, %c0_i32 : i32
    %1 = arith.extui %0 : i1 to i32
    %c0_i32_0 = arith.constant 0 : i32
    %2 = arith.cmpi ne, %1, %c0_i32_0 : i32
    scf.if %2 {
      %cst_9 = arith.constant 0.000000e+00 : f32
      %13 = vector.broadcast %cst_9 : f32 to vector<2x512xf32>
      %c0_10 = arith.constant 0 : index
      %c0_11 = arith.constant 0 : index
      %14 = vector.load %arg6[%c0_10, %c0_11] : memref<2x512xf32, #tpu.memory_space<vmem>>, vector<2x512xf32>
      tpu.vector_store %arg6[%c0_10, %c0_11], %13 {strides = array<i32>} : memref<2x512xf32, #tpu.memory_space<vmem>>, vector<2x512xf32>,
    } else {
    }
    %c0 = arith.constant 0 : index
    %c0_1 = arith.constant 0 : index
    %3 = vector.load %arg2[%c0, %c0_1] : memref<2x2304xf32, #tpu.memory_space<vmem>>, vector<2x2304xf32>
    %4 = arith.truncf %3 : vector<2x2304xf32> to vector<2x2304xbf16>
    %c0_2 = arith.constant 0 : index
    %c0_3 = arith.constant 0 : index
    %5 = vector.load %arg6[%c0_2, %c0_3] : memref<2x512xf32, #tpu.memory_space<vmem>>, vector<2x512xf32>
    %c0_4 = arith.constant 0 : index
    %c0_5 = arith.constant 0 : index
    %6 = vector.load %arg3[%c0_4, %c0_5] : memref<2304x512xbf16, #tpu.memory_space<vmem>>, vector<2304x512xbf16>
    %cst = arith.constant dense<0.000000e+00> : vector<2x512xf32>
    %7 = tpu.matmul %4, %6, %cst {dimension_numbers = #tpu.dot_dimension_numbers<[1], [0], [0], [1], [0, 0, 1, 1], [], []>} : vector<2x2304xbf16>, vector<2304x512xbf16>, vector<2x512xf32> -> vector<2x512xf32>
    %8 = arith.addf %5, %7 : vector<2x512xf32>
    %c0_6 = arith.constant 0 : index
    %c0_7 = arith.constant 0 : index
    %9 = vector.load %arg6[%c0_6, %c0_7] : memref<2x512xf32, #tpu.memory_space<vmem>>, vector<2x512xf32>
    tpu.vector_store %arg6[%c0_6, %c0_7], %8 {strides = array<i32>} : memref<2x512xf32, #tpu.memory_space<vmem>>, vector<2x512xf32>,
    %c3_i32 = arith.constant 3 : i32
    %10 = arith.cmpi eq, %arg1, %c3_i32 : i32
    %11 = arith.extui %10 : i1 to i32
    %c0_i32_8 = arith.constant 0 : i32
    %12 = arith.cmpi ne, %11, %c0_i32_8 : i32
    scf.if %12 {
      %c0_9 = arith.constant 0 : index
      %c0_10 = arith.constant 0 : index
      %13 = vector.load %arg6[%c0_9, %c0_10] : memref<2x512xf32, #tpu.memory_space<vmem>>, vector<2x512xf32>
      %c0_11 = arith.constant 0 : index
      %c0_12 = arith.constant 0 : index
      %14 = vector.load %arg4[%c0_11, %c0_12] : memref<1x512xf32, #tpu.memory_space<vmem>>, vector<1x512xf32>
      %15 = vector.broadcast %14 : vector<1x512xf32> to vector<2x512xf32>
      %16 = arith.addf %13, %15 : vector<2x512xf32>
      %cst_13 = arith.constant 0.000000e+00 : f32
      %17 = vector.broadcast %cst_13 : f32 to vector<2x512xf32>
      %18 = arith.maximumf %16, %17 : vector<2x512xf32>
      %c0_14 = arith.constant 0 : index
      %c0_15 = arith.constant 0 : index
      %19 = vector.load %arg5[%c0_14, %c0_15] : memref<2x512xf32, #tpu.memory_space<vmem>>, vector<2x512xf32>
      tpu.vector_store %arg5[%c0_14, %c0_15], %18 {strides = array<i32>} : memref<2x512xf32, #tpu.memory_space<vmem>>, vector<2x512xf32>,
    } else {
    }
    return
  }
  func.func @transform_0(%arg0: i32, %arg1: i32) -> (i32, i32) {
    %c0_i32 = arith.constant 0 : i32
    return %arg0, %arg1 : i32, i32
  }
  func.func @transform_1(%arg0: i32, %arg1: i32) -> (i32, i32) {
    %c0_i32 = arith.constant 0 : i32
    %c0_i32_0 = arith.constant 0 : i32
    return %arg1, %c0_i32 : i32, i32
  }
  func.func @transform_2(%arg0: i32, %arg1: i32) -> (i32, i32) {
    %c0_i32 = arith.constant 0 : i32
    %c0_i32_0 = arith.constant 0 : i32
    %c0_i32_1 = arith.constant 0 : i32
    return %c0_i32, %c0_i32_0 : i32, i32
  }
  func.func @transform_3(%arg0: i32, %arg1: i32) -> (i32, i32) {
    %c0_i32 = arith.constant 0 : i32
    %c0_i32_0 = arith.constant 0 : i32
    return %arg0, %c0_i32 : i32, i32
  }
}

module attributes {stable_mosaic.version = 11 : i64} {
  func.func @_fc_tail_kernel(%arg0: i32, %arg1: memref<2x512xf32, #tpu.memory_space<vmem>>, %arg2: memref<512x64xf32, #tpu.memory_space<vmem>>, %arg3: memref<1x64xf32, #tpu.memory_space<vmem>>, %arg4: memref<64x10xf32, #tpu.memory_space<vmem>>, %arg5: memref<1x10xf32, #tpu.memory_space<vmem>>, %arg6: memref<2x10xf32, #tpu.memory_space<vmem>>, %arg7: memref<2x64xf32, #tpu.memory_space<vmem>>) attributes {dimension_semantics = [#tpu.dimension_semantics<arbitrary>], iteration_bounds = array<i64: 1>, scalar_prefetch = 0 : i64, scratch_operands = 0 : i64, tpu.core_type = #tpu.core_type<tc>, window_params = [{pipeline_mode = #tpu.pipeline_mode<synchronous>, transform_indices = @transform_0, window_bounds = array<i64: 2, 512>}, {pipeline_mode = #tpu.pipeline_mode<synchronous>, transform_indices = @transform_1, window_bounds = array<i64: 512, 64>}, {pipeline_mode = #tpu.pipeline_mode<synchronous>, transform_indices = @transform_2, window_bounds = array<i64: 1, 64>}, {pipeline_mode = #tpu.pipeline_mode<synchronous>, transform_indices = @transform_3, window_bounds = array<i64: 64, 10>}, {pipeline_mode = #tpu.pipeline_mode<synchronous>, transform_indices = @transform_4, window_bounds = array<i64: 1, 10>}, {pipeline_mode = #tpu.pipeline_mode<synchronous>, transform_indices = @transform_5, window_bounds = array<i64: 2, 10>}, {pipeline_mode = #tpu.pipeline_mode<synchronous>, transform_indices = @transform_6, window_bounds = array<i64: 2, 64>}]} {
    %c0 = arith.constant 0 : index
    %c0_0 = arith.constant 0 : index
    %0 = vector.load %arg1[%c0, %c0_0] : memref<2x512xf32, #tpu.memory_space<vmem>>, vector<2x512xf32>
    %c0_1 = arith.constant 0 : index
    %c0_2 = arith.constant 0 : index
    %1 = vector.load %arg2[%c0_1, %c0_2] : memref<512x64xf32, #tpu.memory_space<vmem>>, vector<512x64xf32>
    %cst = arith.constant dense<0.000000e+00> : vector<2x64xf32>
    %2 = tpu.matmul %0, %1, %cst {dimension_numbers = #tpu.dot_dimension_numbers<[1], [0], [0], [1], [0, 0, 1, 1], [], []>} : vector<2x512xf32>, vector<512x64xf32>, vector<2x64xf32> -> vector<2x64xf32>
    %c0_3 = arith.constant 0 : index
    %c0_4 = arith.constant 0 : index
    %3 = vector.load %arg3[%c0_3, %c0_4] : memref<1x64xf32, #tpu.memory_space<vmem>>, vector<1x64xf32>
    %4 = vector.broadcast %3 : vector<1x64xf32> to vector<2x64xf32>
    %5 = arith.addf %2, %4 : vector<2x64xf32>
    %cst_5 = arith.constant 0.000000e+00 : f32
    %6 = vector.broadcast %cst_5 : f32 to vector<2x64xf32>
    %7 = arith.maximumf %5, %6 : vector<2x64xf32>
    %c0_6 = arith.constant 0 : index
    %c0_7 = arith.constant 0 : index
    %8 = vector.load %arg7[%c0_6, %c0_7] : memref<2x64xf32, #tpu.memory_space<vmem>>, vector<2x64xf32>
    tpu.vector_store %arg7[%c0_6, %c0_7], %7 {strides = array<i32>} : memref<2x64xf32, #tpu.memory_space<vmem>>, vector<2x64xf32>,
    %c0_8 = arith.constant 0 : index
    %c0_9 = arith.constant 0 : index
    %9 = vector.load %arg4[%c0_8, %c0_9] : memref<64x10xf32, #tpu.memory_space<vmem>>, vector<64x10xf32>
    %cst_10 = arith.constant dense<0.000000e+00> : vector<2x10xf32>
    %10 = tpu.matmul %7, %9, %cst_10 {dimension_numbers = #tpu.dot_dimension_numbers<[1], [0], [0], [1], [0, 0, 1, 1], [], []>} : vector<2x64xf32>, vector<64x10xf32>, vector<2x10xf32> -> vector<2x10xf32>
    %c0_11 = arith.constant 0 : index
    %c0_12 = arith.constant 0 : index
    %11 = vector.load %arg5[%c0_11, %c0_12] : memref<1x10xf32, #tpu.memory_space<vmem>>, vector<1x10xf32>
    %12 = vector.broadcast %11 : vector<1x10xf32> to vector<2x10xf32>
    %13 = arith.addf %10, %12 : vector<2x10xf32>
    %cst_13 = arith.constant dense<0xFF800000> : vector<2xf32>
    %14 = vector.multi_reduction <maximumf>, %13, %cst_13 [1] : vector<2x10xf32> to vector<2xf32>
    %15 = vector.shape_cast %14 : vector<2xf32> to vector<2x1xf32>
    %16 = vector.broadcast %15 : vector<2x1xf32> to vector<2x10xf32>
    %17 = arith.subf %13, %16 : vector<2x10xf32>
    %18 = math.exp %17 : vector<2x10xf32>
    %cst_14 = arith.constant dense<0.000000e+00> : vector<2xf32>
    %19 = vector.multi_reduction <add>, %18, %cst_14 [1] : vector<2x10xf32> to vector<2xf32>
    %20 = vector.shape_cast %19 : vector<2xf32> to vector<2x1xf32>
    %21 = math.log %20 : vector<2x1xf32>
    %22 = vector.broadcast %21 : vector<2x1xf32> to vector<2x10xf32>
    %23 = arith.subf %17, %22 : vector<2x10xf32>
    %c0_15 = arith.constant 0 : index
    %c0_16 = arith.constant 0 : index
    %24 = vector.load %arg6[%c0_15, %c0_16] : memref<2x10xf32, #tpu.memory_space<vmem>>, vector<2x10xf32>
    tpu.vector_store %arg6[%c0_15, %c0_16], %23 {strides = array<i32>} : memref<2x10xf32, #tpu.memory_space<vmem>>, vector<2x10xf32>,
    return
  }
  func.func @transform_0(%arg0: i32) -> (i32, i32) {
    %c0_i32 = arith.constant 0 : i32
    %c0_i32_0 = arith.constant 0 : i32
    %c0_i32_1 = arith.constant 0 : i32
    return %c0_i32, %c0_i32_0 : i32, i32
  }
  func.func @transform_1(%arg0: i32) -> (i32, i32) {
    %c0_i32 = arith.constant 0 : i32
    %c0_i32_0 = arith.constant 0 : i32
    %c0_i32_1 = arith.constant 0 : i32
    return %c0_i32, %c0_i32_0 : i32, i32
  }
  func.func @transform_2(%arg0: i32) -> (i32, i32) {
    %c0_i32 = arith.constant 0 : i32
    %c0_i32_0 = arith.constant 0 : i32
    %c0_i32_1 = arith.constant 0 : i32
    return %c0_i32, %c0_i32_0 : i32, i32
  }
  func.func @transform_3(%arg0: i32) -> (i32, i32) {
    %c0_i32 = arith.constant 0 : i32
    %c0_i32_0 = arith.constant 0 : i32
    %c0_i32_1 = arith.constant 0 : i32
    return %c0_i32, %c0_i32_0 : i32, i32
  }
  func.func @transform_4(%arg0: i32) -> (i32, i32) {
    %c0_i32 = arith.constant 0 : i32
    %c0_i32_0 = arith.constant 0 : i32
    %c0_i32_1 = arith.constant 0 : i32
    return %c0_i32, %c0_i32_0 : i32, i32
  }
  func.func @transform_5(%arg0: i32) -> (i32, i32) {
    %c0_i32 = arith.constant 0 : i32
    %c0_i32_0 = arith.constant 0 : i32
    %c0_i32_1 = arith.constant 0 : i32
    return %c0_i32, %c0_i32_0 : i32, i32
  }
  func.func @transform_6(%arg0: i32) -> (i32, i32) {
    %c0_i32 = arith.constant 0 : i32
    %c0_i32_0 = arith.constant 0 : i32
    %c0_i32_1 = arith.constant 0 : i32
    return %c0_i32, %c0_i32_0 : i32, i32
  }
}

</mosaic_0001>

<bundles_post_ra>
// kernel: net_forward.5
= control target key start
LH: loop header
LB: loop body
LE: loop exit
PB: predicated region body
PF: predicated region fallthrough
CT: control target
= control target key end

     0   :  { %8 = vsyncpa [#allocation3], 0  ;;  %s1877_s0 = inlined_call_operand.vmem [shape: f32[1352,9], index: 0, kind: input, shape index: {}]   ;;  %s1878_s1 = inlined_call_operand.hbm [shape: f32[9,32], index: 1, kind: input, shape index: {}]   ;;  %s1879_s2 = inlined_call_operand.hbm [shape: f32[1,32], index: 2, kind: input, shape index: {}]   ;;  %s1880_s3 = inlined_call_operand.vmem [shape: f32[1352,32], index: 3, kind: output, shape index: {}]  }
   0x1   :  { %9 = vsyncpa [#allocation5], 0  ;;  %s1461_s12 = smov 0   ;;  %s1463_s13 = smov 0  }
   0x2   :  { %s1465_s14 = smov 0  }
   0x3 LB: > { %s1474_s15 = sadd.s32 4294967295, %s1402_s14   ;;  %s1476_s16 = sadd.s32 1, %s1402_s14   ;;  %s1402_s14 = sphi %s1465_s14, %s1899_s14   ;;  %s1398_s13 = sphi %s1463_s13, %s1898_s13   ;;  %s1394_s12 = sphi %s1461_s12, %s1897_s12  }
   0x4   : > { %s87_s17 = ssub.s32 %s1402_s14, %s1476_s16  ;;  %s90_s18 = sadd.s32 1, %s1398_s13 }
   0x5   : > { %p88_p0 = scmp.eq.s32.totalorder %s87_s17, 0  ;;  %p100_p1 = scmp.ne.s32.totalorder %s1398_s13, %s1394_s12 }
   0x6   : > { %p101_p2 = scmp.eq.s32.totalorder %s1474_s15, 5  ;;  %p1014_p3 = scmp.ge.s32.totalorder %s1402_s14, 1 }
   0x7   : > { %s1484_s19 = scalar_select %p88_p0, %s1398_s13, %s90_s18  }
   0x8   : > { %p1486_p4 = por %p101_p2, %p100_p1  ;;  %p114_p5 = scmp.lt.s32.totalorder %s1402_s14, 7 }
   0x9   : > { %p1881_p6 = scmp.eq.s32.totalorder %s1474_s15, 0  ;;  %s1436_s22 = smov [#allocation2]  }
   0xa   : > { %s1883_s20 = scalar_select %p1486_p4, 1, 0 }
   0xb   : > { %p1491_p7 = pnand %p1014_p3, %p114_p5  ;;  %s126_s23 = sshll.u32 %s1436_s22, 4  ;;  %s127_s23 = int_to_ptr.vmem [resolvable:$true] %s126_s23 }
   0xc   : > { %s1437_s25 = smov [#allocation4]   ;;  %s1284_s29 = scalar_lea.hbm %s1878_s1, 256 }
   0xd   : > { %s1884_s21 = scalar_select %p1491_p7, 1, 0 }
   0xe   : > { %p1180_p8 = pneg %p1491_p7  ;;  %s140_s26 = sshll.u32 %s1437_s25, 4  ;;  %s1503_s26 = int_to_ptr.vmem [resolvable:$true] %s140_s26 }
   0xf   : > { %p1285_p10 = scmp.ne.s32.totalorder %s1878_s1, %s1284_s29  ;;  %p1291_p0 = scmp.lt.u32.totalorder %s1284_s29, %s1878_s1 }
  0x10   : > { %p1499_p9 = pnand %p1881_p6, %p1180_p8 }
  0x12   : > { %p1286_p11 = pneg %p1499_p9 }
  0x14   : > { %p1287_p12 = pnand %p1286_p11, %p1285_p10 }
  0x16   : > { %p1288_p13 = pneg %p1287_p12 }
  0x18   : > { %p1293_p1 = pnand %p1291_p0, %p1288_p13 }
  0x1a   : > { %1296 = shalt.err (!%p1293_p1)
}
  0x1b   : > { %s1297_s7 = scalar_lea.vmem %s127_s23, 256  ;;  %p1305_p8 = scmp.lt.s32.totalorder %s127_s23, %s127_s23 }
  0x1c   : > { %p1298_p2 = scmp.ne.s32.totalorder %s127_s23, %s1297_s7  ;;  %p1306_p6 = scmp.lt.s32.totalorder %s1297_s7, %s1297_s7 }
  0x1e   : > { %p1300_p3 = pnand %p1298_p2, %p1286_p11  ;;  %p1307_p4 = por %p1306_p6, %p1305_p8 }
  0x20   : > { %p1301_p5 = pneg %p1300_p3 }
  0x22   : > { %p1308_p7 = pnand %p1307_p4, %p1301_p5 }
  0x24   : > { %1311 = shalt.err (!%p1308_p7)
}
  0x25   : > { %s1438_s8 = smov 128   ;;  %s1439_s9 = smov 8  }
  0x26   : > { %1183 = dma.hbm_to_vmem [thread:$0]  (!%p1499_p9), %s1878_s1, 256, %s127_s23, [#allocation3], %s1438_s8, %s1438_s8, %s1439_s9  }
  0x27   : > { %s1312_s18 = scalar_lea.hbm %s1879_s2, 16 }
  0x28   : > { %p1313_p10 = scmp.ne.s32.totalorder %s1879_s2, %s1312_s18  ;;  %p1319_p7 = scmp.lt.u32.totalorder %s1312_s18, %s1879_s2 }
  0x2a   : > { %p1315_p4 = pnand %p1313_p10, %p1286_p11 }
  0x2c   : > { %p1316_p6 = pneg %p1315_p4 }
  0x2e   : > { %p1321_p12 = pnand %p1319_p7, %p1316_p6 }
  0x30   : > { %1324 = shalt.err (!%p1321_p12)
}
  0x31   : > { %s1325_s23 = scalar_lea.vmem %s1503_s26, 16  ;;  %s1332_s29 = scalar_lea.vmem %s1503_s26, 32 }
  0x32   : > { %p1326_p13 = scmp.ne.s32.totalorder %s1503_s26, %s1325_s23  ;;  %p1333_p2 = scmp.lt.s32.totalorder %s1503_s26, %s1503_s26 }
  0x33   : > { %p1334_p3 = scmp.lt.s32.totalorder %s1332_s29, %s1325_s23 }
  0x34   : > { %p1328_p0 = pnand %p1326_p13, %p1286_p11 }
  0x35   : > { %p1335_p5 = por %p1334_p3, %p1333_p2 }
  0x36   : > { %p1329_p1 = pneg %p1328_p0 }
  0x38   : > { %p1336_p8 = pnand %p1335_p5, %p1329_p1 }
  0x3a   : > { %1339 = shalt.err (!%p1336_p8)
}
  0x3b   : > { %1186 = dma.hbm_to_vmem [thread:$0]  (!%p1499_p9), %s1879_s2, 16, %s1503_s26, [#allocation5]  }
  0x3c   : > { %p1886_p10 = scmp.ne.s32.totalorder %s1884_s21, 0 }
  0x3d   : > { %p1887_p11 = scmp.eq.s32.totalorder (!%p1886_p10), %s1474_s15, 0 }
  0x3e   : > { %170 = sbr.rel (%p1886_p10) target bundleno = 386 (0x182), region = 32 }
  0x45   : > { %1385 = dma.done.wait (%p1887_p11), [#allocation3], 256   ;;  %p1888_p4 = pmov %p1887_p11 }
  0x47   : > { %1387 = vsyncadd (%p1888_p4), [#allocation3], 4294967040  ;;  %p1889_p6 = pmov %p1888_p4 }
  0x48   : > { %p1890_p7 = pmov %p1888_p4 }
  0x49   : > { %1389 = dma.done.wait (%p1889_p6), [#allocation5], 16  }
  0x4a   : > { %1391 = vsyncadd (%p1890_p7), [#allocation5], 4294967280  ;;  %s1564_s24 = sshll.u32 %s1474_s15, 5  ;;  %vm358_vm0 = vcmask 1040384   ;;  %vm261_vm1 = vcmask 72704   ;;  %vm1440_vm2 = vmmov 1  }
  0x4b   : > { %p206_p9 = scmp.lt.s32.totalorder %s1564_s24, 168  ;;  %vm1165_vm3 = vmpackc.low %vm358_vm0, %vm1440_vm2  ;;  %v252_v0 = vld [vmem:[#allocation2] sm:$0xff]  ;;  %v253_v1 = vld [vmem:[#allocation2 + $0x8] sm:$0x1]  ;;  %s198_s8 = sand.u32 1, %s1394_s12   ;;  %vm619_vm4 = vcmask 261120  }
  0x4c   : > { %v1164_v3 = vpack.c.bf16 %v253_v1, %v252_v0  ;;  %v1638_v35 = vld [vmem:[#allocation4] ss:$0 sm:$0xff]  ;;  %s1021_s9 = sshll.u32 %s198_s8, 8  ;;  %p1891_p12 = scmp.ne.s32.totalorder %s1883_s20, 0 }
  0x4d   : > { %s207_s21 = scalar_select %p206_p9, %s1564_s24, 168 }
  0x4e   : > { %1166 = vmatprep.subr.msk.bf16.mxu0 %vm1165_vm3, %v1164_v3  ;;  %1170 = vmatprep.subr.msk.bf16.mxu1 %vm1165_vm3, %v1164_v3  ;;  %s1644_s12 = scalar_lea.vmem [#allocation6], %s1021_s9   ;;  %s660_s10 = ssub.s32 (%p1891_p12), 169, %s1564_s24 }
  0x4f   : > { %s1023_s26 = sshll.u32 %s207_s21, 3  ;;  %1169 = vmatpush3.bf16.msk.msra.mxu0 %vm1165_vm3, %v1164_v3  ;;  %1171 = vmatpush3.bf16.msk.msra.mxu1 %vm1165_vm3, %v1164_v3  ;;  %s1075_s11 = sshll.u32 (%p1891_p12), %s1474_s15, 8 }
  0x50   : > { %s1571_s7 = scalar_lea.vmem %s1877_s0, %s1023_s26  ;;  %p661_p13 = scmp.lt.s32.totalorder (%p1891_p12), %s660_s10, 32 }
  0x51   : > { %v220_v2 = vld [vmem:[%s1571_s7] sm:$0xff]  ;;  %v221_v5 = vld [vmem:[%s1571_s7 + $0x8] sm:$0xff]  ;;  %v222_v7 = vld [vmem:[%s1571_s7 + $0x10] sm:$0xff]  ;;  %s1745_s18 = scalar_lea.vmem (%p1891_p12), %s1880_s3, %s1075_s11  }
  0x52   : > { %1116 = vmatprep.mubr.msk.f32.mxu0 %vm261_vm1, %v220_v2  ;;  %v236_v4 = vld [vmem:[%s1571_s7 + $0x80] sm:$0xff]  ;;  %v237_v6 = vld [vmem:[%s1571_s7 + $0x88] sm:$0xff]  ;;  %v238_v8 = vld [vmem:[%s1571_s7 + $0x90] sm:$0xff] }
  0x53   : > { %1140 = vmatprep.mubr.msk.f32.mxu1 %vm261_vm1, %v236_v4  ;;  %1117 = vmatmul.mubr.msk.f32.vlgmr.msra.gmra.mrb[0].mxu0 %vm261_vm1, %v221_v5  ;;  %v223_v9 = vld [vmem:[%s1571_s7 + $0x18] sm:$0xff]  ;;  %v224_v11 = vld [vmem:[%s1571_s7 + $0x20] sm:$0xff]  ;;  %v225_v13 = vld [vmem:[%s1571_s7 + $0x28] sm:$0xff] }
  0x54   : > { %1141 = vmatmul.mubr.msk.f32.vlgmr.msra.gmra.mrb[0].mxu1 %vm261_vm1, %v237_v6  ;;  %1119 = vmatprep.mubr.msk.f32.mxu0 %vm261_vm1, %v222_v7  ;;  %v239_v10 = vld [vmem:[%s1571_s7 + $0x98] sm:$0xff]  ;;  %v240_v12 = vld [vmem:[%s1571_s7 + $0xa0] sm:$0xff]  ;;  %v241_v14 = vld [vmem:[%s1571_s7 + $0xa8] sm:$0xff] }
  0x55   : > { %1143 = vmatprep.mubr.msk.f32.mxu1 %vm261_vm1, %v238_v8  ;;  %v226_v15 = vld [vmem:[%s1571_s7 + $0x30] sm:$0xff]  ;;  %v227_v17 = vld [vmem:[%s1571_s7 + $0x38] sm:$0xff]  ;;  %v228_v19 = vld [vmem:[%s1571_s7 + $0x40] sm:$0xff] }
  0x56   : > { %v242_v16 = vld [vmem:[%s1571_s7 + $0xb0] sm:$0xff]  ;;  %v243_v18 = vld [vmem:[%s1571_s7 + $0xb8] sm:$0xff]  ;;  %v244_v20 = vld [vmem:[%s1571_s7 + $0xc0] sm:$0xff] }
  0x57   : > { %1120 = vmatmul.mubr.msk.f32.gmra.mrb[2].mxu0 %vm261_vm1, %v223_v9  ;;  %v229_v21 = vld [vmem:[%s1571_s7 + $0x48] sm:$0xff]  ;;  %v230_v23 = vld [vmem:[%s1571_s7 + $0x50] sm:$0xff]  ;;  %v231_v25 = vld [vmem:[%s1571_s7 + $0x58] sm:$0xff] }
  0x58   : > { %1144 = vmatmul.mubr.msk.f32.gmra.mrb[2].mxu1 %vm261_vm1, %v239_v10  ;;  %1122 = vmatprep.mubr.msk.f32.mxu0 %vm261_vm1, %v224_v11  ;;  %v245_v22 = vld [vmem:[%s1571_s7 + $0xc8] sm:$0xff]  ;;  %v246_v24 = vld [vmem:[%s1571_s7 + $0xd0] sm:$0xff]  ;;  %v247_v26 = vld [vmem:[%s1571_s7 + $0xd8] sm:$0xff] }
  0x59   : > { %1146 = vmatprep.mubr.msk.f32.mxu1 %vm261_vm1, %v240_v12  ;;  %v232_v27 = vld [vmem:[%s1571_s7 + $0x60] sm:$0xff]  ;;  %v233_v29 = vld [vmem:[%s1571_s7 + $0x68] sm:$0xff]  ;;  %v234_v31 = vld [vmem:[%s1571_s7 + $0x70] sm:$0xff] }
  0x5a   : > { %v248_v28 = vld [vmem:[%s1571_s7 + $0xe0] sm:$0xff]  ;;  %v249_v30 = vld [vmem:[%s1571_s7 + $0xe8] sm:$0xff]  ;;  %v250_v32 = vld [vmem:[%s1571_s7 + $0xf0] sm:$0xff] }
  0x5b   : > { %1123 = vmatmul.mubr.msk.f32.gmra.mrb[4].mxu0 %vm261_vm1, %v225_v13  ;;  %v235_v33 = vld [vmem:[%s1571_s7 + $0x78] sm:$0xff] }
  0x5c   : > { %1147 = vmatmul.mubr.msk.f32.gmra.mrb[4].mxu1 %vm261_vm1, %v241_v14  ;;  %1125 = vmatprep.mubr.msk.f32.mxu0 %vm261_vm1, %v226_v15  ;;  %v251_v34 = vld [vmem:[%s1571_s7 + $0xf8] sm:$0xff] }
  0x5d   : > { %1149 = vmatprep.mubr.msk.f32.mxu1 %vm261_vm1, %v242_v16 }
  0x5f   : > { %1126 = vmatmul.mubr.msk.f32.gmra.mrb[6].mxu0 %vm261_vm1, %v227_v17 }
  0x60   : > { %1150 = vmatmul.mubr.msk.f32.gmra.mrb[6].mxu1 %vm261_vm1, %v243_v18  ;;  %1128 = vmatprep.mubr.msk.f32.mxu0 %vm261_vm1, %v228_v19 }
  0x61   : > { %1152 = vmatprep.mubr.msk.f32.mxu1 %vm261_vm1, %v244_v20 }
  0x63   : > { %1129 = vmatmul.mubr.msk.f32.gmra.mrb[8].mxu0 %vm261_vm1, %v229_v21 }
  0x64   : > { %1153 = vmatmul.mubr.msk.f32.gmra.mrb[8].mxu1 %vm261_vm1, %v245_v22  ;;  %1131 = vmatprep.mubr.msk.f32.mxu0 %vm261_vm1, %v230_v23 }
  0x65   : > { %1155 = vmatprep.mubr.msk.f32.mxu1 %vm261_vm1, %v246_v24 }
  0x67   : > { %1132 = vmatmul.mubr.msk.f32.gmra.mrb[10].mxu0 %vm261_vm1, %v231_v25 }
  0x68   : > { %1156 = vmatmul.mubr.msk.f32.gmra.mrb[10].mxu1 %vm261_vm1, %v247_v26  ;;  %1134 = vmatprep.mubr.msk.f32.mxu0 %vm261_vm1, %v232_v27 }
  0x69   : > { %1158 = vmatprep.mubr.msk.f32.mxu1 %vm261_vm1, %v248_v28 }
  0x6b   : > { %1135 = vmatmul.mubr.msk.f32.gmra.mrb[12].mxu0 %vm261_vm1, %v233_v29 }
  0x6c   : > { %1159 = vmatmul.mubr.msk.f32.gmra.mrb[12].mxu1 %vm261_vm1, %v249_v30  ;;  %1137 = vmatprep.mubr.msk.f32.mxu0 %vm261_vm1, %v234_v31 }
  0x6d   : > { %1161 = vmatprep.mubr.msk.f32.mxu1 %vm261_vm1, %v250_v32 }
  0x6f   : > { %1138 = vmatmul.mubr.msk.f32.gmra.mrb[14].mxu0 %vm261_vm1, %v235_v33 }
  0x70   : > { %1162 = vmatmul.mubr.msk.f32.gmra.mrb[14].mxu1 %vm261_vm1, %v251_v34 }
 0x126   : > { %v1118_v36 = vpop.f32.mrb[0].mxu0 }
 0x127   : > { %v1142_v37 = vpop.f32.mrb[0].mxu1  ;;  %v434_v38 = vadd.f32 %v1118_v36, %v1638_v35  ;;  %v428_v40 = vpop.f32.mrb[1].mxu0 }
 0x128   : > { %v514_v39 = vadd.f32 %v1142_v37, %v1638_v35  ;;  %v508_v41 = vpop.f32.mrb[1].mxu1  ;;  %v429_v42 = vadd.f32 %v1638_v35, %v428_v40 }
 0x129   : > { %v509_v43 = vadd.f32 %v1638_v35, %v508_v41  ;;  %v588_v44 = vmax.f32 %v434_v38, 0.0 }
 0x12a   : > { %v604_v45 = vmax.f32 %v514_v39, 0.0  ;;  %v587_v46 = vmax.f32 %v429_v42, 0.0  ;;  %v1121_v48 = vpop.f32.mrb[2].mxu0 }
 0x12b   : > { %v603_v47 = vmax.f32 %v509_v43, 0.0  ;;  %v1145_v49 = vpop.f32.mrb[2].mxu1  ;;  %621 = vst.msk [vmem:[%s1644_s12 + $0x8] sm:$0xff] %vm619_vm4, %v588_v44  ;;  %v444_v50 = vadd.f32 %v1121_v48, %v1638_v35  ;;  %v438_v52 = vpop.f32.mrb[3].mxu0 }
 0x12c   : > { %637 = vst.msk [vmem:[%s1644_s12 + $0x88] sm:$0xff] %vm619_vm4, %v604_v45  ;;  %v524_v51 = vadd.f32 %v1145_v49, %v1638_v35  ;;  %v518_v53 = vpop.f32.mrb[3].mxu1  ;;  %620 = vst.msk [vmem:[%s1644_s12] sm:$0xff] %vm619_vm4, %v587_v46  ;;  %v439_v54 = vadd.f32 %v1638_v35, %v438_v52 }
 0x12d   : > { %636 = vst.msk [vmem:[%s1644_s12 + $0x80] sm:$0xff] %vm619_vm4, %v603_v47  ;;  %v519_v55 = vadd.f32 %v1638_v35, %v518_v53  ;;  %v590_v56 = vmax.f32 %v444_v50, 0.0 }
 0x12e   : > { %v606_v57 = vmax.f32 %v524_v51, 0.0  ;;  %v589_v58 = vmax.f32 %v439_v54, 0.0  ;;  %v1124_v60 = vpop.f32.mrb[4].mxu0 }
 0x12f   : > { %v605_v59 = vmax.f32 %v519_v55, 0.0  ;;  %v1148_v61 = vpop.f32.mrb[4].mxu1  ;;  %623 = vst.msk [vmem:[%s1644_s12 + $0x18] sm:$0xff] %vm619_vm4, %v590_v56  ;;  %v454_v62 = vadd.f32 %v1124_v60, %v1638_v35  ;;  %v448_v0 = vpop.f32.mrb[5].mxu0 }
 0x130   : > { %639 = vst.msk [vmem:[%s1644_s12 + $0x98] sm:$0xff] %vm619_vm4, %v606_v57  ;;  %v534_v63 = vadd.f32 %v1148_v61, %v1638_v35  ;;  %v528_v1 = vpop.f32.mrb[5].mxu1  ;;  %622 = vst.msk [vmem:[%s1644_s12 + $0x10] sm:$0xff] %vm619_vm4, %v589_v58  ;;  %v449_v2 = vadd.f32 %v1638_v35, %v448_v0 }
 0x131   : > { %638 = vst.msk [vmem:[%s1644_s12 + $0x90] sm:$0xff] %vm619_vm4, %v605_v59  ;;  %v529_v3 = vadd.f32 %v1638_v35, %v528_v1  ;;  %v592_v4 = vmax.f32 %v454_v62, 0.0 }
 0x132   : > { %v608_v5 = vmax.f32 %v534_v63, 0.0  ;;  %v591_v6 = vmax.f32 %v449_v2, 0.0  ;;  %v1127_v8 = vpop.f32.mrb[6].mxu0 }
 0x133   : > { %v607_v7 = vmax.f32 %v529_v3, 0.0  ;;  %v1151_v9 = vpop.f32.mrb[6].mxu1  ;;  %625 = vst.msk [vmem:[%s1644_s12 + $0x28] sm:$0xff] %vm619_vm4, %v592_v4  ;;  %v464_v10 = vadd.f32 %v1127_v8, %v1638_v35  ;;  %v458_v12 = vpop.f32.mrb[7].mxu0 }
 0x134   : > { %641 = vst.msk [vmem:[%s1644_s12 + $0xa8] sm:$0xff] %vm619_vm4, %v608_v5  ;;  %v544_v11 = vadd.f32 %v1151_v9, %v1638_v35  ;;  %v538_v13 = vpop.f32.mrb[7].mxu1  ;;  %624 = vst.msk [vmem:[%s1644_s12 + $0x20] sm:$0xff] %vm619_vm4, %v591_v6  ;;  %v459_v14 = vadd.f32 %v1638_v35, %v458_v12 }
 0x135   : > { %640 = vst.msk [vmem:[%s1644_s12 + $0xa0] sm:$0xff] %vm619_vm4, %v607_v7  ;;  %v539_v15 = vadd.f32 %v1638_v35, %v538_v13  ;;  %v594_v16 = vmax.f32 %v464_v10, 0.0 }
 0x136   : > { %v610_v17 = vmax.f32 %v544_v11, 0.0  ;;  %v593_v18 = vmax.f32 %v459_v14, 0.0  ;;  %v1130_v20 = vpop.f32.mrb[8].mxu0 }
 0x137   : > { %v609_v19 = vmax.f32 %v539_v15, 0.0  ;;  %v1154_v21 = vpop.f32.mrb[8].mxu1  ;;  %627 = vst.msk [vmem:[%s1644_s12 + $0x38] sm:$0xff] %vm619_vm4, %v594_v16  ;;  %v474_v22 = vadd.f32 %v1130_v20, %v1638_v35  ;;  %v468_v24 = vpop.f32.mrb[9].mxu0 }
 0x138   : > { %643 = vst.msk [vmem:[%s1644_s12 + $0xb8] sm:$0xff] %vm619_vm4, %v610_v17  ;;  %v554_v23 = vadd.f32 %v1154_v21, %v1638_v35  ;;  %v548_v25 = vpop.f32.mrb[9].mxu1  ;;  %626 = vst.msk [vmem:[%s1644_s12 + $0x30] sm:$0xff] %vm619_vm4, %v593_v18  ;;  %v469_v26 = vadd.f32 %v1638_v35, %v468_v24 }
 0x139   : > { %642 = vst.msk [vmem:[%s1644_s12 + $0xb0] sm:$0xff] %vm619_vm4, %v609_v19  ;;  %v549_v27 = vadd.f32 %v1638_v35, %v548_v25  ;;  %v596_v28 = vmax.f32 %v474_v22, 0.0 }
 0x13a   : > { %v612_v29 = vmax.f32 %v554_v23, 0.0  ;;  %v595_v30 = vmax.f32 %v469_v26, 0.0  ;;  %v1133_v32 = vpop.f32.mrb[10].mxu0 }
 0x13b   : > { %v611_v31 = vmax.f32 %v549_v27, 0.0  ;;  %v1157_v33 = vpop.f32.mrb[10].mxu1  ;;  %629 = vst.msk [vmem:[%s1644_s12 + $0x48] sm:$0xff] %vm619_vm4, %v596_v28  ;;  %v484_v34 = vadd.f32 %v1133_v32, %v1638_v35  ;;  %v478_v37 = vpop.f32.mrb[11].mxu0 }
 0x13c   : > { %645 = vst.msk [vmem:[%s1644_s12 + $0xc8] sm:$0xff] %vm619_vm4, %v612_v29  ;;  %v564_v36 = vadd.f32 %v1157_v33, %v1638_v35  ;;  %v558_v38 = vpop.f32.mrb[11].mxu1  ;;  %628 = vst.msk [vmem:[%s1644_s12 + $0x40] sm:$0xff] %vm619_vm4, %v595_v30  ;;  %v479_v39 = vadd.f32 %v1638_v35, %v478_v37 }
 0x13d   : > { %644 = vst.msk [vmem:[%s1644_s12 + $0xc0] sm:$0xff] %vm619_vm4, %v611_v31  ;;  %v559_v40 = vadd.f32 %v1638_v35, %v558_v38  ;;  %v598_v41 = vmax.f32 %v484_v34, 0.0 }
 0x13e   : > { %v614_v42 = vmax.f32 %v564_v36, 0.0  ;;  %v597_v43 = vmax.f32 %v479_v39, 0.0  ;;  %v1136_v45 = vpop.f32.mrb[12].mxu0 }
 0x13f   : > { %v613_v44 = vmax.f32 %v559_v40, 0.0  ;;  %v1160_v46 = vpop.f32.mrb[12].mxu1  ;;  %631 = vst.msk [vmem:[%s1644_s12 + $0x58] sm:$0xff] %vm619_vm4, %v598_v41  ;;  %v494_v47 = vadd.f32 %v1136_v45, %v1638_v35  ;;  %v488_v49 = vpop.f32.mrb[13].mxu0 }
 0x140   : > { %647 = vst.msk [vmem:[%s1644_s12 + $0xd8] sm:$0xff] %vm619_vm4, %v614_v42  ;;  %v574_v48 = vadd.f32 %v1160_v46, %v1638_v35  ;;  %v568_v50 = vpop.f32.mrb[13].mxu1  ;;  %630 = vst.msk [vmem:[%s1644_s12 + $0x50] sm:$0xff] %vm619_vm4, %v597_v43  ;;  %v489_v51 = vadd.f32 %v1638_v35, %v488_v49 }
 0x141   : > { %646 = vst.msk [vmem:[%s1644_s12 + $0xd0] sm:$0xff] %vm619_vm4, %v613_v44  ;;  %v569_v52 = vadd.f32 %v1638_v35, %v568_v50  ;;  %v600_v53 = vmax.f32 %v494_v47, 0.0 }
 0x142   : > { %v616_v54 = vmax.f32 %v574_v48, 0.0  ;;  %v599_v55 = vmax.f32 %v489_v51, 0.0  ;;  %v1139_v57 = vpop.f32.mrb[14].mxu0 }
 0x143   : > { %v615_v56 = vmax.f32 %v569_v52, 0.0  ;;  %v1163_v58 = vpop.f32.mrb[14].mxu1  ;;  %633 = vst.msk [vmem:[%s1644_s12 + $0x68] sm:$0xff] %vm619_vm4, %v600_v53  ;;  %v504_v59 = vadd.f32 %v1139_v57, %v1638_v35  ;;  %v498_v61 = vpop.f32.mrb[15].mxu0  ;;  %658 = sbr.rel (!%p1891_p12) target bundleno = 386 (0x182), region = 44 }
 0x144   : > { %649 = vst.msk [vmem:[%s1644_s12 + $0xe8] sm:$0xff] %vm619_vm4, %v616_v54  ;;  %v584_v60 = vadd.f32 %v1163_v58, %v1638_v35  ;;  %v578_v62 = vpop.f32.mrb[15].mxu1  ;;  %632 = vst.msk [vmem:[%s1644_s12 + $0x60] sm:$0xff] %vm619_vm4, %v599_v55  ;;  %v499_v63 = vadd.f32 %v1638_v35, %v498_v61 }
 0x145   : > { %648 = vst.msk [vmem:[%s1644_s12 + $0xe0] sm:$0xff] %vm619_vm4, %v615_v56  ;;  %v579_v0 = vadd.f32 %v1638_v35, %v578_v62  ;;  %v602_v1 = vmax.f32 %v504_v59, 0.0 }
 0x146   : > { %v618_v2 = vmax.f32 %v584_v60, 0.0  ;;  %v601_v3 = vmax.f32 %v499_v63, 0.0 }
 0x147   : > { %v617_v4 = vmax.f32 %v579_v0, 0.0  ;;  %635 = vst.msk [vmem:[%s1644_s12 + $0x78] sm:$0xff] %vm619_vm4, %v602_v1 }
 0x148   : > { %651 = vst.msk [vmem:[%s1644_s12 + $0xf8] sm:$0xff] %vm619_vm4, %v618_v2  ;;  %634 = vst.msk [vmem:[%s1644_s12 + $0x70] sm:$0xff] %vm619_vm4, %v601_v3 }
 0x149   : > { %650 = vst.msk [vmem:[%s1644_s12 + $0xf0] sm:$0xff] %vm619_vm4, %v617_v4 }
 0x14a   : > { %s1901_s10 = smov (!%p661_p13, %s660_s10), 32 }
 0x14b   : > { %s1060_s22 = sshll.u32 %s1901_s10, 7 }
 0x14c   : > { %p1063_p0 = scmp.eq.s32.totalorder %s1060_s22, 0 }
 0x14d   : > { %s1751_s25 = sshrl.u32 (!%p1063_p0), %s1901_s10, 5 }
 0x14e   : > { %669 = sbr.rel (%p1063_p0) target bundleno = 386 (0x182), region = 48  ;;  %p1064_p1 = scmp.le.s32.totalorder (!%p1063_p0), %s1751_s25, 0 }
 0x155   : > { %951 = sbr.rel (%p1064_p1) target bundleno = 365 (0x16d), region = 125  ;;  %s1892_s15 = smov (!%p1064_p1), %s1745_s18 }
 0x156   : > { %s1893_s20 = smov (!%p1064_p1), %s1644_s12  ;;  %s1760_s27 = smov (!%p1064_p1), 0  }
 0x157   : > { %s1762_s28 = smov (!%p1064_p1), 0  }
 0x15c LB: >> { %v793_v35 = vld [vmem:[%s1410_s20] sm:$0xff]  ;;  %v795_v5 = vld [vmem:[%s1410_s20 + $0x8] sm:$0xff]  ;;  %v797_v6 = vld [vmem:[%s1410_s20 + $0x10] sm:$0xff]  ;;  %s857_s23 = sadd.s32 1, %s1414_s27  ;;  %s787_s28 = sadd.s32 1, %s1418_s28   ;;  %s1418_s28 = sphi %s1762_s28, %s787_s28   ;;  %s1414_s27 = sphi %s1760_s27, %s1896_s27   ;;  %s1410_s20 = sphi %s1893_s20, %s1895_s20   ;;  %s1406_s15 = sphi %s1892_s15, %s1894_s15  }
 0x15d   : >> { %794 = vst [vmem:[%s1406_s15] sm:$0xff] %v793_v35  ;;  %796 = vst [vmem:[%s1406_s15 + $0x8] sm:$0xff] %v795_v5  ;;  %v799_v7 = vld [vmem:[%s1410_s20 + $0x18] sm:$0xff]  ;;  %v801_v8 = vld [vmem:[%s1410_s20 + $0x20] sm:$0xff]  ;;  %p858_p2 = scmp.ge.s32.totalorder %s857_s23, %s1751_s25  ;;  %p786_p3 = scmp.ge.s32.totalorder %s787_s28, %s1751_s25 }
 0x15e   : >> { %798 = vst [vmem:[%s1406_s15 + $0x10] sm:$0xff] %v797_v6  ;;  %v803_v9 = vld [vmem:[%s1410_s20 + $0x28] sm:$0xff]  ;;  %800 = vst [vmem:[%s1406_s15 + $0x18] sm:$0xff] %v799_v7  ;;  %v805_v10 = vld [vmem:[%s1410_s20 + $0x30] sm:$0xff] }
 0x15f   : >> { %802 = vst [vmem:[%s1406_s15 + $0x20] sm:$0xff] %v801_v8  ;;  %804 = vst [vmem:[%s1406_s15 + $0x28] sm:$0xff] %v803_v9  ;;  %v807_v11 = vld [vmem:[%s1410_s20 + $0x38] sm:$0xff]  ;;  %v809_v12 = vld [vmem:[%s1410_s20 + $0x40] sm:$0xff]  ;;  %s1903_s23 = smov (%p858_p2, %s857_s23), 0 }
 0x160   : >> { %806 = vst [vmem:[%s1406_s15 + $0x30] sm:$0xff] %v805_v10  ;;  %808 = vst [vmem:[%s1406_s15 + $0x38] sm:$0xff] %v807_v11  ;;  %v811_v13 = vld [vmem:[%s1410_s20 + $0x48] sm:$0xff]  ;;  %v813_v14 = vld [vmem:[%s1410_s20 + $0x50] sm:$0xff]  ;;  %s1065_s29 = sshll.u32 %s1903_s23, 8  ;;  %s1896_s27 = smov %s1903_s23 }
 0x161   : >> { %810 = vst [vmem:[%s1406_s15 + $0x40] sm:$0xff] %v809_v12  ;;  %v815_v15 = vld [vmem:[%s1410_s20 + $0x58] sm:$0xff]  ;;  %812 = vst [vmem:[%s1406_s15 + $0x48] sm:$0xff] %v811_v13  ;;  %v817_v16 = vld [vmem:[%s1410_s20 + $0x60] sm:$0xff]  ;;  %s1818_s30 = scalar_lea.vmem %s1644_s12, %s1065_s29 [#allocation6]   ;;  %s863_s4 = scalar_lea.vmem %s1745_s18, %s1065_s29  }
 0x162   : >> { %814 = vst [vmem:[%s1406_s15 + $0x50] sm:$0xff] %v813_v14  ;;  %816 = vst [vmem:[%s1406_s15 + $0x58] sm:$0xff] %v815_v15  ;;  %v819_v17 = vld [vmem:[%s1410_s20 + $0x68] sm:$0xff]  ;;  %v821_v18 = vld [vmem:[%s1410_s20 + $0x70] sm:$0xff] }
 0x163   : >> { %818 = vst [vmem:[%s1406_s15 + $0x60] sm:$0xff] %v817_v16  ;;  %820 = vst [vmem:[%s1406_s15 + $0x68] sm:$0xff] %v819_v17  ;;  %v823_v19 = vld [vmem:[%s1410_s20 + $0x78] sm:$0xff]  ;;  %v825_v20 = vld [vmem:[%s1410_s20 + $0x80] sm:$0xff] }
 0x164   : >> { %822 = vst [vmem:[%s1406_s15 + $0x70] sm:$0xff] %v821_v18  ;;  %v827_v21 = vld [vmem:[%s1410_s20 + $0x88] sm:$0xff]  ;;  %824 = vst [vmem:[%s1406_s15 + $0x78] sm:$0xff] %v823_v19  ;;  %v829_v22 = vld [vmem:[%s1410_s20 + $0x90] sm:$0xff] }
 0x165   : >> { %826 = vst [vmem:[%s1406_s15 + $0x80] sm:$0xff] %v825_v20  ;;  %828 = vst [vmem:[%s1406_s15 + $0x88] sm:$0xff] %v827_v21  ;;  %v831_v23 = vld [vmem:[%s1410_s20 + $0x98] sm:$0xff]  ;;  %v833_v24 = vld [vmem:[%s1410_s20 + $0xa0] sm:$0xff] }
 0x166   : >> { %830 = vst [vmem:[%s1406_s15 + $0x90] sm:$0xff] %v829_v22  ;;  %832 = vst [vmem:[%s1406_s15 + $0x98] sm:$0xff] %v831_v23  ;;  %v835_v25 = vld [vmem:[%s1410_s20 + $0xa8] sm:$0xff]  ;;  %v837_v26 = vld [vmem:[%s1410_s20 + $0xb0] sm:$0xff]  ;;  %789 = sbr.rel (!%p786_p3) target bundleno = 348 (0x15c), region = 131 }
 0x167   : >> { %834 = vst [vmem:[%s1406_s15 + $0xa0] sm:$0xff] %v833_v24  ;;  %v839_v27 = vld [vmem:[%s1410_s20 + $0xb8] sm:$0xff]  ;;  %836 = vst [vmem:[%s1406_s15 + $0xa8] sm:$0xff] %v835_v25  ;;  %v841_v28 = vld [vmem:[%s1410_s20 + $0xc0] sm:$0xff] }
 0x168   : >> { %838 = vst [vmem:[%s1406_s15 + $0xb0] sm:$0xff] %v837_v26  ;;  %840 = vst [vmem:[%s1406_s15 + $0xb8] sm:$0xff] %v839_v27  ;;  %v843_v29 = vld [vmem:[%s1410_s20 + $0xc8] sm:$0xff]  ;;  %v845_v30 = vld [vmem:[%s1410_s20 + $0xd0] sm:$0xff] }
 0x169   : >> { %842 = vst [vmem:[%s1406_s15 + $0xc0] sm:$0xff] %v841_v28  ;;  %844 = vst [vmem:[%s1406_s15 + $0xc8] sm:$0xff] %v843_v29  ;;  %v847_v31 = vld [vmem:[%s1410_s20 + $0xd8] sm:$0xff]  ;;  %v849_v32 = vld [vmem:[%s1410_s20 + $0xe0] sm:$0xff] }
 0x16a   : >> { %846 = vst [vmem:[%s1406_s15 + $0xd0] sm:$0xff] %v845_v30  ;;  %v851_v33 = vld [vmem:[%s1410_s20 + $0xe8] sm:$0xff]  ;;  %848 = vst [vmem:[%s1406_s15 + $0xd8] sm:$0xff] %v847_v31  ;;  %v853_v34 = vld [vmem:[%s1410_s20 + $0xf0] sm:$0xff] }
 0x16b   : >> { %850 = vst [vmem:[%s1406_s15 + $0xe0] sm:$0xff] %v849_v32  ;;  %852 = vst [vmem:[%s1406_s15 + $0xe8] sm:$0xff] %v851_v33  ;;  %v855_v36 = vld [vmem:[%s1410_s20 + $0xf8] sm:$0xff]  ;;  %s1895_s20 = smov %s1818_s30 }
 0x16c   : >> { %854 = vst [vmem:[%s1406_s15 + $0xf0] sm:$0xff] %v853_v34  ;;  %856 = vst [vmem:[%s1406_s15 + $0xf8] sm:$0xff] %v855_v36  ;;  %s1894_s15 = smov %s863_s4 }
 0x16d PF: > { %s1859_s24 = sand.u32 31, %s1901_s10   ;;  %s1076_s21 = sshll.u32 %s1751_s25, 8 }
 0x16e   : > { %s868_s26 = scalar_lea.vmem %s1644_s12, %s1076_s21 [#allocation6]   ;;  %s870_s5 = scalar_lea.vmem %s1745_s18, %s1076_s21  }
 0x16f   : > { %p1070_p5 = scmp.le.s32.totalorder %s1859_s24, 0 }
 0x170   : > { %s1420_s6 = smov (!%p1070_p5), %s870_s5   ;;  %s1424_s7 = smov (!%p1070_p5), %s868_s26  }
 0x171   : > { %965 = sbr.rel (%p1070_p5) target bundleno = 386 (0x182), region = 136  ;;  %s1428_s8 = smov (!%p1070_p5), 0  }
 0x172   : > { %s1432_s9 = smov (!%p1070_p5), 0  }
 0x178 LB: >> { %v880_v37 = vld [vmem:[%s1426_s7] sm:$0xff]  ;;  %s882_s10 = sadd.s32 1, %s1430_s8  ;;  %s874_s9 = sadd.s32 1, %s1434_s9   ;;  %s1434_s9 = sphi %s1432_s9, %s874_s9   ;;  %s1430_s8 = sphi %s1428_s8, %s1429_s8   ;;  %s1426_s7 = sphi %s1424_s7, %s887_s7   ;;  %s1422_s6 = sphi %s1420_s6, %s888_s6  }
 0x179   : >> { %881 = vst [vmem:[%s1422_s6] sm:$0xff] %v880_v37  ;;  %p883_p8 = scmp.ge.s32.totalorder %s882_s10, %s1859_s24  ;;  %p873_p10 = scmp.ge.s32.totalorder %s874_s9, %s1859_s24 }
 0x17b   : >> { %s1905_s10 = smov (%p883_p8, %s882_s10), 0  ;;  %876 = sbr.rel (!%p873_p10) target bundleno = 376 (0x178), region = 142 }
 0x17c   : >> { %s1071_s12 = sshll.u32 %s1905_s10, 3  ;;  %s1429_s8 = smov %s1905_s10  }
 0x17d   : >> { %s887_s7 = scalar_lea.vmem %s868_s26, %s1071_s12 [#allocation6]   ;;  %s888_s6 = scalar_lea.vmem %s870_s5, %s1071_s12  }
 0x182 PF: > { %p12_p11 = scmp.ge.s32.totalorder %s1476_s16, 8   ;;  %s1897_s12 = smov %s1398_s13 }
 0x183   : > { %s1898_s13 = smov %s1484_s19  ;;  %s1899_s14 = smov %s1476_s16 }
 0x184   :  { %14 = sbr.rel (!%p12_p11) target bundleno = 3 (0x3), region = 153 }
 0x18b   :  { %904 = vsyncpa [#allocation3], 1 }
 0x18c   :  { %906 = vsyncpa [#allocation3 + $0x1], 1 }
 0x18d   :  { %907 = vsyncpa [#allocation5], 1 }

// kernel: net_forward.6
= control target key start
LH: loop header
LB: loop body
LE: loop exit
PB: predicated region body
PF: predicated region fallthrough
CT: control target
= control target key end

     0   :  { %s1729_s12 = smov 0   ;;  %s1731_s13 = smov 0   ;;  %s2306_s0 = inlined_call_operand.vmem [shape: f32[1152,288], index: 0, kind: input, shape index: {}]   ;;  %s2307_s1 = inlined_call_operand.vmem [shape: f32[288,64], index: 1, kind: input, shape index: {}]   ;;  %s2308_s2 = inlined_call_operand.vmem [shape: f32[1,64], index: 2, kind: input, shape index: {}]   ;;  %s2309_s3 = inlined_call_operand.vmem [shape: f32[1152,64], index: 3, kind: output, shape index: {}]  }
   0x1   :  { %s1733_s14 = smov 0  }
   0x2 LB: > { %s1742_s15 = sadd.s32 4294967295, %s1674_s14   ;;  %s1744_s16 = sadd.s32 1, %s1674_s14   ;;  %s1674_s14 = sphi %s1733_s14, %s2318_s14   ;;  %s1670_s13 = sphi %s1731_s13, %s2317_s13   ;;  %s1666_s12 = sphi %s1729_s12, %s2316_s12  }
   0x3   : > { %s85_s17 = ssub.s32 %s1674_s14, %s1744_s16  ;;  %s88_s18 = sadd.s32 1, %s1670_s13 }
   0x4   : > { %p86_p0 = scmp.eq.s32.totalorder %s85_s17, 0  ;;  %p98_p1 = scmp.ne.s32.totalorder %s1670_s13, %s1666_s12 }
   0x5   : > { %p99_p2 = scmp.eq.s32.totalorder %s1742_s15, 4  ;;  %p1293_p3 = scmp.ge.s32.totalorder %s1674_s14, 1 }
   0x6   : > { %s1752_s19 = scalar_select %p86_p0, %s1670_s13, %s88_s18  }
   0x7   : > { %p1754_p4 = por %p99_p2, %p98_p1  ;;  %p149_p5 = scmp.lt.s32.totalorder %s1674_s14, 6 }
   0x9   : > { %p150_p6 = pnand %p1293_p3, %p149_p5 }
   0xa   : > { %v296_v0 = vld [vmem:[%s2307_s1] sm:$0xff] (!%p150_p6)  ;;  %v297_v1 = vld [vmem:[%s2307_s1 + $0x8] sm:$0xff] (!%p150_p6)  ;;  %v298_v2 = vld [vmem:[%s2307_s1 + $0x10] sm:$0xff] (!%p150_p6)  ;;  %s1768_s27 = sshll.u32 (!%p150_p6), %s1742_s15, 5  ;;  %v1708_v3 = vmov (!%p150_p6), 0.0|0.0   ;;  %vm339_vm0 = vcmask (!%p150_p6), 261120  }
   0xb   : > { %153 = sbr.rel (%p150_p6) target bundleno = 443 (0x1bb), region = 32  ;;  %1442 = vmatprep.subr.bf16.mxu0 (!%p150_p6), %v1708_v3  ;;  %1498 = vmatprep.subr.bf16.mxu1 (!%p150_p6), %v1708_v3  ;;  %v1443_v4 = vpack.c.bf16 (!%p150_p6), %v297_v1, %v296_v0  ;;  %v299_v5 = vld [vmem:[%s2307_s1 + $0x18] sm:$0xff] (!%p150_p6)  ;;  %p184_p7 = scmp.lt.s32.totalorder (!%p150_p6), %s1768_s27, 143  ;;  %v300_v7 = vld [vmem:[%s2307_s1 + $0x20] sm:$0xff] (!%p150_p6)  ;;  %v301_v8 = vld [vmem:[%s2307_s1 + $0x28] sm:$0xff] (!%p150_p6)  ;;  %vm918_vm1 = vcmask (!%p150_p6), 523264  }
   0xc   : > { %v1446_v6 = vpack.c.bf16 (!%p150_p6), %v299_v5, %v298_v2  ;;  %v1449_v9 = vpack.c.bf16 (!%p150_p6), %v301_v8, %v300_v7  ;;  %v302_v10 = vld [vmem:[%s2307_s1 + $0x30] sm:$0xff] (!%p150_p6)  ;;  %v303_v11 = vld [vmem:[%s2307_s1 + $0x38] sm:$0xff] (!%p150_p6)  ;;  %v304_v15 = vld [vmem:[%s2307_s1 + $0x40] sm:$0xff] (!%p150_p6) }
   0xd   : > { %1444 = vmatpush1.bf16.msra.mxu0 (!%p150_p6), %v1443_v4  ;;  %1514 = vmatpush1.bf16.msra.mxu1 (!%p150_p6), %v1443_v4  ;;  %v1452_v13 = vpack.c.bf16 (!%p150_p6), %v303_v11, %v302_v10  ;;  %v305_v16 = vld [vmem:[%s2307_s1 + $0x48] sm:$0xff] (!%p150_p6)  ;;  %v306_v18 = vld [vmem:[%s2307_s1 + $0x50] sm:$0xff] (!%p150_p6)  ;;  %v307_v19 = vld [vmem:[%s2307_s1 + $0x58] sm:$0xff] (!%p150_p6) }
   0xe   : > { %1445 = vmatprep.subr.bf16.mxu0 (!%p150_p6), %v1708_v3  ;;  %1499 = vmatprep.subr.bf16.mxu1 (!%p150_p6), %v1708_v3  ;;  %v1455_v17 = vpack.c.bf16 (!%p150_p6), %v305_v16, %v304_v15  ;;  %v1458_v20 = vpack.c.bf16 (!%p150_p6), %v307_v19, %v306_v18  ;;  %v308_v21 = vld [vmem:[%s2307_s1 + $0x60] sm:$0xff] (!%p150_p6)  ;;  %v309_v22 = vld [vmem:[%s2307_s1 + $0x68] sm:$0xff] (!%p150_p6)  ;;  %v310_v24 = vld [vmem:[%s2307_s1 + $0x70] sm:$0xff] (!%p150_p6) }
   0xf   : > { %v1461_v23 = vpack.c.bf16 (!%p150_p6), %v309_v22, %v308_v21  ;;  %v311_v25 = vld [vmem:[%s2307_s1 + $0x78] sm:$0xff] (!%p150_p6)  ;;  %v312_v27 = vld [vmem:[%s2307_s1 + $0x80] sm:$0xff] (!%p150_p6)  ;;  %v313_v28 = vld [vmem:[%s2307_s1 + $0x88] sm:$0xff] (!%p150_p6) }
  0x10   : > { %v1464_v26 = vpack.c.bf16 (!%p150_p6), %v311_v25, %v310_v24  ;;  %v1467_v29 = vpack.c.bf16 (!%p150_p6), %v313_v28, %v312_v27  ;;  %v314_v30 = vld [vmem:[%s2307_s1 + $0x90] sm:$0xff] (!%p150_p6)  ;;  %v315_v31 = vld [vmem:[%s2307_s1 + $0x98] sm:$0xff] (!%p150_p6)  ;;  %v316_v33 = vld [vmem:[%s2307_s1 + $0xa0] sm:$0xff] (!%p150_p6) }
  0x11   : > { %1447 = vmatpush1.bf16.msra.mxu0 (!%p150_p6), %v1446_v6  ;;  %1515 = vmatpush1.bf16.msra.mxu1 (!%p150_p6), %v1446_v6  ;;  %v1470_v32 = vpack.c.bf16 (!%p150_p6), %v315_v31, %v314_v30  ;;  %v317_v34 = vld [vmem:[%s2307_s1 + $0xa8] sm:$0xff] (!%p150_p6)  ;;  %v318_v36 = vld [vmem:[%s2307_s1 + $0xb0] sm:$0xff] (!%p150_p6)  ;;  %v319_v37 = vld [vmem:[%s2307_s1 + $0xb8] sm:$0xff] (!%p150_p6) }
  0x12   : > { %s185_s30 = scalar_select %p184_p7, %s1768_s27, 143  ;;  %1448 = vmatprep.subr.bf16.mxu0 %v1708_v3  ;;  %1500 = vmatprep.subr.bf16.mxu1 %v1708_v3  ;;  %v1473_v35 = vpack.c.bf16 %v317_v34, %v316_v33  ;;  %v1476_v38 = vpack.c.bf16 %v319_v37, %v318_v36  ;;  %v320_v39 = vld [vmem:[%s2307_s1 + $0xc0] sm:$0xff]  ;;  %v321_v40 = vld [vmem:[%s2307_s1 + $0xc8] sm:$0xff]  ;;  %v322_v42 = vld [vmem:[%s2307_s1 + $0xd0] sm:$0xff] }
  0x13   : > { %v1479_v41 = vpack.c.bf16 %v321_v40, %v320_v39  ;;  %v323_v43 = vld [vmem:[%s2307_s1 + $0xd8] sm:$0xff]  ;;  %v324_v45 = vld [vmem:[%s2307_s1 + $0xe0] sm:$0xff]  ;;  %v325_v46 = vld [vmem:[%s2307_s1 + $0xe8] sm:$0xff]  ;;  %s959_s24 = ssub.s32 (%p1754_p4), 144, %s1768_s27  ;;  %s1347_s25 = sshll.u32 (%p1754_p4), %s1742_s15, 8 }
  0x14   : > { %s1530_s8 = smul.u32 24, %s185_s30  ;;  %v1482_v44 = vpack.c.bf16 %v323_v43, %v322_v42  ;;  %v1485_v47 = vpack.c.bf16 %v325_v46, %v324_v45  ;;  %v326_v48 = vld [vmem:[%s2307_s1 + $0xf0] sm:$0xff]  ;;  %v327_v49 = vld [vmem:[%s2307_s1 + $0xf8] sm:$0xff]  ;;  %v328_v50 = vld [vmem:[%s2307_s1 + $0x100] sm:$0xff]  ;;  %p960_p8 = scmp.lt.s32.totalorder (%p1754_p4), %s959_s24, 32 }
  0x15   : > { %1450 = vmatpush1.bf16.msra.mxu0 %v1449_v9  ;;  %1516 = vmatpush1.bf16.msra.mxu1 %v1449_v9  ;;  %v329_v51 = vld [vmem:[%s2307_s1 + $0x108] sm:$0xff]  ;;  %v1488_v52 = vpack.c.bf16 %v327_v49, %v326_v48  ;;  %v330_v54 = vld [vmem:[%s2307_s1 + $0x110] sm:$0xff]  ;;  %v331_v55 = vld [vmem:[%s2307_s1 + $0x118] sm:$0xff]  ;;  %s2174_s29 = scalar_lea.vmem (%p1754_p4), %s2309_s3, %s1347_s25  }
  0x16   : > { %s1788_s11 = scalar_lea.vmem %s2306_s0, %s1530_s8  ;;  %1451 = vmatprep.subr.bf16.mxu0 %v1708_v3  ;;  %1501 = vmatprep.subr.bf16.mxu1 %v1708_v3  ;;  %v1490_v53 = vpack.c.bf16 %v329_v51, %v328_v50  ;;  %v1494_v59 = vpack.c.bf16 %v331_v55, %v330_v54 }
  0x17   : > { %v201_v12 = vld [vmem:[%s1788_s11 + $0x8] sm:$0xff]  ;;  %v200_v56 = vld [vmem:[%s1788_s11] sm:$0xff]  ;;  %v203_v61 = vld [vmem:[%s1788_s11 + $0x18] sm:$0xff] }
  0x18   : > { %v273_v14 = vld [vmem:[%s1788_s11 + $0x248] sm:$0xff]  ;;  %500 = vmatprep.mubr.f32.mxu0 %v201_v12  ;;  %v272_v57 = vld [vmem:[%s1788_s11 + $0x240] sm:$0xff]  ;;  %v275_v62 = vld [vmem:[%s1788_s11 + $0x258] sm:$0xff] }
  0x19   : > { %620 = vmatprep.mubr.f32.mxu1 %v273_v14  ;;  %1453 = vmatpush1.bf16.msra.mxu0 %v1452_v13  ;;  %v204_v58 = vld [vmem:[%s1788_s11 + $0x20] sm:$0xff]  ;;  %v207_v63 = vld [vmem:[%s1788_s11 + $0x38] sm:$0xff]  ;;  %v206_v1 = vld [vmem:[%s1788_s11 + $0x30] sm:$0xff] }
  0x1a   : > { %1517 = vmatpush1.bf16.msra.mxu1 %v1452_v13  ;;  %1454 = vmatprep.subr.bf16.mxu0 %v1708_v3  ;;  %v276_v60 = vld [vmem:[%s1788_s11 + $0x260] sm:$0xff]  ;;  %v279_v0 = vld [vmem:[%s1788_s11 + $0x278] sm:$0xff]  ;;  %v278_v2 = vld [vmem:[%s1788_s11 + $0x270] sm:$0xff] }
  0x1b   : > { %1502 = vmatprep.subr.bf16.mxu1 %v1708_v3  ;;  %v282_v4 = vld [vmem:[%s1788_s11 + $0x290] sm:$0xff]  ;;  %v209_v5 = vld [vmem:[%s1788_s11 + $0x48] sm:$0xff]  ;;  %v212_v9 = vld [vmem:[%s1788_s11 + $0x60] sm:$0xff] }
  0x1c   : > { %v281_v6 = vld [vmem:[%s1788_s11 + $0x288] sm:$0xff]  ;;  %v284_v10 = vld [vmem:[%s1788_s11 + $0x2a0] sm:$0xff]  ;;  %v215_v13 = vld [vmem:[%s1788_s11 + $0x78] sm:$0xff] }
  0x1d   : > { %1456 = vmatpush1.bf16.msra.mxu0 %v1455_v17  ;;  %v213_v7 = vld [vmem:[%s1788_s11 + $0x68] sm:$0xff]  ;;  %v216_v11 = vld [vmem:[%s1788_s11 + $0x80] sm:$0xff]  ;;  %v287_v14 = vld [vmem:[%s1788_s11 + $0x2b8] sm:$0xff] }
  0x1e   : > { %1518 = vmatpush1.bf16.msra.mxu1 %v1455_v17  ;;  %1457 = vmatprep.subr.bf16.mxu0 %v1708_v3  ;;  %v285_v8 = vld [vmem:[%s1788_s11 + $0x2a8] sm:$0xff]  ;;  %v288_v12 = vld [vmem:[%s1788_s11 + $0x2c0] sm:$0xff]  ;;  %v219_v15 = vld [vmem:[%s1788_s11 + $0x98] sm:$0xff] }
  0x1f   : > { %1503 = vmatprep.subr.bf16.mxu1 %v1708_v3  ;;  %v291_v16 = vld [vmem:[%s1788_s11 + $0x2d8] sm:$0xff]  ;;  %v218_v17 = vld [vmem:[%s1788_s11 + $0x90] sm:$0xff]  ;;  %v221_v21 = vld [vmem:[%s1788_s11 + $0xa8] sm:$0xff] }
  0x20   : > { %v290_v18 = vld [vmem:[%s1788_s11 + $0x2d0] sm:$0xff]  ;;  %v293_v22 = vld [vmem:[%s1788_s11 + $0x2e8] sm:$0xff]  ;;  %v224_v25 = vld [vmem:[%s1788_s11 + $0xc0] sm:$0xff] }
  0x21   : > { %1459 = vmatpush1.bf16.msra.mxu0 %v1458_v20  ;;  %v222_v19 = vld [vmem:[%s1788_s11 + $0xb0] sm:$0xff]  ;;  %v228_v27 = vld [vmem:[%s1788_s11 + $0xe0] sm:$0xff]  ;;  %v211_v30 = vld [vmem:[%s1788_s11 + $0x58] sm:$0xff] }
  0x22   : > { %1519 = vmatpush1.bf16.msra.mxu1 %v1458_v20  ;;  %1460 = vmatprep.subr.bf16.mxu0 %v1708_v3  ;;  %v294_v20 = vld [vmem:[%s1788_s11 + $0x2f0] sm:$0xff]  ;;  %v208_v28 = vld [vmem:[%s1788_s11 + $0x40] sm:$0xff]  ;;  %v231_v31 = vld [vmem:[%s1788_s11 + $0xf8] sm:$0xff] }
  0x23   : > { %1504 = vmatprep.subr.bf16.mxu1 %v1708_v3  ;;  %v202_v24 = vld [vmem:[%s1788_s11 + $0x10] sm:$0xff]  ;;  %v217_v34 = vld [vmem:[%s1788_s11 + $0x88] sm:$0xff]  ;;  %v220_v36 = vld [vmem:[%s1788_s11 + $0xa0] sm:$0xff] }
  0x24   : > { %v230_v33 = vld [vmem:[%s1788_s11 + $0xf0] sm:$0xff]  ;;  %v233_v37 = vld [vmem:[%s1788_s11 + $0x108] sm:$0xff]  ;;  %v240_v43 = vld [vmem:[%s1788_s11 + $0x140] sm:$0xff] }
  0x25   : > { %1462 = vmatpush1.bf16.msra.mxu0 %v1461_v23  ;;  %v237_v39 = vld [vmem:[%s1788_s11 + $0x128] sm:$0xff]  ;;  %v226_v40 = vld [vmem:[%s1788_s11 + $0xd0] sm:$0xff]  ;;  %v239_v45 = vld [vmem:[%s1788_s11 + $0x138] sm:$0xff] }
  0x26   : > { %1520 = vmatpush1.bf16.msra.mxu1 %v1461_v23  ;;  %1463 = vmatprep.subr.bf16.mxu0 %v1708_v3  ;;  %v225_v23 = vld [vmem:[%s1788_s11 + $0xc8] sm:$0xff]  ;;  %v235_v46 = vld [vmem:[%s1788_s11 + $0x118] sm:$0xff]  ;;  %v238_v48 = vld [vmem:[%s1788_s11 + $0x130] sm:$0xff] }
  0x27   : > { %1505 = vmatprep.subr.bf16.mxu1 %v1708_v3  ;;  %v229_v42 = vld [vmem:[%s1788_s11 + $0xe8] sm:$0xff]  ;;  %v242_v49 = vld [vmem:[%s1788_s11 + $0x150] sm:$0xff]  ;;  %v247_v54 = vld [vmem:[%s1788_s11 + $0x178] sm:$0xff] }
  0x28   : > { %v241_v50 = vld [vmem:[%s1788_s11 + $0x148] sm:$0xff]  ;;  %v246_v51 = vld [vmem:[%s1788_s11 + $0x170] sm:$0xff] }
  0x29   : > { %1465 = vmatpush1.bf16.msra.mxu0 %v1464_v26  ;;  %v249_v55 = vld [vmem:[%s1788_s11 + $0x188] sm:$0xff] }
  0x2a   : > { %1521 = vmatpush1.bf16.msra.mxu1 %v1464_v26  ;;  %1466 = vmatprep.subr.bf16.mxu0 %v1708_v3  ;;  %v205_v26 = vld [vmem:[%s1788_s11 + $0x28] sm:$0xff] }
  0x2b   : > { %1506 = vmatprep.subr.bf16.mxu1 %v1708_v3 }
  0x2d   : > { %1468 = vmatpush1.bf16.msra.mxu0 %v1467_v29 }
  0x2e   : > { %1522 = vmatpush1.bf16.msra.mxu1 %v1467_v29  ;;  %1469 = vmatprep.subr.bf16.mxu0 %v1708_v3  ;;  %v227_v29 = vld [vmem:[%s1788_s11 + $0xd8] sm:$0xff] }
  0x2f   : > { %1507 = vmatprep.subr.bf16.mxu1 %v1708_v3 }
  0x31   : > { %1471 = vmatpush1.bf16.msra.mxu0 %v1470_v32 }
  0x32   : > { %1523 = vmatpush1.bf16.msra.mxu1 %v1470_v32  ;;  %1472 = vmatprep.subr.bf16.mxu0 %v1708_v3  ;;  %v214_v32 = vld [vmem:[%s1788_s11 + $0x70] sm:$0xff] }
  0x33   : > { %1508 = vmatprep.subr.bf16.mxu1 %v1708_v3 }
  0x35   : > { %1474 = vmatpush1.bf16.msra.mxu0 %v1473_v35 }
  0x36   : > { %1524 = vmatpush1.bf16.msra.mxu1 %v1473_v35  ;;  %1475 = vmatprep.subr.bf16.mxu0 %v1708_v3  ;;  %v234_v35 = vld [vmem:[%s1788_s11 + $0x110] sm:$0xff] }
  0x37   : > { %1509 = vmatprep.subr.bf16.mxu1 %v1708_v3 }
  0x39   : > { %1477 = vmatpush1.bf16.msra.mxu0 %v1476_v38 }
  0x3a   : > { %1525 = vmatpush1.bf16.msra.mxu1 %v1476_v38  ;;  %1478 = vmatprep.subr.bf16.mxu0 %v1708_v3  ;;  %v223_v38 = vld [vmem:[%s1788_s11 + $0xb8] sm:$0xff] }
  0x3b   : > { %1510 = vmatprep.subr.bf16.mxu1 %v1708_v3 }
  0x3d   : > { %1480 = vmatpush1.bf16.msra.mxu0 %v1479_v41 }
  0x3e   : > { %1526 = vmatpush1.bf16.msra.mxu1 %v1479_v41  ;;  %1481 = vmatprep.subr.bf16.mxu0 %v1708_v3  ;;  %v236_v41 = vld [vmem:[%s1788_s11 + $0x120] sm:$0xff] }
  0x3f   : > { %1511 = vmatprep.subr.bf16.mxu1 %v1708_v3 }
  0x41   : > { %1483 = vmatpush1.bf16.msra.mxu0 %v1482_v44 }
  0x42   : > { %1527 = vmatpush1.bf16.msra.mxu1 %v1482_v44  ;;  %1484 = vmatprep.subr.bf16.mxu0 %v1708_v3  ;;  %v232_v44 = vld [vmem:[%s1788_s11 + $0x100] sm:$0xff] }
  0x43   : > { %1512 = vmatprep.subr.bf16.mxu1 %v1708_v3 }
  0x45   : > { %1486 = vmatpush1.bf16.msra.mxu0 %v1485_v47 }
  0x46   : > { %1528 = vmatpush1.bf16.msra.mxu1 %v1485_v47  ;;  %1487 = vmatprep.subr.bf16.mxu0 %v1708_v3  ;;  %v243_v47 = vld [vmem:[%s1788_s11 + $0x158] sm:$0xff] }
  0x47   : > { %1513 = vmatprep.subr.bf16.mxu1 %v1708_v3  ;;  %v210_v3 = vld [vmem:[%s1788_s11 + $0x50] sm:$0xff] }
  0x49   : > { %1489 = vmatpush1.bf16.msra.mxu0 %v1488_v52 }
  0x4a   : > { %1529 = vmatpush1.bf16.msra.mxu1 %v1488_v52  ;;  %v244_v52 = vld [vmem:[%s1788_s11 + $0x160] sm:$0xff] }
  0x4b   : > { %1491 = vmatprep.subr.bf16.mxu1 %v1490_v53 }
  0x4c   : > { %501 = vmatmul.mubr.f32.vlgmr.msra.gmra.mrb[0].mxu0 %v200_v56  ;;  %v250_v56 = vld [vmem:[%s1788_s11 + $0x190] sm:$0xff] }
  0x4d   : > { %621 = vmatmul.mubr.f32.vlgmr.msra.gmra.mrb[0].mxu1 %v272_v57  ;;  %505 = vmatprep.mubr.f32.mxu0 %v204_v58  ;;  %v248_v57 = vld [vmem:[%s1788_s11 + $0x180] sm:$0xff]  ;;  %v253_v58 = vld [vmem:[%s1788_s11 + $0x1a8] sm:$0xff] }
  0x4e   : > { %1493 = vmatpush3.bf16.msra.mxu1 %v1490_v53  ;;  %625 = vmatprep.mubr.f32.mxu1 %v276_v60  ;;  %v245_v53 = vld [vmem:[%s1788_s11 + $0x168] sm:$0xff]  ;;  %v256_v60 = vld [vmem:[%s1788_s11 + $0x1c0] sm:$0xff] }
  0x4f   : > { %1495 = vmatprep.subr.bf16.mxu1 %v1494_v59 }
  0x50   : > { %506 = vmatmul.mubr.f32.gmra.mrb[2].mxu0 %v203_v61  ;;  %v251_v61 = vld [vmem:[%s1788_s11 + $0x198] sm:$0xff] }
  0x51   : > { %626 = vmatmul.mubr.f32.gmra.mrb[2].mxu1 %v275_v62  ;;  %510 = vmatprep.mubr.f32.mxu0 %v207_v63  ;;  %v259_v62 = vld [vmem:[%s1788_s11 + $0x1d8] sm:$0xff] }
  0x52   : > { %630 = vmatprep.mubr.f32.mxu1 %v279_v0  ;;  %1497 = vmatpush3.bf16.msra.mxu1 %v1494_v59  ;;  %v252_v59 = vld [vmem:[%s1788_s11 + $0x1a0] sm:$0xff]  ;;  %v255_v63 = vld [vmem:[%s1788_s11 + $0x1b8] sm:$0xff]  ;;  %v262_v0 = vld [vmem:[%s1788_s11 + $0x1f0] sm:$0xff] }
  0x54   : > { %511 = vmatmul.mubr.f32.gmra.mrb[4].mxu0 %v206_v1  ;;  %v254_v1 = vld [vmem:[%s1788_s11 + $0x1b0] sm:$0xff] }
  0x55   : > { %631 = vmatmul.mubr.f32.gmra.mrb[4].mxu1 %v278_v2  ;;  %515 = vmatprep.mubr.f32.mxu0 %v210_v3  ;;  %v265_v2 = vld [vmem:[%s1788_s11 + $0x208] sm:$0xff]  ;;  %v258_v3 = vld [vmem:[%s1788_s11 + $0x1d0] sm:$0xff] }
  0x56   : > { %635 = vmatprep.mubr.f32.mxu1 %v282_v4  ;;  %v268_v4 = vld [vmem:[%s1788_s11 + $0x220] sm:$0xff] }
  0x58   : > { %516 = vmatmul.mubr.f32.gmra.mrb[6].mxu0 %v209_v5  ;;  %v257_v5 = vld [vmem:[%s1788_s11 + $0x1c8] sm:$0xff] }
  0x59   : > { %636 = vmatmul.mubr.f32.gmra.mrb[6].mxu1 %v281_v6  ;;  %520 = vmatprep.mubr.f32.mxu0 %v213_v7  ;;  %v271_v6 = vld [vmem:[%s1788_s11 + $0x238] sm:$0xff]  ;;  %v261_v7 = vld [vmem:[%s1788_s11 + $0x1e8] sm:$0xff] }
  0x5a   : > { %640 = vmatprep.mubr.f32.mxu1 %v285_v8  ;;  %v274_v8 = vld [vmem:[%s1788_s11 + $0x250] sm:$0xff] }
  0x5c   : > { %521 = vmatmul.mubr.f32.gmra.mrb[8].mxu0 %v212_v9  ;;  %v260_v9 = vld [vmem:[%s1788_s11 + $0x1e0] sm:$0xff] }
  0x5d   : > { %641 = vmatmul.mubr.f32.gmra.mrb[8].mxu1 %v284_v10  ;;  %525 = vmatprep.mubr.f32.mxu0 %v216_v11  ;;  %v277_v10 = vld [vmem:[%s1788_s11 + $0x268] sm:$0xff]  ;;  %v264_v11 = vld [vmem:[%s1788_s11 + $0x200] sm:$0xff] }
  0x5e   : > { %645 = vmatprep.mubr.f32.mxu1 %v288_v12  ;;  %v280_v12 = vld [vmem:[%s1788_s11 + $0x280] sm:$0xff] }
  0x60   : > { %526 = vmatmul.mubr.f32.gmra.mrb[10].mxu0 %v215_v13  ;;  %v263_v13 = vld [vmem:[%s1788_s11 + $0x1f8] sm:$0xff] }
  0x61   : > { %646 = vmatmul.mubr.f32.gmra.mrb[10].mxu1 %v287_v14  ;;  %530 = vmatprep.mubr.f32.mxu0 %v219_v15  ;;  %v283_v14 = vld [vmem:[%s1788_s11 + $0x298] sm:$0xff] }
  0x62   : > { %650 = vmatprep.mubr.f32.mxu1 %v291_v16  ;;  %v267_v15 = vld [vmem:[%s1788_s11 + $0x218] sm:$0xff]  ;;  %v286_v16 = vld [vmem:[%s1788_s11 + $0x2b0] sm:$0xff] }
  0x64   : > { %531 = vmatmul.mubr.f32.gmra.mrb[12].mxu0 %v218_v17  ;;  %v266_v17 = vld [vmem:[%s1788_s11 + $0x210] sm:$0xff] }
  0x65   : > { %651 = vmatmul.mubr.f32.gmra.mrb[12].mxu1 %v290_v18  ;;  %535 = vmatprep.mubr.f32.mxu0 %v222_v19  ;;  %v289_v18 = vld [vmem:[%s1788_s11 + $0x2c8] sm:$0xff]  ;;  %v270_v19 = vld [vmem:[%s1788_s11 + $0x230] sm:$0xff] }
  0x66   : > { %655 = vmatprep.mubr.f32.mxu1 %v294_v20  ;;  %v292_v20 = vld [vmem:[%s1788_s11 + $0x2e0] sm:$0xff] }
  0x68   : > { %536 = vmatmul.mubr.f32.gmra.mrb[14].mxu0 %v221_v21  ;;  %v269_v21 = vld [vmem:[%s1788_s11 + $0x228] sm:$0xff] }
  0x69   : > { %656 = vmatmul.mubr.f32.gmra.mrb[14].mxu1 %v293_v22  ;;  %540 = vmatprep.mubr.f32.mxu0 %v225_v23  ;;  %v295_v22 = vld [vmem:[%s1788_s11 + $0x2f8] sm:$0xff]  ;;  %s175_s11 = sand.u32 1, %s1666_s12  }
  0x6a   : > { %1394 = vmatprep.mubr.msk.f32.mxu1 %vm339_vm0, %v202_v24  ;;  %s1294_s23 = sshll.u32 %s175_s11, 8 }
  0x6b   : > { %s2062_s12 = scalar_lea.vmem [#allocation2], %s1294_s23  }
  0x6c   : > { %541 = vmatmul.mubr.f32.gmra.mrb[16].mxu0 %v224_v25 }
  0x6d   : > { %1395 = vmatmul.mubr.msk.f32.vlgmr.msra.gmra.mrb[16].mxu1 %vm339_vm0, %v205_v26  ;;  %545 = vmatprep.mubr.f32.mxu0 %v228_v27 }
  0x6e   : > { %1397 = vmatprep.mubr.msk.f32.mxu1 %vm339_vm0, %v208_v28 }
  0x70   : > { %546 = vmatmul.mubr.f32.gmra.mrb[18].mxu0 %v227_v29 }
  0x71   : > { %1398 = vmatmul.mubr.msk.f32.gmra.mrb[18].mxu1 %vm339_vm0, %v211_v30  ;;  %550 = vmatprep.mubr.f32.mxu0 %v231_v31 }
  0x72   : > { %1400 = vmatprep.mubr.msk.f32.mxu1 %vm339_vm0, %v214_v32 }
  0x74   : > { %551 = vmatmul.mubr.f32.gmra.mrb[20].mxu0 %v230_v33 }
  0x75   : > { %1401 = vmatmul.mubr.msk.f32.gmra.mrb[20].mxu1 %vm339_vm0, %v217_v34  ;;  %555 = vmatprep.mubr.f32.mxu0 %v234_v35 }
  0x76   : > { %1403 = vmatprep.mubr.msk.f32.mxu1 %vm339_vm0, %v220_v36 }
  0x78   : > { %556 = vmatmul.mubr.f32.gmra.mrb[22].mxu0 %v233_v37 }
  0x79   : > { %1404 = vmatmul.mubr.msk.f32.gmra.mrb[22].mxu1 %vm339_vm0, %v223_v38  ;;  %560 = vmatprep.mubr.f32.mxu0 %v237_v39 }
  0x7a   : > { %1406 = vmatprep.mubr.msk.f32.mxu1 %vm339_vm0, %v226_v40 }
  0x7c   : > { %561 = vmatmul.mubr.f32.gmra.mrb[24].mxu0 %v236_v41 }
  0x7d   : > { %1407 = vmatmul.mubr.msk.f32.gmra.mrb[24].mxu1 %vm339_vm0, %v229_v42  ;;  %565 = vmatprep.mubr.f32.mxu0 %v240_v43 }
  0x7e   : > { %1409 = vmatprep.mubr.msk.f32.mxu1 %vm339_vm0, %v232_v44 }
  0x80   : > { %566 = vmatmul.mubr.f32.gmra.mrb[26].mxu0 %v239_v45 }
  0x81   : > { %1410 = vmatmul.mubr.msk.f32.gmra.mrb[26].mxu1 %vm339_vm0, %v235_v46  ;;  %570 = vmatprep.mubr.f32.mxu0 %v243_v47 }
  0x82   : > { %1412 = vmatprep.mubr.msk.f32.mxu1 %vm339_vm0, %v238_v48 }
  0x84   : > { %571 = vmatmul.mubr.f32.gmra.mrb[28].mxu0 %v242_v49 }
  0x85   : > { %1413 = vmatmul.mubr.msk.f32.gmra.mrb[28].mxu1 %vm339_vm0, %v241_v50  ;;  %575 = vmatprep.mubr.f32.mxu0 %v246_v51 }
  0x86   : > { %1415 = vmatprep.mubr.msk.f32.mxu1 %vm339_vm0, %v244_v52 }
  0x88   : > { %576 = vmatmul.mubr.f32.gmra.mrb[30].mxu0 %v245_v53  ;;  %v2056_v53 = vld [vmem:[%s2308_s2] ss:$0 sm:$0xff] }
  0x89   : > { %1416 = vmatmul.mubr.msk.f32.gmra.mrb[30].mxu1 %vm339_vm0, %v247_v54  ;;  %580 = vmatprep.mubr.f32.mxu0 %v249_v55 }
  0x8a   : > { %1418 = vmatprep.mubr.msk.f32.mxu1 %vm339_vm0, %v250_v56 }
  0x8c   : > { %581 = vmatmul.mubr.f32.gmra.mrb[32].mxu0 %v248_v57 }
  0x8d   : > { %1419 = vmatmul.mubr.msk.f32.gmra.mrb[32].mxu1 %vm339_vm0, %v253_v58  ;;  %585 = vmatprep.mubr.f32.mxu0 %v252_v59 }
  0x8e   : > { %1421 = vmatprep.mubr.msk.f32.mxu1 %vm339_vm0, %v256_v60 }
  0x90   : > { %586 = vmatmul.mubr.f32.gmra.mrb[34].mxu0 %v251_v61 }
  0x91   : > { %1422 = vmatmul.mubr.msk.f32.gmra.mrb[34].mxu1 %vm339_vm0, %v259_v62  ;;  %590 = vmatprep.mubr.f32.mxu0 %v255_v63 }
  0x92   : > { %1424 = vmatprep.mubr.msk.f32.mxu1 %vm339_vm0, %v262_v0 }
  0x94   : > { %591 = vmatmul.mubr.f32.gmra.mrb[36].mxu0 %v254_v1 }
  0x95   : > { %1425 = vmatmul.mubr.msk.f32.gmra.mrb[36].mxu1 %vm339_vm0, %v265_v2  ;;  %595 = vmatprep.mubr.f32.mxu0 %v258_v3 }
  0x96   : > { %1427 = vmatprep.mubr.msk.f32.mxu1 %vm339_vm0, %v268_v4 }
  0x98   : > { %596 = vmatmul.mubr.f32.gmra.mrb[38].mxu0 %v257_v5 }
  0x99   : > { %1428 = vmatmul.mubr.msk.f32.gmra.mrb[38].mxu1 %vm339_vm0, %v271_v6  ;;  %600 = vmatprep.mubr.f32.mxu0 %v261_v7 }
  0x9a   : > { %1430 = vmatprep.mubr.msk.f32.mxu1 %vm339_vm0, %v274_v8 }
  0x9c   : > { %601 = vmatmul.mubr.f32.gmra.mrb[40].mxu0 %v260_v9 }
  0x9d   : > { %1431 = vmatmul.mubr.msk.f32.gmra.mrb[40].mxu1 %vm339_vm0, %v277_v10  ;;  %605 = vmatprep.mubr.f32.mxu0 %v264_v11 }
  0x9e   : > { %1433 = vmatprep.mubr.msk.f32.mxu1 %vm339_vm0, %v280_v12 }
  0xa0   : > { %606 = vmatmul.mubr.f32.gmra.mrb[42].mxu0 %v263_v13 }
  0xa1   : > { %1434 = vmatmul.mubr.msk.f32.gmra.mrb[42].mxu1 %vm339_vm0, %v283_v14  ;;  %610 = vmatprep.mubr.f32.mxu0 %v267_v15 }
  0xa2   : > { %1436 = vmatprep.mubr.msk.f32.mxu1 %vm339_vm0, %v286_v16 }
  0xa4   : > { %611 = vmatmul.mubr.f32.gmra.mrb[44].mxu0 %v266_v17 }
  0xa5   : > { %1437 = vmatmul.mubr.msk.f32.gmra.mrb[44].mxu1 %vm339_vm0, %v289_v18  ;;  %615 = vmatprep.mubr.f32.mxu0 %v270_v19 }
  0xa6   : > { %1439 = vmatprep.mubr.msk.f32.mxu1 %vm339_vm0, %v292_v20 }
  0xa8   : > { %616 = vmatmul.mubr.f32.gmra.mrb[46].mxu0 %v269_v21 }
  0xa9   : > { %1440 = vmatmul.mubr.msk.f32.gmra.mrb[46].mxu1 %vm339_vm0, %v295_v22 }
 0x11f   : > { %v502_v23 = vpop.f32.mrb[0].mxu0 }
 0x120   : > { %v2036_v24 = vpop.f32.mrb[0].mxu1  ;;  %v504_v25 = vpop.f32.mrb[1].mxu0  ;;  %v503_v57 = vadd.f32 %v2056_v53, %v502_v23 }
 0x121   : > { %v624_v26 = vpop.f32.mrb[1].mxu1 }
 0x123   : > { %v507_v27 = vpop.f32.mrb[2].mxu0 }
 0x124   : > { %v2038_v28 = vpop.f32.mrb[2].mxu1  ;;  %v509_v29 = vpop.f32.mrb[3].mxu0  ;;  %v508_v56 = vadd.f32 %v2056_v53, %v507_v27 }
 0x125   : > { %v629_v30 = vpop.f32.mrb[3].mxu1 }
 0x127   : > { %v512_v31 = vpop.f32.mrb[4].mxu0 }
 0x128   : > { %v2040_v32 = vpop.f32.mrb[4].mxu1  ;;  %v514_v33 = vpop.f32.mrb[5].mxu0  ;;  %v513_v2 = vadd.f32 %v2056_v53, %v512_v31 }
 0x129   : > { %v634_v34 = vpop.f32.mrb[5].mxu1 }
 0x12b   : > { %v517_v35 = vpop.f32.mrb[6].mxu0 }
 0x12c   : > { %v2042_v36 = vpop.f32.mrb[6].mxu1  ;;  %v519_v37 = vpop.f32.mrb[7].mxu0  ;;  %v518_v0 = vadd.f32 %v2056_v53, %v517_v35 }
 0x12d   : > { %v639_v38 = vpop.f32.mrb[7].mxu1 }
 0x12f   : > { %v522_v39 = vpop.f32.mrb[8].mxu0 }
 0x130   : > { %v2044_v40 = vpop.f32.mrb[8].mxu1  ;;  %v524_v41 = vpop.f32.mrb[9].mxu0  ;;  %v523_v12 = vadd.f32 %v2056_v53, %v522_v39 }
 0x131   : > { %v644_v42 = vpop.f32.mrb[9].mxu1 }
 0x133   : > { %v527_v43 = vpop.f32.mrb[10].mxu0 }
 0x134   : > { %v2046_v44 = vpop.f32.mrb[10].mxu1  ;;  %v529_v45 = vpop.f32.mrb[11].mxu0  ;;  %v528_v10 = vadd.f32 %v2056_v53, %v527_v43 }
 0x135   : > { %v649_v46 = vpop.f32.mrb[11].mxu1 }
 0x137   : > { %v532_v47 = vpop.f32.mrb[12].mxu0 }
 0x138   : > { %v2048_v48 = vpop.f32.mrb[12].mxu1  ;;  %v534_v49 = vpop.f32.mrb[13].mxu0  ;;  %v533_v22 = vadd.f32 %v2056_v53, %v532_v47 }
 0x139   : > { %v654_v50 = vpop.f32.mrb[13].mxu1 }
 0x13b   : > { %v537_v51 = vpop.f32.mrb[14].mxu0 }
 0x13c   : > { %v2050_v52 = vpop.f32.mrb[14].mxu1  ;;  %v539_v54 = vpop.f32.mrb[15].mxu0  ;;  %v538_v20 = vadd.f32 %v2056_v53, %v537_v51 }
 0x13d   : > { %v659_v55 = vpop.f32.mrb[15].mxu1 }
 0x13f   : > { %v542_v58 = vpop.f32.mrb[16].mxu0 }
 0x140   : > { %v1396_v59 = vpop.f32.mrb[16].mxu1  ;;  %v544_v61 = vpop.f32.mrb[17].mxu0  ;;  %v543_v35 = vadd.f32 %v2056_v53, %v542_v58 }
 0x141   : > { %v733_v60 = vadd.f32 %v1396_v59, %v508_v56  ;;  %v727_v62 = vpop.f32.mrb[17].mxu1 }
 0x142   : > { %v728_v63 = vadd.f32 %v727_v62, %v503_v57 }
 0x143   : > { %v887_v1 = vmax.f32 %v733_v60, 0.0  ;;  %v547_v4 = vpop.f32.mrb[18].mxu0 }
 0x144   : > { %v886_v3 = vmax.f32 %v728_v63, 0.0  ;;  %v1399_v5 = vpop.f32.mrb[18].mxu1  ;;  %v549_v7 = vpop.f32.mrb[19].mxu0  ;;  %v548_v33 = vadd.f32 %v2056_v53, %v547_v4 }
 0x145   : > { %920 = vst.msk [vmem:[%s2062_s12 + $0x8] sm:$0xff] %vm918_vm1, %v887_v1  ;;  %v743_v6 = vadd.f32 %v1399_v5, %v518_v0  ;;  %v737_v8 = vpop.f32.mrb[19].mxu1 }
 0x146   : > { %919 = vst.msk [vmem:[%s2062_s12] sm:$0xff] %vm918_vm1, %v886_v3  ;;  %v738_v9 = vadd.f32 %v737_v8, %v513_v2 }
 0x147   : > { %v889_v11 = vmax.f32 %v743_v6, 0.0  ;;  %v552_v14 = vpop.f32.mrb[20].mxu0 }
 0x148   : > { %v888_v13 = vmax.f32 %v738_v9, 0.0  ;;  %v1402_v15 = vpop.f32.mrb[20].mxu1  ;;  %v554_v17 = vpop.f32.mrb[21].mxu0  ;;  %v553_v49 = vadd.f32 %v2056_v53, %v552_v14 }
 0x149   : > { %922 = vst.msk [vmem:[%s2062_s12 + $0x18] sm:$0xff] %vm918_vm1, %v889_v11  ;;  %v753_v16 = vadd.f32 %v1402_v15, %v528_v10  ;;  %v747_v18 = vpop.f32.mrb[21].mxu1 }
 0x14a   : > { %921 = vst.msk [vmem:[%s2062_s12 + $0x10] sm:$0xff] %vm918_vm1, %v888_v13  ;;  %v748_v19 = vadd.f32 %v747_v18, %v523_v12 }
 0x14b   : > { %v891_v21 = vmax.f32 %v753_v16, 0.0  ;;  %v557_v25 = vpop.f32.mrb[22].mxu0 }
 0x14c   : > { %v890_v23 = vmax.f32 %v748_v19, 0.0  ;;  %v1405_v26 = vpop.f32.mrb[22].mxu1  ;;  %v559_v29 = vpop.f32.mrb[23].mxu0  ;;  %v558_v46 = vadd.f32 %v2056_v53, %v557_v25 }
 0x14d   : > { %924 = vst.msk [vmem:[%s2062_s12 + $0x28] sm:$0xff] %vm918_vm1, %v891_v21  ;;  %v763_v27 = vadd.f32 %v1405_v26, %v538_v20  ;;  %v757_v30 = vpop.f32.mrb[23].mxu1 }
 0x14e   : > { %923 = vst.msk [vmem:[%s2062_s12 + $0x20] sm:$0xff] %vm918_vm1, %v890_v23  ;;  %v758_v31 = vadd.f32 %v757_v30, %v533_v22 }
 0x14f   : > { %v893_v34 = vmax.f32 %v763_v27, 0.0  ;;  %v562_v38 = vpop.f32.mrb[24].mxu0 }
 0x150   : > { %v892_v37 = vmax.f32 %v758_v31, 0.0  ;;  %v1408_v39 = vpop.f32.mrb[24].mxu1  ;;  %v564_v42 = vpop.f32.mrb[25].mxu0  ;;  %v563_v61 = vadd.f32 %v2056_v53, %v562_v38 }
 0x151   : > { %926 = vst.msk [vmem:[%s2062_s12 + $0x38] sm:$0xff] %vm918_vm1, %v893_v34  ;;  %v773_v41 = vadd.f32 %v1408_v39, %v548_v33  ;;  %v767_v43 = vpop.f32.mrb[25].mxu1 }
 0x152   : > { %925 = vst.msk [vmem:[%s2062_s12 + $0x30] sm:$0xff] %vm918_vm1, %v892_v37  ;;  %v768_v45 = vadd.f32 %v767_v43, %v543_v35 }
 0x153   : > { %v895_v47 = vmax.f32 %v773_v41, 0.0  ;;  %v567_v51 = vpop.f32.mrb[26].mxu0 }
 0x154   : > { %v894_v50 = vmax.f32 %v768_v45, 0.0  ;;  %v1411_v54 = vpop.f32.mrb[26].mxu1  ;;  %v569_v56 = vpop.f32.mrb[27].mxu0  ;;  %v568_v59 = vadd.f32 %v2056_v53, %v567_v51 }
 0x155   : > { %928 = vst.msk [vmem:[%s2062_s12 + $0x48] sm:$0xff] %vm918_vm1, %v895_v47  ;;  %v783_v55 = vadd.f32 %v1411_v54, %v558_v46  ;;  %v777_v57 = vpop.f32.mrb[27].mxu1  ;;  %v623_v54 = vadd.f32 %v2056_v53, %v2036_v24  ;;  %v633_v24 = vadd.f32 %v2056_v53, %v2040_v32 }
 0x156   : > { %927 = vst.msk [vmem:[%s2062_s12 + $0x40] sm:$0xff] %vm918_vm1, %v894_v50  ;;  %v778_v58 = vadd.f32 %v777_v57, %v553_v49  ;;  %v628_v50 = vadd.f32 %v2056_v53, %v2038_v28  ;;  %v638_v28 = vadd.f32 %v2056_v53, %v2042_v36 }
 0x157   : > { %v897_v60 = vmax.f32 %v783_v55, 0.0  ;;  %v572_v63 = vpop.f32.mrb[28].mxu0 }
 0x158   : > { %v896_v62 = vmax.f32 %v778_v58, 0.0  ;;  %v1414_v0 = vpop.f32.mrb[28].mxu1  ;;  %v574_v2 = vpop.f32.mrb[29].mxu0  ;;  %v573_v6 = vadd.f32 %v2056_v53, %v572_v63 }
 0x159   : > { %930 = vst.msk [vmem:[%s2062_s12 + $0x58] sm:$0xff] %vm918_vm1, %v897_v60  ;;  %v793_v1 = vadd.f32 %v1414_v0, %v568_v59  ;;  %v787_v3 = vpop.f32.mrb[29].mxu1 }
 0x15a   : > { %929 = vst.msk [vmem:[%s2062_s12 + $0x50] sm:$0xff] %vm918_vm1, %v896_v62  ;;  %v788_v4 = vadd.f32 %v787_v3, %v563_v61 }
 0x15b   : > { %v899_v5 = vmax.f32 %v793_v1, 0.0  ;;  %v577_v8 = vpop.f32.mrb[30].mxu0 }
 0x15c   : > { %v898_v7 = vmax.f32 %v788_v4, 0.0  ;;  %v1417_v9 = vpop.f32.mrb[30].mxu1  ;;  %v578_v10 = vadd.f32 %v2056_v53, %v577_v8  ;;  %v579_v11 = vpop.f32.mrb[31].mxu0 }
 0x15d   : > { %932 = vst.msk [vmem:[%s2062_s12 + $0x68] sm:$0xff] %vm918_vm1, %v899_v5  ;;  %v797_v12 = vpop.f32.mrb[31].mxu1  ;;  %v643_v11 = vadd.f32 %v2056_v53, %v2044_v40 }
 0x15e   : > { %931 = vst.msk [vmem:[%s2062_s12 + $0x60] sm:$0xff] %vm918_vm1, %v898_v7  ;;  %v798_v13 = vadd.f32 %v797_v12, %v573_v6  ;;  %v803_v14 = vadd.f32 %v1417_v9, %v578_v10  ;;  %v648_v9 = vadd.f32 %v2056_v53, %v2046_v44 }
 0x15f   : > { %v582_v16 = vpop.f32.mrb[32].mxu0 }
 0x160   : > { %v900_v15 = vmax.f32 %v798_v13, 0.0  ;;  %v1420_v17 = vpop.f32.mrb[32].mxu1  ;;  %v901_v18 = vmax.f32 %v803_v14, 0.0  ;;  %v583_v19 = vadd.f32 %v2056_v53, %v582_v16  ;;  %v584_v20 = vpop.f32.mrb[33].mxu0 }
 0x161   : > { %v807_v21 = vpop.f32.mrb[33].mxu1  ;;  %v658_v20 = vadd.f32 %v2056_v53, %v2050_v52 }
 0x162   : > { %933 = vst.msk [vmem:[%s2062_s12 + $0x70] sm:$0xff] %vm918_vm1, %v900_v15  ;;  %934 = vst.msk [vmem:[%s2062_s12 + $0x78] sm:$0xff] %vm918_vm1, %v901_v18  ;;  %v808_v22 = vadd.f32 %v807_v21, %v583_v19 }
 0x163   : > { %v587_v23 = vpop.f32.mrb[34].mxu0 }
 0x164   : > { %v1423_v25 = vpop.f32.mrb[34].mxu1  ;;  %v902_v26 = vmax.f32 %v808_v22, 0.0  ;;  %v588_v27 = vadd.f32 %v2056_v53, %v587_v23  ;;  %v589_v29 = vpop.f32.mrb[35].mxu0  ;;  %v653_v22 = vadd.f32 %v2056_v53, %v2048_v48 }
 0x165   : > { %v817_v30 = vpop.f32.mrb[35].mxu1 }
 0x166   : > { %935 = vst.msk [vmem:[%s2062_s12 + $0x80] sm:$0xff] %vm918_vm1, %v902_v26  ;;  %v813_v31 = vadd.f32 %v1420_v17, %v588_v27 }
 0x167   : > { %v592_v33 = vpop.f32.mrb[36].mxu0 }
 0x168   : > { %v1426_v34 = vpop.f32.mrb[36].mxu1  ;;  %v903_v35 = vmax.f32 %v813_v31, 0.0  ;;  %v593_v37 = vadd.f32 %v2056_v53, %v592_v33  ;;  %v594_v38 = vpop.f32.mrb[37].mxu0 }
 0x169   : > { %v827_v39 = vpop.f32.mrb[37].mxu1 }
 0x16a   : > { %936 = vst.msk [vmem:[%s2062_s12 + $0x88] sm:$0xff] %vm918_vm1, %v903_v35  ;;  %v818_v41 = vadd.f32 %v817_v30, %v593_v37 }
 0x16b   : > { %v597_v42 = vpop.f32.mrb[38].mxu0 }
 0x16c   : > { %v2115_v43 = vpop.f32.mrb[38].mxu1  ;;  %v904_v45 = vmax.f32 %v818_v41, 0.0  ;;  %v598_v46 = vadd.f32 %v2056_v53, %v597_v42  ;;  %v599_v47 = vpop.f32.mrb[39].mxu0 }
 0x16d   : > { %v837_v49 = vpop.f32.mrb[39].mxu1 }
 0x16e   : > { %937 = vst.msk [vmem:[%s2062_s12 + $0x90] sm:$0xff] %vm918_vm1, %v904_v45  ;;  %v823_v51 = vadd.f32 %v1423_v25, %v598_v46 }
 0x16f   : > { %v602_v55 = vpop.f32.mrb[40].mxu0 }
 0x170   : > { %v1432_v56 = vpop.f32.mrb[40].mxu1  ;;  %v905_v57 = vmax.f32 %v823_v51, 0.0  ;;  %v603_v58 = vadd.f32 %v2056_v53, %v602_v55  ;;  %v604_v60 = vpop.f32.mrb[41].mxu0 }
 0x171   : > { %v853_v59 = vadd.f32 %v1432_v56, %v628_v50  ;;  %v847_v61 = vpop.f32.mrb[41].mxu1 }
 0x172   : > { %v848_v62 = vadd.f32 %v847_v61, %v623_v54  ;;  %938 = vst.msk [vmem:[%s2062_s12 + $0x98] sm:$0xff] %vm918_vm1, %v905_v57  ;;  %v828_v63 = vadd.f32 %v827_v39, %v603_v58 }
 0x173   : > { %v911_v0 = vmax.f32 %v853_v59, 0.0  ;;  %v607_v2 = vpop.f32.mrb[42].mxu0 }
 0x174   : > { %v910_v1 = vmax.f32 %v848_v62, 0.0  ;;  %v1435_v3 = vpop.f32.mrb[42].mxu1  ;;  %v906_v4 = vmax.f32 %v828_v63, 0.0  ;;  %v608_v5 = vadd.f32 %v2056_v53, %v607_v2  ;;  %v609_v7 = vpop.f32.mrb[43].mxu0 }
 0x175   : > { %944 = vst.msk [vmem:[%s2062_s12 + $0xc8] sm:$0xff] %vm918_vm1, %v911_v0  ;;  %v863_v6 = vadd.f32 %v1435_v3, %v638_v28  ;;  %v857_v36 = vpop.f32.mrb[43].mxu1 }
 0x176   : > { %943 = vst.msk [vmem:[%s2062_s12 + $0xc0] sm:$0xff] %vm918_vm1, %v910_v1  ;;  %v858_v8 = vadd.f32 %v857_v36, %v633_v24  ;;  %939 = vst.msk [vmem:[%s2062_s12 + $0xa0] sm:$0xff] %vm918_vm1, %v906_v4  ;;  %v833_v32 = vadd.f32 %v1426_v34, %v608_v5 }
 0x177   : > { %v913_v10 = vmax.f32 %v863_v6, 0.0  ;;  %v612_v13 = vpop.f32.mrb[44].mxu0 }
 0x178   : > { %v912_v12 = vmax.f32 %v858_v8, 0.0  ;;  %v1438_v14 = vpop.f32.mrb[44].mxu1  ;;  %v907_v15 = vmax.f32 %v833_v32, 0.0  ;;  %v613_v16 = vadd.f32 %v2056_v53, %v612_v13  ;;  %v614_v18 = vpop.f32.mrb[45].mxu0 }
 0x179   : > { %946 = vst.msk [vmem:[%s2062_s12 + $0xd8] sm:$0xff] %vm918_vm1, %v913_v10  ;;  %v873_v17 = vadd.f32 %v1438_v14, %v648_v9  ;;  %v867_v44 = vpop.f32.mrb[45].mxu1 }
 0x17a   : > { %945 = vst.msk [vmem:[%s2062_s12 + $0xd0] sm:$0xff] %vm918_vm1, %v912_v12  ;;  %v868_v19 = vadd.f32 %v867_v44, %v643_v11  ;;  %940 = vst.msk [vmem:[%s2062_s12 + $0xa8] sm:$0xff] %vm918_vm1, %v907_v15  ;;  %v838_v40 = vadd.f32 %v837_v49, %v613_v16 }
 0x17b   : > { %v915_v21 = vmax.f32 %v873_v17, 0.0  ;;  %v617_v25 = vpop.f32.mrb[46].mxu0 }
 0x17c   : > { %v914_v23 = vmax.f32 %v868_v19, 0.0  ;;  %v1441_v26 = vpop.f32.mrb[46].mxu1  ;;  %v908_v27 = vmax.f32 %v838_v40, 0.0  ;;  %v618_v29 = vadd.f32 %v2056_v53, %v617_v25  ;;  %v619_v30 = vpop.f32.mrb[47].mxu0  ;;  %957 = sbr.rel (!%p1754_p4) target bundleno = 443 (0x1bb), region = 36 }
 0x17d   : > { %948 = vst.msk [vmem:[%s2062_s12 + $0xe8] sm:$0xff] %vm918_vm1, %v915_v21  ;;  %v883_v52 = vadd.f32 %v1441_v26, %v658_v20  ;;  %v877_v31 = vpop.f32.mrb[47].mxu1 }
 0x17e   : > { %947 = vst.msk [vmem:[%s2062_s12 + $0xe0] sm:$0xff] %vm918_vm1, %v914_v23  ;;  %v878_v33 = vadd.f32 %v877_v31, %v653_v22  ;;  %941 = vst.msk [vmem:[%s2062_s12 + $0xb0] sm:$0xff] %vm918_vm1, %v908_v27  ;;  %v843_v48 = vadd.f32 %v2115_v43, %v618_v29 }
 0x17f   : > { %v917_v34 = vmax.f32 %v883_v52, 0.0 }
 0x180   : > { %v916_v35 = vmax.f32 %v878_v33, 0.0  ;;  %v909_v37 = vmax.f32 %v843_v48, 0.0 }
 0x181   : > { %950 = vst.msk [vmem:[%s2062_s12 + $0xf8] sm:$0xff] %vm918_vm1, %v917_v34 }
 0x182   : > { %949 = vst.msk [vmem:[%s2062_s12 + $0xf0] sm:$0xff] %vm918_vm1, %v916_v35  ;;  %942 = vst.msk [vmem:[%s2062_s12 + $0xb8] sm:$0xff] %vm918_vm1, %v909_v37 }
 0x183   : > { %s2320_s24 = smov (!%p960_p8, %s959_s24), 32 }
 0x184   : > { %s1332_s30 = sshll.u32 %s2320_s24, 7 }
 0x185   : > { %p1335_p9 = scmp.eq.s32.totalorder %s1332_s30, 0 }
 0x186   : > { %s2180_s4 = sshrl.u32 (!%p1335_p9), %s2320_s24, 5 }
 0x187   : > { %968 = sbr.rel (%p1335_p9) target bundleno = 443 (0x1bb), region = 40  ;;  %p1336_p10 = scmp.le.s32.totalorder (!%p1335_p9), %s2180_s4, 0 }
 0x18e   : > { %1246 = sbr.rel (%p1336_p10) target bundleno = 422 (0x1a6), region = 116  ;;  %s2311_s15 = smov (!%p1336_p10), %s2174_s29 }
 0x18f   : > { %s2312_s20 = smov (!%p1336_p10), %s2062_s12  ;;  %s2189_s27 = smov (!%p1336_p10), 0  }
 0x190   : > { %s2191_s5 = smov (!%p1336_p10), 0  }
 0x195 LB: >> { %v1092_v53 = vld [vmem:[%s1682_s20] sm:$0xff]  ;;  %v1094_v38 = vld [vmem:[%s1682_s20 + $0x8] sm:$0xff]  ;;  %v1096_v39 = vld [vmem:[%s1682_s20 + $0x10] sm:$0xff]  ;;  %s1156_s6 = sadd.s32 1, %s1686_s27  ;;  %s1086_s5 = sadd.s32 1, %s1690_s5   ;;  %s1690_s5 = sphi %s2191_s5, %s1086_s5   ;;  %s1686_s27 = sphi %s2189_s27, %s2315_s27   ;;  %s1682_s20 = sphi %s2312_s20, %s2314_s20   ;;  %s1678_s15 = sphi %s2311_s15, %s2313_s15  }
 0x196   : >> { %1093 = vst [vmem:[%s1678_s15] sm:$0xff] %v1092_v53  ;;  %1095 = vst [vmem:[%s1678_s15 + $0x8] sm:$0xff] %v1094_v38  ;;  %v1098_v41 = vld [vmem:[%s1682_s20 + $0x18] sm:$0xff]  ;;  %v1100_v42 = vld [vmem:[%s1682_s20 + $0x20] sm:$0xff]  ;;  %p1157_p11 = scmp.ge.s32.totalorder %s1156_s6, %s2180_s4  ;;  %p1085_p12 = scmp.ge.s32.totalorder %s1086_s5, %s2180_s4 }
 0x197   : >> { %1097 = vst [vmem:[%s1678_s15 + $0x10] sm:$0xff] %v1096_v39  ;;  %v1102_v43 = vld [vmem:[%s1682_s20 + $0x28] sm:$0xff]  ;;  %1099 = vst [vmem:[%s1678_s15 + $0x18] sm:$0xff] %v1098_v41  ;;  %v1104_v45 = vld [vmem:[%s1682_s20 + $0x30] sm:$0xff] }
 0x198   : >> { %1101 = vst [vmem:[%s1678_s15 + $0x20] sm:$0xff] %v1100_v42  ;;  %1103 = vst [vmem:[%s1678_s15 + $0x28] sm:$0xff] %v1102_v43  ;;  %v1106_v46 = vld [vmem:[%s1682_s20 + $0x38] sm:$0xff]  ;;  %v1108_v47 = vld [vmem:[%s1682_s20 + $0x40] sm:$0xff]  ;;  %s2322_s6 = smov (%p1157_p11, %s1156_s6), 0 }
 0x199   : >> { %1105 = vst [vmem:[%s1678_s15 + $0x30] sm:$0xff] %v1104_v45  ;;  %1107 = vst [vmem:[%s1678_s15 + $0x38] sm:$0xff] %v1106_v46  ;;  %v1110_v49 = vld [vmem:[%s1682_s20 + $0x48] sm:$0xff]  ;;  %v1112_v50 = vld [vmem:[%s1682_s20 + $0x50] sm:$0xff]  ;;  %s1337_s7 = sshll.u32 %s2322_s6, 8  ;;  %s2315_s27 = smov %s2322_s6 }
 0x19a   : >> { %1109 = vst [vmem:[%s1678_s15 + $0x40] sm:$0xff] %v1108_v47  ;;  %v1114_v51 = vld [vmem:[%s1682_s20 + $0x58] sm:$0xff]  ;;  %1111 = vst [vmem:[%s1678_s15 + $0x48] sm:$0xff] %v1110_v49  ;;  %v1116_v54 = vld [vmem:[%s1682_s20 + $0x60] sm:$0xff]  ;;  %s2247_s8 = scalar_lea.vmem %s2062_s12, %s1337_s7 [#allocation2]   ;;  %s1162_s9 = scalar_lea.vmem %s2174_s29, %s1337_s7  }
 0x19b   : >> { %1113 = vst [vmem:[%s1678_s15 + $0x50] sm:$0xff] %v1112_v50  ;;  %1115 = vst [vmem:[%s1678_s15 + $0x58] sm:$0xff] %v1114_v51  ;;  %v1118_v55 = vld [vmem:[%s1682_s20 + $0x68] sm:$0xff]  ;;  %v1120_v56 = vld [vmem:[%s1682_s20 + $0x70] sm:$0xff] }
 0x19c   : >> { %1117 = vst [vmem:[%s1678_s15 + $0x60] sm:$0xff] %v1116_v54  ;;  %1119 = vst [vmem:[%s1678_s15 + $0x68] sm:$0xff] %v1118_v55  ;;  %v1122_v57 = vld [vmem:[%s1682_s20 + $0x78] sm:$0xff]  ;;  %v1124_v58 = vld [vmem:[%s1682_s20 + $0x80] sm:$0xff] }
 0x19d   : >> { %1121 = vst [vmem:[%s1678_s15 + $0x70] sm:$0xff] %v1120_v56  ;;  %v1126_v59 = vld [vmem:[%s1682_s20 + $0x88] sm:$0xff]  ;;  %1123 = vst [vmem:[%s1678_s15 + $0x78] sm:$0xff] %v1122_v57  ;;  %v1128_v60 = vld [vmem:[%s1682_s20 + $0x90] sm:$0xff] }
 0x19e   : >> { %1125 = vst [vmem:[%s1678_s15 + $0x80] sm:$0xff] %v1124_v58  ;;  %1127 = vst [vmem:[%s1678_s15 + $0x88] sm:$0xff] %v1126_v59  ;;  %v1130_v61 = vld [vmem:[%s1682_s20 + $0x98] sm:$0xff]  ;;  %v1132_v62 = vld [vmem:[%s1682_s20 + $0xa0] sm:$0xff] }
 0x19f   : >> { %1129 = vst [vmem:[%s1678_s15 + $0x90] sm:$0xff] %v1128_v60  ;;  %1131 = vst [vmem:[%s1678_s15 + $0x98] sm:$0xff] %v1130_v61  ;;  %v1134_v28 = vld [vmem:[%s1682_s20 + $0xa8] sm:$0xff]  ;;  %v1136_v63 = vld [vmem:[%s1682_s20 + $0xb0] sm:$0xff]  ;;  %1088 = sbr.rel (!%p1085_p12) target bundleno = 405 (0x195), region = 122 }
 0x1a0   : >> { %1133 = vst [vmem:[%s1678_s15 + $0xa0] sm:$0xff] %v1132_v62  ;;  %v1138_v0 = vld [vmem:[%s1682_s20 + $0xb8] sm:$0xff]  ;;  %1135 = vst [vmem:[%s1678_s15 + $0xa8] sm:$0xff] %v1134_v28  ;;  %v1140_v24 = vld [vmem:[%s1682_s20 + $0xc0] sm:$0xff] }
 0x1a1   : >> { %1137 = vst [vmem:[%s1678_s15 + $0xb0] sm:$0xff] %v1136_v63  ;;  %1139 = vst [vmem:[%s1678_s15 + $0xb8] sm:$0xff] %v1138_v0  ;;  %v1142_v1 = vld [vmem:[%s1682_s20 + $0xc8] sm:$0xff]  ;;  %v1144_v2 = vld [vmem:[%s1682_s20 + $0xd0] sm:$0xff] }
 0x1a2   : >> { %1141 = vst [vmem:[%s1678_s15 + $0xc0] sm:$0xff] %v1140_v24  ;;  %1143 = vst [vmem:[%s1678_s15 + $0xc8] sm:$0xff] %v1142_v1  ;;  %v1146_v3 = vld [vmem:[%s1682_s20 + $0xd8] sm:$0xff]  ;;  %v1148_v4 = vld [vmem:[%s1682_s20 + $0xe0] sm:$0xff] }
 0x1a3   : >> { %1145 = vst [vmem:[%s1678_s15 + $0xd0] sm:$0xff] %v1144_v2  ;;  %v1150_v5 = vld [vmem:[%s1682_s20 + $0xe8] sm:$0xff]  ;;  %1147 = vst [vmem:[%s1678_s15 + $0xd8] sm:$0xff] %v1146_v3  ;;  %v1152_v6 = vld [vmem:[%s1682_s20 + $0xf0] sm:$0xff] }
 0x1a4   : >> { %1149 = vst [vmem:[%s1678_s15 + $0xe0] sm:$0xff] %v1148_v4  ;;  %1151 = vst [vmem:[%s1678_s15 + $0xe8] sm:$0xff] %v1150_v5  ;;  %v1154_v7 = vld [vmem:[%s1682_s20 + $0xf8] sm:$0xff]  ;;  %s2314_s20 = smov %s2247_s8 }
 0x1a5   : >> { %1153 = vst [vmem:[%s1678_s15 + $0xf0] sm:$0xff] %v1152_v6  ;;  %1155 = vst [vmem:[%s1678_s15 + $0xf8] sm:$0xff] %v1154_v7  ;;  %s2313_s15 = smov %s1162_s9 }
 0x1a6 PF: > { %s2288_s10 = sand.u32 31, %s2320_s24   ;;  %s1348_s14 = sshll.u32 %s2180_s4, 8 }
 0x1a7   : > { %s1167_s17 = scalar_lea.vmem %s2062_s12, %s1348_s14 [#allocation2]   ;;  %s1169_s18 = scalar_lea.vmem %s2174_s29, %s1348_s14  }
 0x1a8   : > { %p1342_p13 = scmp.le.s32.totalorder %s2288_s10, 0 }
 0x1a9   : > { %s1692_s11 = smov (!%p1342_p13), %s1169_s18   ;;  %s1696_s21 = smov (!%p1342_p13), %s1167_s17  }
 0x1aa   : > { %1260 = sbr.rel (%p1342_p13) target bundleno = 443 (0x1bb), region = 127  ;;  %s1700_s22 = smov (!%p1342_p13), 0  }
 0x1ab   : > { %s1704_s23 = smov (!%p1342_p13), 0  }
 0x1b1 LB: >> { %v1179_v36 = vld [vmem:[%s1698_s21] sm:$0xff]  ;;  %s1181_s24 = sadd.s32 1, %s1702_s22  ;;  %s1173_s23 = sadd.s32 1, %s1706_s23   ;;  %s1706_s23 = sphi %s1704_s23, %s1173_s23   ;;  %s1702_s22 = sphi %s1700_s22, %s1701_s22   ;;  %s1698_s21 = sphi %s1696_s21, %s1186_s21   ;;  %s1694_s11 = sphi %s1692_s11, %s1187_s11  }
 0x1b2   : >> { %1180 = vst [vmem:[%s1694_s11] sm:$0xff] %v1179_v36  ;;  %p1182_p0 = scmp.ge.s32.totalorder %s1181_s24, %s2288_s10  ;;  %p1172_p1 = scmp.ge.s32.totalorder %s1173_s23, %s2288_s10 }
 0x1b4   : >> { %s2324_s24 = smov (%p1182_p0, %s1181_s24), 0  ;;  %1175 = sbr.rel (!%p1172_p1) target bundleno = 433 (0x1b1), region = 133 }
 0x1b5   : >> { %s1343_s12 = sshll.u32 %s2324_s24, 3  ;;  %s1701_s22 = smov %s2324_s24  }
 0x1b6   : >> { %s1186_s21 = scalar_lea.vmem %s1167_s17, %s1343_s12 [#allocation2]   ;;  %s1187_s11 = scalar_lea.vmem %s1169_s18, %s1343_s12  }
 0x1bb PF: > { %p10_p2 = scmp.ge.s32.totalorder %s1744_s16, 7   ;;  %s2316_s12 = smov %s1670_s13 }
 0x1bc   : > { %s2317_s13 = smov %s1752_s19  ;;  %s2318_s14 = smov %s1744_s16 }
 0x1bd   :  { %12 = sbr.rel (!%p10_p2) target bundleno = 2 (0x2), region = 144 }

// kernel: net_forward.7
= control target key start
LH: loop header
LB: loop body
LE: loop exit
PB: predicated region body
PF: predicated region fallthrough
CT: control target
= control target key end

     0   :  { %s460_s0 = inlined_call_operand.vmem [shape: f32[24,768], index: 0, kind: input, shape index: {}]   ;;  %s461_s1 = inlined_call_operand.vmem [shape: f32[24,768], index: 1, kind: input, shape index: {}]   ;;  %s462_s2 = inlined_call_operand.vmem [shape: f32[24,768], index: 2, kind: input, shape index: {}]   ;;  %s463_s3 = inlined_call_operand.vmem [shape: f32[24,768], index: 3, kind: input, shape index: {}]   ;;  %s464_s4 = inlined_call_operand.vmem [shape: f32[24,768], index: 4, kind: output, shape index: {}]  }
   0x1   :  { %v17_v0 = vld [vmem:[%s460_s0] sm:$0xff]  ;;  %v18_v5 = vld [vmem:[%s460_s0 + $0x8] sm:$0xff]  ;;  %v19_v11 = vld [vmem:[%s460_s0 + $0x10] sm:$0xff] }
   0x2   :  { %v35_v1 = vld [vmem:[%s461_s1] sm:$0xff]  ;;  %v36_v6 = vld [vmem:[%s461_s1 + $0x8] sm:$0xff]  ;;  %v37_v13 = vld [vmem:[%s461_s1 + $0x10] sm:$0xff] }
   0x3   :  { %v71_v2 = vld [vmem:[%s462_s2] sm:$0xff]  ;;  %v53_v3 = vmax.f32 %v17_v0, %v35_v1  ;;  %v54_v8 = vmax.f32 %v18_v5, %v36_v6  ;;  %v72_v9 = vld [vmem:[%s462_s2 + $0x8] sm:$0xff]  ;;  %v73_v14 = vld [vmem:[%s462_s2 + $0x10] sm:$0xff]  ;;  %v55_v17 = vmax.f32 %v19_v11, %v37_v13 }
   0x4   :  { %v89_v4 = vld [vmem:[%s463_s3] sm:$0xff]  ;;  %v90_v10 = vld [vmem:[%s463_s3 + $0x8] sm:$0xff]  ;;  %v91_v15 = vld [vmem:[%s463_s3 + $0x10] sm:$0xff] }
   0x5   :  { %v107_v7 = vmax.f32 %v71_v2, %v89_v4  ;;  %v108_v12 = vmax.f32 %v72_v9, %v90_v10  ;;  %v109_v18 = vmax.f32 %v73_v14, %v91_v15  ;;  %v20_v19 = vld [vmem:[%s460_s0 + $0x18] sm:$0xff]  ;;  %v21_v25 = vld [vmem:[%s460_s0 + $0x20] sm:$0xff]  ;;  %v22_v32 = vld [vmem:[%s460_s0 + $0x28] sm:$0xff] }
   0x6   :  { %v38_v20 = vld [vmem:[%s461_s1 + $0x18] sm:$0xff]  ;;  %v39_v26 = vld [vmem:[%s461_s1 + $0x20] sm:$0xff]  ;;  %v40_v34 = vld [vmem:[%s461_s1 + $0x28] sm:$0xff] }
   0x7   :  { %v125_v16 = vmax.f32 %v53_v3, %v107_v7  ;;  %v74_v21 = vld [vmem:[%s462_s2 + $0x18] sm:$0xff]  ;;  %v126_v22 = vmax.f32 %v54_v8, %v108_v12  ;;  %v56_v23 = vmax.f32 %v20_v19, %v38_v20  ;;  %v127_v27 = vmax.f32 %v55_v17, %v109_v18  ;;  %v75_v30 = vld [vmem:[%s462_s2 + $0x20] sm:$0xff]  ;;  %v76_v35 = vld [vmem:[%s462_s2 + $0x28] sm:$0xff] }
   0x8   :  { %v92_v24 = vld [vmem:[%s463_s3 + $0x18] sm:$0xff]  ;;  %v57_v29 = vmax.f32 %v21_v25, %v39_v26  ;;  %v93_v31 = vld [vmem:[%s463_s3 + $0x20] sm:$0xff]  ;;  %v94_v36 = vld [vmem:[%s463_s3 + $0x28] sm:$0xff]  ;;  %v58_v38 = vmax.f32 %v22_v32, %v40_v34 }
   0x9   :  { %143 = vst [vmem:[%s464_s4] sm:$0xff] %v125_v16  ;;  %v110_v28 = vmax.f32 %v74_v21, %v92_v24  ;;  %144 = vst [vmem:[%s464_s4 + $0x8] sm:$0xff] %v126_v22  ;;  %v111_v33 = vmax.f32 %v75_v30, %v93_v31  ;;  %v112_v39 = vmax.f32 %v76_v35, %v94_v36  ;;  %v23_v40 = vld [vmem:[%s460_s0 + $0x30] sm:$0xff]  ;;  %v24_v46 = vld [vmem:[%s460_s0 + $0x38] sm:$0xff] }
   0xa   :  { %145 = vst [vmem:[%s464_s4 + $0x10] sm:$0xff] %v127_v27  ;;  %v41_v41 = vld [vmem:[%s461_s1 + $0x30] sm:$0xff]  ;;  %v42_v47 = vld [vmem:[%s461_s1 + $0x38] sm:$0xff]  ;;  %v25_v53 = vld [vmem:[%s460_s0 + $0x40] sm:$0xff] }
   0xb   :  { %v128_v37 = vmax.f32 %v56_v23, %v110_v28  ;;  %v77_v42 = vld [vmem:[%s462_s2 + $0x30] sm:$0xff]  ;;  %v129_v43 = vmax.f32 %v57_v29, %v111_v33  ;;  %v59_v44 = vmax.f32 %v23_v40, %v41_v41  ;;  %v130_v48 = vmax.f32 %v58_v38, %v112_v39  ;;  %v78_v51 = vld [vmem:[%s462_s2 + $0x38] sm:$0xff]  ;;  %v43_v55 = vld [vmem:[%s461_s1 + $0x40] sm:$0xff] }
   0xc   :  { %v95_v45 = vld [vmem:[%s463_s3 + $0x30] sm:$0xff]  ;;  %v60_v50 = vmax.f32 %v24_v46, %v42_v47  ;;  %v96_v52 = vld [vmem:[%s463_s3 + $0x38] sm:$0xff]  ;;  %v79_v56 = vld [vmem:[%s462_s2 + $0x40] sm:$0xff]  ;;  %v61_v59 = vmax.f32 %v25_v53, %v43_v55 }
   0xd   :  { %146 = vst [vmem:[%s464_s4 + $0x18] sm:$0xff] %v128_v37  ;;  %v113_v49 = vmax.f32 %v77_v42, %v95_v45  ;;  %147 = vst [vmem:[%s464_s4 + $0x20] sm:$0xff] %v129_v43  ;;  %v114_v54 = vmax.f32 %v78_v51, %v96_v52  ;;  %v97_v57 = vld [vmem:[%s463_s3 + $0x40] sm:$0xff]  ;;  %v26_v61 = vld [vmem:[%s460_s0 + $0x48] sm:$0xff] }
   0xe   :  { %148 = vst [vmem:[%s464_s4 + $0x28] sm:$0xff] %v130_v48  ;;  %v115_v60 = vmax.f32 %v79_v56, %v97_v57  ;;  %v44_v62 = vld [vmem:[%s461_s1 + $0x48] sm:$0xff]  ;;  %v27_v3 = vld [vmem:[%s460_s0 + $0x50] sm:$0xff]  ;;  %v28_v10 = vld [vmem:[%s460_s0 + $0x58] sm:$0xff] }
   0xf   :  { %v131_v58 = vmax.f32 %v59_v44, %v113_v49  ;;  %v80_v63 = vld [vmem:[%s462_s2 + $0x48] sm:$0xff]  ;;  %v132_v0 = vmax.f32 %v60_v50, %v114_v54  ;;  %v62_v1 = vmax.f32 %v26_v61, %v44_v62  ;;  %v45_v4 = vld [vmem:[%s461_s1 + $0x50] sm:$0xff]  ;;  %v46_v12 = vld [vmem:[%s461_s1 + $0x58] sm:$0xff] }
  0x10   :  { %v98_v2 = vld [vmem:[%s463_s3 + $0x48] sm:$0xff]  ;;  %v133_v5 = vmax.f32 %v61_v59, %v115_v60  ;;  %v63_v7 = vmax.f32 %v27_v3, %v45_v4  ;;  %v81_v8 = vld [vmem:[%s462_s2 + $0x50] sm:$0xff]  ;;  %v82_v13 = vld [vmem:[%s462_s2 + $0x58] sm:$0xff]  ;;  %v64_v16 = vmax.f32 %v28_v10, %v46_v12 }
  0x11   :  { %149 = vst [vmem:[%s464_s4 + $0x30] sm:$0xff] %v131_v58  ;;  %v116_v6 = vmax.f32 %v80_v63, %v98_v2  ;;  %v99_v9 = vld [vmem:[%s463_s3 + $0x50] sm:$0xff]  ;;  %150 = vst [vmem:[%s464_s4 + $0x38] sm:$0xff] %v132_v0  ;;  %v100_v14 = vld [vmem:[%s463_s3 + $0x58] sm:$0xff] }
  0x12   :  { %v117_v11 = vmax.f32 %v81_v8, %v99_v9  ;;  %151 = vst [vmem:[%s464_s4 + $0x40] sm:$0xff] %v133_v5  ;;  %v118_v17 = vmax.f32 %v82_v13, %v100_v14  ;;  %v29_v18 = vld [vmem:[%s460_s0 + $0x60] sm:$0xff]  ;;  %v30_v24 = vld [vmem:[%s460_s0 + $0x68] sm:$0xff]  ;;  %v31_v31 = vld [vmem:[%s460_s0 + $0x70] sm:$0xff] }
  0x13   :  { %v134_v15 = vmax.f32 %v62_v1, %v116_v6  ;;  %v47_v19 = vld [vmem:[%s461_s1 + $0x60] sm:$0xff]  ;;  %v48_v25 = vld [vmem:[%s461_s1 + $0x68] sm:$0xff]  ;;  %v49_v33 = vld [vmem:[%s461_s1 + $0x70] sm:$0xff] }
  0x14   :  { %v83_v20 = vld [vmem:[%s462_s2 + $0x60] sm:$0xff]  ;;  %v135_v21 = vmax.f32 %v63_v7, %v117_v11  ;;  %v65_v22 = vmax.f32 %v29_v18, %v47_v19  ;;  %v136_v26 = vmax.f32 %v64_v16, %v118_v17  ;;  %v66_v28 = vmax.f32 %v30_v24, %v48_v25  ;;  %v84_v29 = vld [vmem:[%s462_s2 + $0x68] sm:$0xff]  ;;  %v85_v34 = vld [vmem:[%s462_s2 + $0x70] sm:$0xff] }
  0x15   :  { %v101_v23 = vld [vmem:[%s463_s3 + $0x60] sm:$0xff]  ;;  %152 = vst [vmem:[%s464_s4 + $0x48] sm:$0xff] %v134_v15  ;;  %v102_v30 = vld [vmem:[%s463_s3 + $0x68] sm:$0xff]  ;;  %v103_v35 = vld [vmem:[%s463_s3 + $0x70] sm:$0xff]  ;;  %v67_v37 = vmax.f32 %v31_v31, %v49_v33 }
  0x16   :  { %v119_v27 = vmax.f32 %v83_v20, %v101_v23  ;;  %153 = vst [vmem:[%s464_s4 + $0x50] sm:$0xff] %v135_v21  ;;  %v120_v32 = vmax.f32 %v84_v29, %v102_v30  ;;  %154 = vst [vmem:[%s464_s4 + $0x58] sm:$0xff] %v136_v26  ;;  %v121_v38 = vmax.f32 %v85_v34, %v103_v35  ;;  %v32_v39 = vld [vmem:[%s460_s0 + $0x78] sm:$0xff]  ;;  %v33_v45 = vld [vmem:[%s460_s0 + $0x80] sm:$0xff] }
  0x17   :  { %v50_v40 = vld [vmem:[%s461_s1 + $0x78] sm:$0xff]  ;;  %v51_v46 = vld [vmem:[%s461_s1 + $0x80] sm:$0xff]  ;;  %v34_v52 = vld [vmem:[%s460_s0 + $0x88] sm:$0xff] }
  0x18   :  { %v137_v36 = vmax.f32 %v65_v22, %v119_v27  ;;  %v86_v41 = vld [vmem:[%s462_s2 + $0x78] sm:$0xff]  ;;  %v138_v42 = vmax.f32 %v66_v28, %v120_v32  ;;  %v68_v43 = vmax.f32 %v32_v39, %v50_v40  ;;  %v139_v47 = vmax.f32 %v67_v37, %v121_v38  ;;  %v87_v50 = vld [vmem:[%s462_s2 + $0x80] sm:$0xff]  ;;  %v52_v54 = vld [vmem:[%s461_s1 + $0x88] sm:$0xff] }
  0x19   :  { %v104_v44 = vld [vmem:[%s463_s3 + $0x78] sm:$0xff]  ;;  %v69_v49 = vmax.f32 %v33_v45, %v51_v46  ;;  %v105_v51 = vld [vmem:[%s463_s3 + $0x80] sm:$0xff]  ;;  %v88_v55 = vld [vmem:[%s462_s2 + $0x88] sm:$0xff]  ;;  %v70_v58 = vmax.f32 %v34_v52, %v52_v54 }
  0x1a   :  { %155 = vst [vmem:[%s464_s4 + $0x60] sm:$0xff] %v137_v36  ;;  %v122_v48 = vmax.f32 %v86_v41, %v104_v44  ;;  %156 = vst [vmem:[%s464_s4 + $0x68] sm:$0xff] %v138_v42  ;;  %v123_v53 = vmax.f32 %v87_v50, %v105_v51  ;;  %v106_v56 = vld [vmem:[%s463_s3 + $0x88] sm:$0xff] }
  0x1b   :  { %157 = vst [vmem:[%s464_s4 + $0x70] sm:$0xff] %v139_v47  ;;  %v124_v59 = vmax.f32 %v88_v55, %v106_v56 }
  0x1c   :  { %v140_v57 = vmax.f32 %v68_v43, %v122_v48  ;;  %v141_v60 = vmax.f32 %v69_v49, %v123_v53 }
  0x1d   :  { %v142_v61 = vmax.f32 %v70_v58, %v124_v59 }
  0x1e   :  { %158 = vst [vmem:[%s464_s4 + $0x78] sm:$0xff] %v140_v57  ;;  %159 = vst [vmem:[%s464_s4 + $0x80] sm:$0xff] %v141_v60 }
  0x1f   :  { %160 = vst [vmem:[%s464_s4 + $0x88] sm:$0xff] %v142_v61 }

// kernel: net_forward.9
= control target key start
LH: loop header
LB: loop body
LE: loop exit
PB: predicated region body
PF: predicated region fallthrough
CT: control target
= control target key end

     0   :  { %12 = vsyncpa [#allocation3], 0  ;;  %v628_v47 = vmov 1983009808   ;;  %v101_v49 = vlaneseq  ;;  %s921_s0 = inlined_call_operand.vmem [shape: f32[2,512], index: 0, kind: input, shape index: {}]   ;;  %s922_s1 = inlined_call_operand.vmem [shape: f32[512,64], index: 1, kind: input, shape index: {}]   ;;  %s923_s2 = inlined_call_operand.vmem [shape: f32[1,64], index: 2, kind: input, shape index: {}]   ;;  %s924_s3 = inlined_call_operand.vmem [shape: f32[64,10], index: 3, kind: input, shape index: {}]   ;;  %s925_s4 = inlined_call_operand.vmem [shape: f32[1,10], index: 4, kind: input, shape index: {}]   ;;  %s926_s5 = inlined_call_operand.hbm [shape: f32[2,10], index: 5, kind: output, shape index: {0}]   ;;  %s927_s6 = inlined_call_operand.hbm [shape: f32[2,64], index: 6, kind: output, shape index: {1}]  }
   0x1   :  { %v41_v0 = vld [vmem:[%s922_s1 + $0x80] sm:$0xff]  ;;  %v42_v1 = vld [vmem:[%s922_s1 + $0x88] sm:$0xff]  ;;  %v43_v11 = vld [vmem:[%s922_s1 + $0x90] sm:$0xff]  ;;  %v99_v48 = vunpack.c.l.s4 %v628_v47 }
   0x2   :  { %v25_v2 = vld [vmem:[%s922_s1] sm:$0xff]  ;;  %v493_v3 = vpack.c.bf16 %v42_v1, %v41_v0  ;;  %v26_v4 = vld [vmem:[%s922_s1 + $0x8] sm:$0xff]  ;;  %v44_v13 = vld [vmem:[%s922_s1 + $0x98] sm:$0xff]  ;;  %v102_v0 = vshrl.u32 %v101_v49, 7 }
   0x3   :  { %v73_v5 = vld [vmem:[%s922_s1 + $0x180] sm:$0xff]  ;;  %v74_v6 = vld [vmem:[%s922_s1 + $0x188] sm:$0xff]  ;;  %v495_v7 = vpack.c.bf16 %v26_v4, %v25_v2  ;;  %v27_v14 = vld [vmem:[%s922_s1 + $0x10] sm:$0xff]  ;;  %v497_v16 = vpack.c.bf16 %v44_v13, %v43_v11  ;;  %v100_v63 = vunpack.c.0.s8 %v99_v48 }
   0x4   :  { %v525_v8 = vpack.c.bf16 %v74_v6, %v73_v5  ;;  %v57_v9 = vld [vmem:[%s922_s1 + $0x100] sm:$0xff]  ;;  %v58_v10 = vld [vmem:[%s922_s1 + $0x108] sm:$0xff]  ;;  %494 = vmatprep.subr.bf16.mxu0 %v493_v3  ;;  %v28_v15 = vld [vmem:[%s922_s1 + $0x18] sm:$0xff] }
   0x5   :  { %v527_v12 = vpack.c.bf16 %v58_v10, %v57_v9  ;;  %496 = vmatpush3.bf16.msra.mxu0 %v495_v7  ;;  %v499_v17 = vpack.c.bf16 %v28_v15, %v27_v14  ;;  %v75_v18 = vld [vmem:[%s922_s1 + $0x190] sm:$0xff]  ;;  %v76_v19 = vld [vmem:[%s922_s1 + $0x198] sm:$0xff]  ;;  %v45_v23 = vld [vmem:[%s922_s1 + $0xa0] sm:$0xff]  ;;  %v103_v13 = vsub.s32 %v100_v63, %v102_v0 }
   0x6   :  { %526 = vmatprep.subr.bf16.mxu1 %v525_v8  ;;  %v59_v20 = vld [vmem:[%s922_s1 + $0x110] sm:$0xff]  ;;  %v529_v21 = vpack.c.bf16 %v76_v19, %v75_v18  ;;  %v60_v22 = vld [vmem:[%s922_s1 + $0x118] sm:$0xff]  ;;  %v46_v24 = vld [vmem:[%s922_s1 + $0xa8] sm:$0xff]  ;;  %498 = vmatprep.subr.bf16.mxu0 %v497_v16 }
   0x7   :  { %528 = vmatpush3.bf16.msra.mxu1 %v527_v12  ;;  %v531_v25 = vpack.c.bf16 %v60_v22, %v59_v20  ;;  %v501_v26 = vpack.c.bf16 %v46_v24, %v45_v23  ;;  %v29_v27 = vld [vmem:[%s922_s1 + $0x20] sm:$0xff]  ;;  %v30_v28 = vld [vmem:[%s922_s1 + $0x28] sm:$0xff]  ;;  %v47_v35 = vld [vmem:[%s922_s1 + $0xb0] sm:$0xff] }
   0x8   :  { %v77_v29 = vld [vmem:[%s922_s1 + $0x1a0] sm:$0xff]  ;;  %530 = vmatprep.subr.bf16.mxu1 %v529_v21  ;;  %v78_v30 = vld [vmem:[%s922_s1 + $0x1a8] sm:$0xff]  ;;  %v503_v33 = vpack.c.bf16 %v30_v28, %v29_v27  ;;  %v48_v36 = vld [vmem:[%s922_s1 + $0xb8] sm:$0xff] }
   0x9   :  { %v61_v31 = vld [vmem:[%s922_s1 + $0x120] sm:$0xff]  ;;  %v62_v32 = vld [vmem:[%s922_s1 + $0x128] sm:$0xff]  ;;  %500 = vmatpush3.bf16.msra.mxu0 %v499_v17  ;;  %v533_v34 = vpack.c.bf16 %v78_v30, %v77_v29  ;;  %v31_v37 = vld [vmem:[%s922_s1 + $0x30] sm:$0xff]  ;;  %v505_v39 = vpack.c.bf16 %v48_v36, %v47_v35 }
   0xa   :  { %502 = vmatprep.subr.bf16.mxu0 %v501_v26  ;;  %v535_v38 = vpack.c.bf16 %v62_v32, %v61_v31  ;;  %v32_v40 = vld [vmem:[%s922_s1 + $0x38] sm:$0xff]  ;;  %v79_v41 = vld [vmem:[%s922_s1 + $0x1b0] sm:$0xff]  ;;  %v49_v46 = vld [vmem:[%s922_s1 + $0xc0] sm:$0xff] }
   0xb   :  { %532 = vmatpush3.bf16.msra.mxu1 %v531_v25  ;;  %v80_v42 = vld [vmem:[%s922_s1 + $0x1b8] sm:$0xff]  ;;  %v63_v44 = vld [vmem:[%s922_s1 + $0x130] sm:$0xff]  ;;  %v50_v50 = vld [vmem:[%s922_s1 + $0xc8] sm:$0xff]  ;;  %v507_v51 = vpack.c.bf16 %v32_v40, %v31_v37 }
   0xc   :  { %534 = vmatprep.subr.bf16.mxu1 %v533_v34  ;;  %v537_v43 = vpack.c.bf16 %v80_v42, %v79_v41  ;;  %v64_v45 = vld [vmem:[%s922_s1 + $0x138] sm:$0xff]  ;;  %v81_v52 = vld [vmem:[%s922_s1 + $0x1c0] sm:$0xff]  ;;  %v82_v53 = vld [vmem:[%s922_s1 + $0x1c8] sm:$0xff]  ;;  %v509_v55 = vpack.c.bf16 %v50_v50, %v49_v46 }
   0xd   :  { %504 = vmatpush3.bf16.msra.mxu0 %v503_v33  ;;  %v539_v54 = vpack.c.bf16 %v64_v45, %v63_v44  ;;  %v33_v56 = vld [vmem:[%s922_s1 + $0x40] sm:$0xff]  ;;  %v34_v57 = vld [vmem:[%s922_s1 + $0x48] sm:$0xff]  ;;  %v541_v59 = vpack.c.bf16 %v82_v53, %v81_v52  ;;  %v51_v61 = vld [vmem:[%s922_s1 + $0xd0] sm:$0xff] }
   0xe   :  { %506 = vmatprep.subr.bf16.mxu0 %v505_v39  ;;  %v65_v58 = vld [vmem:[%s922_s1 + $0x140] sm:$0xff]  ;;  %v66_v60 = vld [vmem:[%s922_s1 + $0x148] sm:$0xff]  ;;  %v52_v62 = vld [vmem:[%s922_s1 + $0xd8] sm:$0xff]  ;;  %v511_v3 = vpack.c.bf16 %v34_v57, %v33_v56 }
   0xf   :  { %536 = vmatpush3.bf16.msra.mxu1 %v535_v38  ;;  %v83_v1 = vld [vmem:[%s922_s1 + $0x1d0] sm:$0xff]  ;;  %v84_v2 = vld [vmem:[%s922_s1 + $0x1d8] sm:$0xff]  ;;  %v543_v4 = vpack.c.bf16 %v66_v60, %v65_v58  ;;  %v513_v5 = vpack.c.bf16 %v52_v62, %v51_v61  ;;  %v53_v11 = vld [vmem:[%s922_s1 + $0xe0] sm:$0xff] }
  0x10   :  { %538 = vmatprep.subr.bf16.mxu1 %v537_v43  ;;  %v35_v6 = vld [vmem:[%s922_s1 + $0x50] sm:$0xff]  ;;  %v36_v7 = vld [vmem:[%s922_s1 + $0x58] sm:$0xff]  ;;  %v545_v9 = vpack.c.bf16 %v84_v2, %v83_v1  ;;  %v54_v12 = vld [vmem:[%s922_s1 + $0xe8] sm:$0xff] }
  0x11   :  { %508 = vmatpush3.bf16.msra.mxu0 %v507_v51  ;;  %v67_v8 = vld [vmem:[%s922_s1 + $0x150] sm:$0xff]  ;;  %v68_v10 = vld [vmem:[%s922_s1 + $0x158] sm:$0xff]  ;;  %v85_v14 = vld [vmem:[%s922_s1 + $0x1e0] sm:$0xff]  ;;  %v515_v16 = vpack.c.bf16 %v36_v7, %v35_v6  ;;  %v517_v19 = vpack.c.bf16 %v54_v12, %v53_v11 }
  0x12   :  { %510 = vmatprep.subr.bf16.mxu0 %v509_v55  ;;  %v86_v15 = vld [vmem:[%s922_s1 + $0x1e8] sm:$0xff]  ;;  %v37_v17 = vld [vmem:[%s922_s1 + $0x60] sm:$0xff]  ;;  %v547_v18 = vpack.c.bf16 %v68_v10, %v67_v8  ;;  %v55_v25 = vld [vmem:[%s922_s1 + $0xf0] sm:$0xff] }
  0x13   :  { %540 = vmatpush3.bf16.msra.mxu1 %v539_v54  ;;  %v38_v20 = vld [vmem:[%s922_s1 + $0x68] sm:$0xff]  ;;  %v69_v21 = vld [vmem:[%s922_s1 + $0x160] sm:$0xff]  ;;  %v549_v23 = vpack.c.bf16 %v86_v15, %v85_v14  ;;  %v56_v26 = vld [vmem:[%s922_s1 + $0xf8] sm:$0xff] }
  0x14   :  { %542 = vmatprep.subr.bf16.mxu1 %v541_v59  ;;  %v24_v22 = vld [vmem:[%s921_s0] sm:$0xff]  ;;  %v70_v24 = vld [vmem:[%s922_s1 + $0x168] sm:$0xff]  ;;  %v87_v29 = vld [vmem:[%s922_s1 + $0x1f0] sm:$0xff] }
  0x15   :  { %512 = vmatpush3.bf16.msra.mxu0 %v511_v3  ;;  %v104_v27 = vrot.slane %v24_v22, %v103_v13  ;;  %v97_v28 = vcombine.high %v24_v22, %v24_v22  ;;  %v88_v30 = vld [vmem:[%s922_s1 + $0x1f8] sm:$0xff] }
  0x16   :  { %514 = vmatprep.subr.bf16.mxu0 %v513_v5 }
  0x17   :  { %544 = vmatpush3.bf16.msra.mxu1 %v543_v4 }
  0x18   :  { %546 = vmatprep.subr.bf16.mxu1 %v545_v9 }
  0x19   :  { %13 = vsyncpa [#allocation5], 0  ;;  %516 = vmatpush3.bf16.msra.mxu0 %v515_v16  ;;  %v519_v31 = vpack.c.bf16 %v38_v20, %v37_v17  ;;  %v112_v32 = vcombine.high %v104_v27, %v104_v27  ;;  %v111_v33 = vrot.slane %v97_v28, %v103_v13  ;;  %v551_v34 = vpack.c.bf16 %v70_v24, %v69_v21  ;;  %v39_v36 = vld [vmem:[%s922_s1 + $0x70] sm:$0xff]  ;;  %v40_v37 = vld [vmem:[%s922_s1 + $0x78] sm:$0xff] }
  0x1a   :  { %518 = vmatprep.subr.bf16.mxu0 %v517_v19  ;;  %v521_v35 = vpack.c.bf16 %v56_v26, %v55_v25  ;;  %v553_v38 = vpack.c.bf16 %v88_v30, %v87_v29  ;;  %v71_v39 = vld [vmem:[%s922_s1 + $0x170] sm:$0xff]  ;;  %v72_v40 = vld [vmem:[%s922_s1 + $0x178] sm:$0xff]  ;;  %v523_v42 = vpack.c.bf16 %v40_v37, %v39_v36  ;;  %v261_v44 = vld [vmem:[%s924_s3] sm:$0xff]  ;;  %v629_v47 = vmov 0.0|0.0  }
  0x1b   :  { %548 = vmatpush3.bf16.msra.mxu1 %v547_v18  ;;  %182 = vmatprep.mubr.f32.mxu0 %v112_v32  ;;  %v113_v41 = vcombine.high %v111_v33, %v111_v33  ;;  %v555_v43 = vpack.c.bf16 %v72_v40, %v71_v39  ;;  %v262_v45 = vld [vmem:[%s924_s3 + $0x8] sm:$0xff]  ;;  %v263_v48 = vld [vmem:[%s924_s3 + $0x10] sm:$0xff]  ;;  %v264_v49 = vld [vmem:[%s924_s3 + $0x18] sm:$0xff]  ;;  %vm630_vm0 = vmmov 0   ;;  %v631_v57 = vmov 0.0  }
  0x1c   :  { %550 = vmatprep.subr.bf16.mxu1 %v549_v23  ;;  %v558_v46 = vpack.c.bf16 %v262_v45, %v261_v44  ;;  %v561_v50 = vpack.c.bf16 %v264_v49, %v263_v48  ;;  %v265_v51 = vld [vmem:[%s924_s3 + $0x20] sm:$0xff]  ;;  %v266_v52 = vld [vmem:[%s924_s3 + $0x28] sm:$0xff]  ;;  %v267_v54 = vld [vmem:[%s924_s3 + $0x30] sm:$0xff]  ;;  %vm276_vm1 = vcmask 523264   ;;  %vm259_vm2 = vcmask 517120  }
  0x1d   :  { %520 = vmatpush3.bf16.msra.mxu0 %v519_v31  ;;  %252 = vmatprep.mubr.f32.mxu1 %v113_v41  ;;  %v564_v53 = vpack.c.bf16 %v266_v52, %v265_v51  ;;  %v268_v55 = vld [vmem:[%s924_s3 + $0x38] sm:$0xff]  ;;  %v392_v59 = vld [vmem:[%s923_s2] ss:$0 sm:$0xff]  ;;  %vm350_vm3 = vcmask 74752   ;;  %s632_s2 = smov [#allocation4]  }
  0x1e   :  { %522 = vmatprep.subr.bf16.mxu0 %v521_v35  ;;  %v567_v56 = vpack.c.bf16 %v268_v55, %v267_v54  ;;  %v393_v4 = vld [vmem:[%s925_s4] ss:$0 sm:$0xff]  ;;  %s380_s23 = sshll.u32 %s632_s2, 4  ;;  %s381_s23 = int_to_ptr.vmem [resolvable:$true] %s380_s23 }
  0x1f   :  { %552 = vmatpush3.bf16.msra.mxu1 %v551_v34  ;;  %s580_s24 = scalar_lea.vmem %s381_s23, 32  ;;  %p585_p1 = scmp.lt.s32.totalorder %s381_s23, %s381_s23 }
  0x20   :  { %554 = vmatprep.subr.bf16.mxu1 %v553_v38  ;;  %p581_p0 = scmp.ne.s32.totalorder %s381_s23, %s580_s24  ;;  %p586_p2 = scmp.lt.s32.totalorder %s580_s24, %s580_s24 }
  0x21   :  { %524 = vmatpush3.bf16.msra.mxu0 %v523_v42 }
  0x22   :  { %557 = vmatprep.subr.bf16.mxu0 %v629_v47  ;;  %p587_p3 = por %p586_p2, %p585_p1 }
  0x23   :  { %556 = vmatpush3.bf16.msra.mxu1 %v555_v43 }
  0x24   :  { %183 = vmatmul.mubr.f32.vlgmr.msra.gmra.mrb[0].mxu0 %v104_v27  ;;  %p588_p4 = pnand %p587_p3, %p581_p0 }
  0x25   :  { %559 = vmatpush3.bf16.msra.mxu0 %v558_v46  ;;  %490 = vmatprep.mubr.msk.f32.mxu0 %vm630_vm0, %v631_v57 }
  0x26   :  { %253 = vmatmul.mubr.f32.vlgmr.msra.gmra.mrb[0].mxu1 %v111_v33  ;;  %560 = vmatprep.subr.bf16.mxu0 %v629_v47 }
  0x29   :  { %562 = vmatpush3.bf16.msra.mxu0 %v561_v50 }
  0x2a   :  { %563 = vmatprep.subr.bf16.mxu0 %v629_v47 }
  0x2d   :  { %565 = vmatpush3.bf16.msra.mxu0 %v564_v53 }
  0x2e   :  { %566 = vmatprep.subr.bf16.mxu0 %v629_v47 }
  0x31   :  { %568 = vmatpush3.bf16.msra.mxu0 %v567_v56 }
  0xf7   :  { %v427_v58 = vpop.f32.mrb[0].mxu0 }
  0xf8   :  { %v428_v60 = vpop.f32.mrb[1].mxu0 }
  0xf9   :  { %v462_v61 = vpop.f32.mrb[0].mxu1  ;;  %v429_v62 = vadd.f32 %v428_v60, %v427_v58 }
  0xfa   :  { %v463_v63 = vpop.f32.mrb[1].mxu1 }
  0xfb   :  { %v464_v0 = vadd.f32 %v463_v63, %v462_v61  ;;  %v185_v1 = vadd.f32 %v429_v62, %v392_v59 }
  0xfd   :  { %v255_v2 = vadd.f32 %v464_v0, %v185_v1 }
  0xff   :  { %v258_v3 = vmax.f32 %v255_v2, 0.0 }
 0x101   :  { %491 = vmatmul.mubr.msk.f32.vlgmr.msra.gmra.mrb[2].mxu0 %vm276_vm1, %v258_v3  ;;  %260 = vst.msk [vmem:[#allocation4] sm:$0x3] %vm259_vm2, %v258_v3 }
 0x1d4   :  { %v346_v5 = vpop.f32.mrb[2].mxu0 }
 0x1d5   :  { %v347_v6 = vadd.f32 %v393_v4, %v346_v5  ;;  %v492_v7 = vpop.f32.mrb[3].mxu0 }
 0x1d7   :  { %v351_v8 = vsel %vm350_vm3, %v347_v6, -inf }
 0x1d8   :  { %352 = vmax.xlane.f32.xlu0 %v351_v8 }
 0x265   :  { %v353_v9 = vpop.xlane.xlu0 %352 }
 0x266   :  { %v354_v10 = vsub.f32 %v347_v6, %v353_v9 }
 0x268   :  { %v355_v11 = vmul.f32 1.442695, %v354_v10 }
 0x26a   :  { %576 = vpow2.f32 %v355_v11 }
 0x274   :  { %v577_v12 = vpop.eup %576 }
 0x275   :  { %v357_v13 = vsel %vm350_vm3, %v577_v12, 0.0 }
 0x276   :  { %358 = vadd.xlane.f32.xlu0 %v357_v13 }
 0x277   :  { %591 = shalt.err (!%p588_p4)
}
 0x278   :  { %s592_s26 = scalar_lea.hbm %s927_s6, 32 }
 0x279   :  { %p593_p5 = scmp.ne.s32.totalorder %s927_s6, %s592_s26  ;;  %p596_p6 = scmp.lt.u32.totalorder %s592_s26, %s927_s6 }
 0x27b   :  { %p598_p7 = pnand %p596_p6, %p593_p5 }
 0x27d   :  { %601 = shalt.err (!%p598_p7)
}
 0x27e   :  { %383 = dma.vmem_to_hbm [thread:$0]  %s381_s23, 32, %s927_s6, [#allocation5]  }
 0x27f   :  { %s633_s9 = smov [#allocation2]  }
 0x280   :  { %s370_s1 = sshll.u32 %s633_s9, 4  ;;  %s371_s1 = int_to_ptr.vmem [resolvable:$true] %s370_s1 }
 0x281   :  { %s602_s10 = scalar_lea.vmem %s371_s1, 32  ;;  %p607_p9 = scmp.lt.s32.totalorder %s371_s1, %s371_s1 }
 0x282   :  { %p603_p8 = scmp.ne.s32.totalorder %s371_s1, %s602_s10  ;;  %p608_p10 = scmp.lt.s32.totalorder %s602_s10, %s602_s10 }
 0x284   :  { %p609_p11 = por %p608_p10, %p607_p9 }
 0x286   :  { %p610_p12 = pnand %p609_p11, %p603_p8 }
 0x303   :  { %v359_v14 = vpop.xlane.xlu0 %358 }
 0x304   :  { %578 = vlog2.f32 %v359_v14 }
 0x30e   :  { %v579_v15 = vpop.eup %578 }
 0x30f   :  { %v361_v16 = vmul.f32 0.6931472, %v579_v15 }
 0x311   :  { %v362_v17 = vsub.f32 %v354_v10, %v361_v16 }
 0x313   :  { %363 = vst.msk [vmem:[#allocation2] sm:$0x3] %vm350_vm3, %v362_v17 }
 0x314   :  { %613 = shalt.err (!%p610_p12)
}
 0x315   :  { %s614_s6 = scalar_lea.hbm %s926_s5, 32 }
 0x316   :  { %p615_p13 = scmp.ne.s32.totalorder %s926_s5, %s614_s6  ;;  %p618_p0 = scmp.lt.u32.totalorder %s614_s6, %s926_s5 }
 0x318   :  { %p620_p1 = pnand %p618_p0, %p615_p13 }
 0x31a   :  { %623 = shalt.err (!%p620_p1)
}
 0x31b   :  { %373 = dma.vmem_to_hbm [thread:$0]  %s371_s1, 32, %s926_s5, [#allocation3]  }
 0x31c   :  { %624 = dma.done.wait [#allocation3], 32  }
 0x31d   :  { %625 = vsyncadd [#allocation3], 4294967264 }
 0x31e   :  { %626 = dma.done.wait [#allocation5], 32  }
 0x31f   :  { %627 = vsyncadd [#allocation5], 4294967264 }
 0x320   :  { %390 = vsyncpa [#allocation3], 1 }
 0x321   :  { %391 = vsyncpa [#allocation5], 1 }

// kernel: net_forward.8
= control target key start
LH: loop header
LB: loop body
LE: loop exit
PB: predicated region body
PF: predicated region fallthrough
CT: control target
= control target key end

     0   :  { %s6287_s12 = smov 0   ;;  %s6289_s13 = smov 0   ;;  %s7001_s0 = inlined_call_operand.vmem [shape: f32[2,9216], index: 0, kind: input, shape index: {}]   ;;  %s7002_s1 = inlined_call_operand.vmem [shape: bf16[9216,512], index: 1, kind: input, shape index: {}]   ;;  %s7003_s2 = inlined_call_operand.vmem [shape: f32[1,512], index: 2, kind: input, shape index: {}]   ;;  %s7004_s3 = inlined_call_operand.vmem [shape: f32[2,512], index: 3, kind: output, shape index: {}]  }
   0x1   :  { %s6291_s14 = smov 0  }
   0x2 LB: > { %s22_s15 = sadd.s32 1, %s6259_s13  ;;  %p4696_p0 = scmp.ge.s32.totalorder %s6263_s14, 1  ;;  %s6263_s14 = sphi %s6291_s14, %s13_s14   ;;  %s6259_s13 = sphi %s6289_s13, %s7006_s13   ;;  %s6255_s12 = sphi %s6287_s12, %s7005_s12  }
   0x3   : > { %p23_p1 = scmp.ge.s32.totalorder %s22_s15, 4  ;;  %p168_p2 = scmp.lt.s32.totalorder %s6263_s14, 5 }
   0x5   : > { %s7008_s15 = smov (%p23_p1, %s22_s15), 0  ;;  %p169_p3 = pnand %p4696_p0, %p168_p2 }
   0x6   : > { %s202_s16 = smul.u32 (!%p169_p3), 18, %s6255_s12  ;;  %p4700_p6 = scmp.ne.s32.totalorder (!%p169_p3), %s6255_s12, 0 }
   0x7   : > { %172 = sbr.rel (%p169_p3) target bundleno = 835 (0x343), region = 32 }
   0x8   : > { %s212_s17 = smul.u32 (!%p169_p3), 288, %s6255_s12  ;;  %p205_p4 = scmp.lt.s32.totalorder (!%p169_p3), %s202_s16, 71 }
   0xa   : > { %p213_p5 = scmp.lt.s32.totalorder (!%p169_p3), %s212_s17, 1151 }
   0xe   : > { %s7010_s16 = smov (!%p205_p4, %s202_s16), 71  ;;  %s7012_s17 = smov (!%p213_p5, %s212_s17), 1151 }
   0xf   : > { %s4697_s18 = sshll.u32 %s7010_s16, 1  ;;  %s5282_s22 = sshll.u32 %s7012_s17, 4  ;;  %v6265_v0 = vmov (!%p4700_p6), 0.0  }
  0x10   : > { %s6312_s21 = scalar_lea.vmem %s7001_s0, %s4697_s18  ;;  %s6317_s25 = scalar_lea.vmem %s7002_s1, %s5282_s22  ;;  %228 = vst [vmem:[#allocation2] sm:$0xff] (!%p4700_p6), %v6265_v0 }
  0x11   : > { %227 = sbr.rel (%p4700_p6) target bundleno = 24 (0x18), region = 36 }
  0x18 PF: > { %v5373_v1 = vld [vmem:[%s6317_s25 + $0x4] ss:$16 sps:$4 sm:$0xff]   ;;  %v5375_v2 = vld [vmem:[%s6317_s25 + $0xc] ss:$16 sps:$4 sm:$0xff]   ;;  %v5377_v3 = vld [vmem:[%s6317_s25] ss:$16 sps:$4 sm:$0xff]   ;;  %v243_v39 = vlaneseq }
  0x19   : > { %3808 = vmatprep.subr.bf16.mxu0 %v5373_v1  ;;  %v5378_v4 = vld [vmem:[%s6317_s25 + $0x8] ss:$16 sps:$4 sm:$0xff]   ;;  %4177 = vmatprep.subr.bf16.mxu1 %v5375_v2  ;;  %v5379_v5 = vld [vmem:[%s6317_s25 + $0x24] ss:$16 sps:$4 sm:$0xff]   ;;  %v5381_v6 = vld [vmem:[%s6317_s25 + $0x2c] ss:$16 sps:$4 sm:$0xff]  }
  0x1a   : > { %3809 = vmatpush1.bf16.msra.mxu0 %v5377_v3  ;;  %4178 = vmatpush1.bf16.msra.mxu1 %v5378_v4  ;;  %v5383_v7 = vld [vmem:[%s6317_s25 + $0x20] ss:$16 sps:$4 sm:$0xff]   ;;  %v5384_v8 = vld [vmem:[%s6317_s25 + $0x28] ss:$16 sps:$4 sm:$0xff]   ;;  %v5385_v9 = vld [vmem:[%s6317_s25 + $0x44] ss:$16 sps:$4 sm:$0xff]  }
  0x1b   : > { %3810 = vmatprep.subr.bf16.mxu0 %v5379_v5  ;;  %4179 = vmatprep.subr.bf16.mxu1 %v5381_v6  ;;  %v5387_v10 = vld [vmem:[%s6317_s25 + $0x4c] ss:$16 sps:$4 sm:$0xff]   ;;  %v5389_v11 = vld [vmem:[%s6317_s25 + $0x40] ss:$16 sps:$4 sm:$0xff]   ;;  %v5390_v12 = vld [vmem:[%s6317_s25 + $0x48] ss:$16 sps:$4 sm:$0xff]  }
  0x1c   : > { %v5391_v13 = vld [vmem:[%s6317_s25 + $0x64] ss:$16 sps:$4 sm:$0xff]   ;;  %v5393_v14 = vld [vmem:[%s6317_s25 + $0x6c] ss:$16 sps:$4 sm:$0xff]   ;;  %v5395_v15 = vld [vmem:[%s6317_s25 + $0x60] ss:$16 sps:$4 sm:$0xff]  }
  0x1d   : > { %v5396_v16 = vld [vmem:[%s6317_s25 + $0x68] ss:$16 sps:$4 sm:$0xff]   ;;  %v5397_v17 = vld [vmem:[%s6317_s25 + $0x84] ss:$16 sps:$4 sm:$0xff]   ;;  %v5399_v18 = vld [vmem:[%s6317_s25 + $0x8c] ss:$16 sps:$4 sm:$0xff]  }
  0x1e   : > { %3811 = vmatpush1.bf16.msra.mxu0 %v5383_v7  ;;  %4180 = vmatpush1.bf16.msra.mxu1 %v5384_v8  ;;  %v5401_v19 = vld [vmem:[%s6317_s25 + $0x80] ss:$16 sps:$4 sm:$0xff]   ;;  %v5402_v20 = vld [vmem:[%s6317_s25 + $0x88] ss:$16 sps:$4 sm:$0xff]   ;;  %v5403_v21 = vld [vmem:[%s6317_s25 + $0xa4] ss:$16 sps:$4 sm:$0xff]  }
  0x1f   : > { %3812 = vmatprep.subr.bf16.mxu0 %v5385_v9  ;;  %4181 = vmatprep.subr.bf16.mxu1 %v5387_v10  ;;  %v5405_v22 = vld [vmem:[%s6317_s25 + $0xac] ss:$16 sps:$4 sm:$0xff]   ;;  %v5407_v23 = vld [vmem:[%s6317_s25 + $0xa0] ss:$16 sps:$4 sm:$0xff]   ;;  %v5408_v24 = vld [vmem:[%s6317_s25 + $0xa8] ss:$16 sps:$4 sm:$0xff]  }
  0x20   : > { %v5409_v25 = vld [vmem:[%s6317_s25 + $0xc4] ss:$16 sps:$4 sm:$0xff]   ;;  %v5411_v26 = vld [vmem:[%s6317_s25 + $0xcc] ss:$16 sps:$4 sm:$0xff]   ;;  %v5413_v27 = vld [vmem:[%s6317_s25 + $0xc0] ss:$16 sps:$4 sm:$0xff]  }
  0x21   : > { %v5414_v28 = vld [vmem:[%s6317_s25 + $0xc8] ss:$16 sps:$4 sm:$0xff]   ;;  %v5415_v29 = vld [vmem:[%s6317_s25 + $0xe4] ss:$16 sps:$4 sm:$0xff]   ;;  %v5417_v30 = vld [vmem:[%s6317_s25 + $0xec] ss:$16 sps:$4 sm:$0xff]  }
  0x22   : > { %3813 = vmatpush1.bf16.msra.mxu0 %v5389_v11  ;;  %4182 = vmatpush1.bf16.msra.mxu1 %v5390_v12  ;;  %v5419_v31 = vld [vmem:[%s6317_s25 + $0xe0] ss:$16 sps:$4 sm:$0xff]   ;;  %v5420_v32 = vld [vmem:[%s6317_s25 + $0xe8] ss:$16 sps:$4 sm:$0xff]   ;;  %v5421_v33 = vld [vmem:[%s6317_s25 + $0x104] ss:$16 sps:$4 sm:$0xff]  }
  0x23   : > { %3814 = vmatprep.subr.bf16.mxu0 %v5391_v13  ;;  %4183 = vmatprep.subr.bf16.mxu1 %v5393_v14  ;;  %v5423_v34 = vld [vmem:[%s6317_s25 + $0x10c] ss:$16 sps:$4 sm:$0xff]   ;;  %v5425_v35 = vld [vmem:[%s6317_s25 + $0x100] ss:$16 sps:$4 sm:$0xff]   ;;  %v5426_v36 = vld [vmem:[%s6317_s25 + $0x108] ss:$16 sps:$4 sm:$0xff]  }
  0x24   : > { %v6266_v37 = vmov 1983009808   ;;  %v5427_v40 = vld [vmem:[%s6317_s25 + $0x124] ss:$16 sps:$4 sm:$0xff]   ;;  %v5429_v41 = vld [vmem:[%s6317_s25 + $0x12c] ss:$16 sps:$4 sm:$0xff]  }
  0x25   : > { %v241_v38 = vunpack.c.l.s4 %v6266_v37  ;;  %v5431_v42 = vld [vmem:[%s6317_s25 + $0x120] ss:$16 sps:$4 sm:$0xff]   ;;  %v6359_v44 = vshrl.u32 %v243_v39, 7  ;;  %v5432_v45 = vld [vmem:[%s6317_s25 + $0x128] ss:$16 sps:$4 sm:$0xff]   ;;  %p5278_p7 = scmp.ne.s32.totalorder %s6255_s12, 3 }
  0x26   : > { %3815 = vmatpush1.bf16.msra.mxu0 %v5395_v15  ;;  %4184 = vmatpush1.bf16.msra.mxu1 %v5396_v16  ;;  %v5433_v46 = vld [vmem:[%s6317_s25 + $0x144] ss:$16 sps:$4 sm:$0xff]   ;;  %v5435_v47 = vld [vmem:[%s6317_s25 + $0x14c] ss:$16 sps:$4 sm:$0xff]   ;;  %v5437_v48 = vld [vmem:[%s6317_s25 + $0x140] ss:$16 sps:$4 sm:$0xff]  }
  0x27   : > { %3816 = vmatprep.subr.bf16.mxu0 %v5397_v17  ;;  %4185 = vmatprep.subr.bf16.mxu1 %v5399_v18  ;;  %v242_v43 = vunpack.c.0.s8 %v241_v38  ;;  %v5438_v49 = vld [vmem:[%s6317_s25 + $0x148] ss:$16 sps:$4 sm:$0xff]   ;;  %v5439_v51 = vld [vmem:[%s6317_s25 + $0x164] ss:$16 sps:$4 sm:$0xff]   ;;  %v5441_v52 = vld [vmem:[%s6317_s25 + $0x16c] ss:$16 sps:$4 sm:$0xff]  }
  0x28   : > { %v229_v53 = vld [vmem:[%s6312_s21] sm:$0xff]  ;;  %v5444_v56 = vld [vmem:[%s6317_s25 + $0x168] ss:$16 sps:$4 sm:$0xff]   ;;  %v5447_v58 = vld [vmem:[%s6317_s25 + $0x18c] ss:$16 sps:$4 sm:$0xff]  }
  0x29   : > { %v6367_v50 = vsub.s32 %v242_v43, %v6359_v44  ;;  %v5443_v54 = vld [vmem:[%s6317_s25 + $0x160] ss:$16 sps:$4 sm:$0xff]   ;;  %v5445_v57 = vld [vmem:[%s6317_s25 + $0x184] ss:$16 sps:$4 sm:$0xff]   ;;  %v5450_v62 = vld [vmem:[%s6317_s25 + $0x188] ss:$16 sps:$4 sm:$0xff]   ;;  %v239_v5 = vcombine.high %v229_v53, %v229_v53 }
  0x2a   : > { %3817 = vmatpush1.bf16.msra.mxu0 %v5401_v19  ;;  %4186 = vmatpush1.bf16.msra.mxu1 %v5402_v20  ;;  %v5449_v60 = vld [vmem:[%s6317_s25 + $0x180] ss:$16 sps:$4 sm:$0xff]   ;;  %v5451_v63 = vld [vmem:[%s6317_s25 + $0x1a4] ss:$16 sps:$4 sm:$0xff]   ;;  %v5453_v0 = vld [vmem:[%s6317_s25 + $0x1ac] ss:$16 sps:$4 sm:$0xff]  }
  0x2b   : > { %3818 = vmatprep.subr.bf16.mxu0 %v5403_v21  ;;  %4187 = vmatprep.subr.bf16.mxu1 %v5405_v22  ;;  %v246_v55 = vrot.slane %v229_v53, %v6367_v50  ;;  %v5455_v1 = vld [vmem:[%s6317_s25 + $0x1a0] ss:$16 sps:$4 sm:$0xff]   ;;  %v5456_v2 = vld [vmem:[%s6317_s25 + $0x1a8] ss:$16 sps:$4 sm:$0xff]   ;;  %v5457_v3 = vld [vmem:[%s6317_s25 + $0x1c4] ss:$16 sps:$4 sm:$0xff]   ;;  %v6390_v10 = vrot.slane %v239_v5, %v6367_v50 }
  0x2c   : > { %v5459_v4 = vld [vmem:[%s6317_s25 + $0x1cc] ss:$16 sps:$4 sm:$0xff]   ;;  %v5461_v6 = vld [vmem:[%s6317_s25 + $0x1c0] ss:$16 sps:$4 sm:$0xff]   ;;  %v5462_v7 = vld [vmem:[%s6317_s25 + $0x1c8] ss:$16 sps:$4 sm:$0xff]  }
  0x2d   : > { %v254_v59 = vcombine.high %v246_v55, %v246_v55  ;;  %v5463_v8 = vld [vmem:[%s6317_s25 + $0x1e4] ss:$16 sps:$4 sm:$0xff]   ;;  %v5465_v9 = vld [vmem:[%s6317_s25 + $0x1ec] ss:$16 sps:$4 sm:$0xff]   ;;  %v5467_v11 = vld [vmem:[%s6317_s25 + $0x1e0] ss:$16 sps:$4 sm:$0xff]   ;;  %v255_v15 = vcombine.high %v6390_v10, %v6390_v10  ;;  %v333_v17 = vpack.c.bf16 %v246_v55, %v246_v55 }
  0x2e   : > { %3819 = vmatpush1.bf16.msra.mxu0 %v5407_v23  ;;  %4188 = vmatpush1.bf16.msra.mxu1 %v5408_v24  ;;  %v5468_v12 = vld [vmem:[%s6317_s25 + $0x1e8] ss:$16 sps:$4 sm:$0xff]   ;;  %v5472_v13 = vld [vmem:[%s6317_s25 + $0x204] ss:$16 sps:$4 sm:$0xff]   ;;  %v5475_v14 = vld [vmem:[%s6317_s25 + $0x20c] ss:$16 sps:$4 sm:$0xff]  }
  0x2f   : > { %3820 = vmatprep.subr.bf16.mxu0 %v5409_v25  ;;  %4189 = vmatprep.subr.bf16.mxu1 %v5411_v26  ;;  %v334_v61 = vpack.c.bf16 %v254_v59, %v254_v59  ;;  %v5470_v16 = vld [vmem:[%s6317_s25 + $0x200] ss:$16 sps:$4 sm:$0xff]   ;;  %v5473_v18 = vld [vmem:[%s6317_s25 + $0x208] ss:$16 sps:$4 sm:$0xff]   ;;  %v5478_v19 = vld [vmem:[%s6317_s25 + $0x224] ss:$16 sps:$4 sm:$0xff]   ;;  %v336_v21 = vpack.c.bf16 %v255_v15, %v255_v15 }
  0x30   : > { %v5481_v20 = vld [vmem:[%s6317_s25 + $0x22c] ss:$16 sps:$4 sm:$0xff]   ;;  %v5476_v22 = vld [vmem:[%s6317_s25 + $0x220] ss:$16 sps:$4 sm:$0xff]   ;;  %v5479_v23 = vld [vmem:[%s6317_s25 + $0x228] ss:$16 sps:$4 sm:$0xff]  }
  0x31   : > { %3840 = vmatprep.mubr.bf16.mxu0 %v334_v61  ;;  %4209 = vmatprep.mubr.bf16.mxu1 %v334_v61  ;;  %v5484_v24 = vld [vmem:[%s6317_s25 + $0x244] ss:$16 sps:$4 sm:$0xff]   ;;  %v5487_v25 = vld [vmem:[%s6317_s25 + $0x24c] ss:$16 sps:$4 sm:$0xff]   ;;  %v5482_v26 = vld [vmem:[%s6317_s25 + $0x240] ss:$16 sps:$4 sm:$0xff]  }
  0x32   : > { %3821 = vmatpush1.bf16.msra.mxu0 %v5413_v27  ;;  %4190 = vmatpush1.bf16.msra.mxu1 %v5414_v28  ;;  %v5485_v27 = vld [vmem:[%s6317_s25 + $0x248] ss:$16 sps:$4 sm:$0xff]   ;;  %v5490_v28 = vld [vmem:[%s6317_s25 + $0x264] ss:$16 sps:$4 sm:$0xff]   ;;  %v5505_v37 = vld [vmem:[%s6317_s25 + $0x2ac] ss:$16 sps:$4 sm:$0xff]  }
  0x33   : > { %3822 = vmatprep.subr.bf16.mxu0 %v5415_v29  ;;  %4191 = vmatprep.subr.bf16.mxu1 %v5417_v30  ;;  %v5493_v29 = vld [vmem:[%s6317_s25 + $0x26c] ss:$16 sps:$4 sm:$0xff]   ;;  %v5488_v30 = vld [vmem:[%s6317_s25 + $0x260] ss:$16 sps:$4 sm:$0xff]   ;;  %v5503_v39 = vld [vmem:[%s6317_s25 + $0x2a8] ss:$16 sps:$4 sm:$0xff]  }
  0x34   : > { %v5500_v38 = vld [vmem:[%s6317_s25 + $0x2a0] ss:$16 sps:$4 sm:$0xff]   ;;  %v5509_v43 = vld [vmem:[%s6317_s25 + $0x2c8] ss:$16 sps:$4 sm:$0xff]   ;;  %v5529_v55 = vld [vmem:[%s6317_s25 + $0x32c] ss:$16 sps:$4 sm:$0xff]  }
  0x35   : > { %v5521_v53 = vld [vmem:[%s6317_s25 + $0x308] ss:$16 sps:$4 sm:$0xff]   ;;  %v5535_v59 = vld [vmem:[%s6317_s25 + $0x34c] ss:$16 sps:$4 sm:$0xff]   ;;  %v5562_v15 = vld [vmem:[%s6317_s25 + $0x3e4] ss:$16 sps:$4 sm:$0xff]  }
  0x36   : > { %3823 = vmatpush1.bf16.msra.mxu0 %v5419_v31  ;;  %4192 = vmatpush1.bf16.msra.mxu1 %v5420_v32  ;;  %v5491_v31 = vld [vmem:[%s6317_s25 + $0x268] ss:$16 sps:$4 sm:$0xff]   ;;  %v5496_v32 = vld [vmem:[%s6317_s25 + $0x284] ss:$16 sps:$4 sm:$0xff]  }
  0x37   : > { %3824 = vmatprep.subr.bf16.mxu0 %v5421_v33  ;;  %4193 = vmatprep.subr.bf16.mxu1 %v5423_v34  ;;  %v5499_v33 = vld [vmem:[%s6317_s25 + $0x28c] ss:$16 sps:$4 sm:$0xff]   ;;  %v5494_v34 = vld [vmem:[%s6317_s25 + $0x280] ss:$16 sps:$4 sm:$0xff]   ;;  %v5533_v61 = vld [vmem:[%s6317_s25 + $0x348] ss:$16 sps:$4 sm:$0xff]  }
  0x38   : > { %v5545_v5 = vld [vmem:[%s6317_s25 + $0x388] ss:$16 sps:$4 sm:$0xff]  }
  0x3a   : > { %3825 = vmatpush1.bf16.msra.mxu0 %v5425_v35  ;;  %4194 = vmatpush1.bf16.msra.mxu1 %v5426_v36  ;;  %v5497_v35 = vld [vmem:[%s6317_s25 + $0x288] ss:$16 sps:$4 sm:$0xff]   ;;  %v5502_v36 = vld [vmem:[%s6317_s25 + $0x2a4] ss:$16 sps:$4 sm:$0xff]  }
  0x3b   : > { %3826 = vmatprep.subr.bf16.mxu0 %v5427_v40  ;;  %4195 = vmatprep.subr.bf16.mxu1 %v5429_v41  ;;  %v5508_v40 = vld [vmem:[%s6317_s25 + $0x2c4] ss:$16 sps:$4 sm:$0xff]   ;;  %v5511_v41 = vld [vmem:[%s6317_s25 + $0x2cc] ss:$16 sps:$4 sm:$0xff]  }
  0x3e   : > { %3827 = vmatpush1.bf16.msra.mxu0 %v5431_v42  ;;  %4196 = vmatpush1.bf16.msra.mxu1 %v5432_v45  ;;  %v5506_v42 = vld [vmem:[%s6317_s25 + $0x2c0] ss:$16 sps:$4 sm:$0xff]   ;;  %v5514_v45 = vld [vmem:[%s6317_s25 + $0x2e4] ss:$16 sps:$4 sm:$0xff]  }
  0x3f   : > { %3828 = vmatprep.subr.bf16.mxu0 %v5433_v46  ;;  %4197 = vmatprep.subr.bf16.mxu1 %v5435_v47  ;;  %v5517_v46 = vld [vmem:[%s6317_s25 + $0x2ec] ss:$16 sps:$4 sm:$0xff]   ;;  %v5512_v47 = vld [vmem:[%s6317_s25 + $0x2e0] ss:$16 sps:$4 sm:$0xff]  }
  0x42   : > { %3829 = vmatpush1.bf16.msra.mxu0 %v5437_v48  ;;  %4198 = vmatpush1.bf16.msra.mxu1 %v5438_v49  ;;  %v5515_v48 = vld [vmem:[%s6317_s25 + $0x2e8] ss:$16 sps:$4 sm:$0xff]   ;;  %v5520_v49 = vld [vmem:[%s6317_s25 + $0x304] ss:$16 sps:$4 sm:$0xff]  }
  0x43   : > { %3830 = vmatprep.subr.bf16.mxu0 %v5439_v51  ;;  %4199 = vmatprep.subr.bf16.mxu1 %v5441_v52  ;;  %v5523_v51 = vld [vmem:[%s6317_s25 + $0x30c] ss:$16 sps:$4 sm:$0xff]   ;;  %v5518_v52 = vld [vmem:[%s6317_s25 + $0x300] ss:$16 sps:$4 sm:$0xff]  }
  0x46   : > { %3831 = vmatpush1.bf16.msra.mxu0 %v5443_v54  ;;  %4200 = vmatpush1.bf16.msra.mxu1 %v5444_v56  ;;  %v5526_v54 = vld [vmem:[%s6317_s25 + $0x324] ss:$16 sps:$4 sm:$0xff]   ;;  %v5524_v56 = vld [vmem:[%s6317_s25 + $0x320] ss:$16 sps:$4 sm:$0xff]  }
  0x47   : > { %3832 = vmatprep.subr.bf16.mxu0 %v5445_v57  ;;  %4201 = vmatprep.subr.bf16.mxu1 %v5447_v58  ;;  %v5527_v57 = vld [vmem:[%s6317_s25 + $0x328] ss:$16 sps:$4 sm:$0xff]   ;;  %v5532_v58 = vld [vmem:[%s6317_s25 + $0x344] ss:$16 sps:$4 sm:$0xff]  }
  0x4a   : > { %3833 = vmatpush1.bf16.msra.mxu0 %v5449_v60  ;;  %4202 = vmatpush1.bf16.msra.mxu1 %v5450_v62  ;;  %v5530_v60 = vld [vmem:[%s6317_s25 + $0x340] ss:$16 sps:$4 sm:$0xff]   ;;  %v5538_v62 = vld [vmem:[%s6317_s25 + $0x364] ss:$16 sps:$4 sm:$0xff]  }
  0x4b   : > { %3834 = vmatprep.subr.bf16.mxu0 %v5451_v63  ;;  %4203 = vmatprep.subr.bf16.mxu1 %v5453_v0  ;;  %v5541_v63 = vld [vmem:[%s6317_s25 + $0x36c] ss:$16 sps:$4 sm:$0xff]   ;;  %v5536_v0 = vld [vmem:[%s6317_s25 + $0x360] ss:$16 sps:$4 sm:$0xff]  }
  0x4e   : > { %3835 = vmatpush1.bf16.msra.mxu0 %v5455_v1  ;;  %4204 = vmatpush1.bf16.msra.mxu1 %v5456_v2  ;;  %v5539_v1 = vld [vmem:[%s6317_s25 + $0x368] ss:$16 sps:$4 sm:$0xff]   ;;  %v5544_v2 = vld [vmem:[%s6317_s25 + $0x384] ss:$16 sps:$4 sm:$0xff]  }
  0x4f   : > { %3836 = vmatprep.subr.bf16.mxu0 %v5457_v3  ;;  %4205 = vmatprep.subr.bf16.mxu1 %v5459_v4  ;;  %v5547_v3 = vld [vmem:[%s6317_s25 + $0x38c] ss:$16 sps:$4 sm:$0xff]   ;;  %v5542_v4 = vld [vmem:[%s6317_s25 + $0x380] ss:$16 sps:$4 sm:$0xff]  }
  0x52   : > { %3837 = vmatpush1.bf16.msra.mxu0 %v5461_v6  ;;  %4206 = vmatpush1.bf16.msra.mxu1 %v5462_v7  ;;  %v5550_v6 = vld [vmem:[%s6317_s25 + $0x3a4] ss:$16 sps:$4 sm:$0xff]   ;;  %v5553_v7 = vld [vmem:[%s6317_s25 + $0x3ac] ss:$16 sps:$4 sm:$0xff]  }
  0x53   : > { %3838 = vmatprep.subr.bf16.mxu0 %v5463_v8  ;;  %4207 = vmatprep.subr.bf16.mxu1 %v5465_v9  ;;  %v5548_v8 = vld [vmem:[%s6317_s25 + $0x3a0] ss:$16 sps:$4 sm:$0xff]   ;;  %v5551_v9 = vld [vmem:[%s6317_s25 + $0x3a8] ss:$16 sps:$4 sm:$0xff]  }
  0x56   : > { %3839 = vmatpush1.bf16.msra.mxu0 %v5467_v11  ;;  %4208 = vmatpush1.bf16.msra.mxu1 %v5468_v12  ;;  %v5556_v11 = vld [vmem:[%s6317_s25 + $0x3c4] ss:$16 sps:$4 sm:$0xff]   ;;  %v5559_v12 = vld [vmem:[%s6317_s25 + $0x3cc] ss:$16 sps:$4 sm:$0xff]  }
  0x57   : > { %3849 = vmatprep.subr.bf16.mxu0 %v5472_v13  ;;  %4218 = vmatprep.subr.bf16.mxu1 %v5475_v14  ;;  %v5554_v13 = vld [vmem:[%s6317_s25 + $0x3c0] ss:$16 sps:$4 sm:$0xff]   ;;  %v5557_v14 = vld [vmem:[%s6317_s25 + $0x3c8] ss:$16 sps:$4 sm:$0xff]  }
  0x59   : > { %3841 = vmatmul.mubr.bf16.vlgmr.msra.gmra.mrb[0].mxu0 %v333_v17  ;;  %4210 = vmatmul.mubr.bf16.vlgmr.msra.gmra.mrb[0].mxu1 %v333_v17  ;;  %v5560_v17 = vld [vmem:[%s6317_s25 + $0x3e0] ss:$16 sps:$4 sm:$0xff]  }
  0x5a   : > { %3850 = vmatpush1.bf16.msra.mxu0 %v5470_v16  ;;  %4219 = vmatpush1.bf16.msra.mxu1 %v5473_v18  ;;  %v5565_v16 = vld [vmem:[%s6317_s25 + $0x3ec] ss:$16 sps:$4 sm:$0xff]   ;;  %v5563_v18 = vld [vmem:[%s6317_s25 + $0x3e8] ss:$16 sps:$4 sm:$0xff]  }
  0x5b   : > { %3851 = vmatprep.subr.bf16.mxu0 %v5478_v19  ;;  %4220 = vmatprep.subr.bf16.mxu1 %v5481_v20  ;;  %v5568_v19 = vld [vmem:[%s6317_s25 + $0x404] ss:$16 sps:$4 sm:$0xff]   ;;  %v5571_v20 = vld [vmem:[%s6317_s25 + $0x40c] ss:$16 sps:$4 sm:$0xff]  }
  0x5c   : > { %3881 = vmatprep.mubr.bf16.mxu0 %v336_v21  ;;  %4250 = vmatprep.mubr.bf16.mxu1 %v336_v21  ;;  %v5566_v21 = vld [vmem:[%s6317_s25 + $0x400] ss:$16 sps:$4 sm:$0xff]  }
  0x5e   : > { %3852 = vmatpush1.bf16.msra.mxu0 %v5476_v22  ;;  %4221 = vmatpush1.bf16.msra.mxu1 %v5479_v23  ;;  %v335_v22 = vpack.c.bf16 %v6390_v10, %v6390_v10  ;;  %v5569_v23 = vld [vmem:[%s6317_s25 + $0x408] ss:$16 sps:$4 sm:$0xff]  }
  0x5f   : > { %3853 = vmatprep.subr.bf16.mxu0 %v5484_v24  ;;  %4222 = vmatprep.subr.bf16.mxu1 %v5487_v25  ;;  %v6467_v24 = vld [vmem:[%s6312_s21 + $0x8] sm:$0xff]  ;;  %v5574_v25 = vld [vmem:[%s6317_s25 + $0x424] ss:$16 sps:$4 sm:$0xff]  }
  0x62   : > { %3854 = vmatpush1.bf16.msra.mxu0 %v5482_v26  ;;  %4223 = vmatpush1.bf16.msra.mxu1 %v5485_v27  ;;  %v5577_v26 = vld [vmem:[%s6317_s25 + $0x42c] ss:$16 sps:$4 sm:$0xff]   ;;  %v6473_v27 = vrot.slane %v6467_v24, %v6367_v50 }
  0x63   : > { %3855 = vmatprep.subr.bf16.mxu0 %v5490_v28  ;;  %4224 = vmatprep.subr.bf16.mxu1 %v5493_v29  ;;  %v5572_v28 = vld [vmem:[%s6317_s25 + $0x420] ss:$16 sps:$4 sm:$0xff]   ;;  %v5575_v29 = vld [vmem:[%s6317_s25 + $0x428] ss:$16 sps:$4 sm:$0xff]  }
  0x64   : > { %v271_v10 = vcombine.high %v6473_v27, %v6473_v27 }
  0x66   : > { %3856 = vmatpush1.bf16.msra.mxu0 %v5488_v30  ;;  %4225 = vmatpush1.bf16.msra.mxu1 %v5491_v31  ;;  %v5580_v30 = vld [vmem:[%s6317_s25 + $0x444] ss:$16 sps:$4 sm:$0xff]   ;;  %v5583_v31 = vld [vmem:[%s6317_s25 + $0x44c] ss:$16 sps:$4 sm:$0xff]  }
  0x67   : > { %3857 = vmatprep.subr.bf16.mxu0 %v5496_v32  ;;  %4226 = vmatprep.subr.bf16.mxu1 %v5499_v33  ;;  %v338_v32 = vpack.c.bf16 %v271_v10, %v271_v10  ;;  %v5578_v33 = vld [vmem:[%s6317_s25 + $0x440] ss:$16 sps:$4 sm:$0xff]   ;;  %v5659_v10 = vld [vmem:[%s6317_s25 + $0x5e8] ss:$16 sps:$4 sm:$0xff]  }
  0x6a   : > { %3858 = vmatpush1.bf16.msra.mxu0 %v5494_v34  ;;  %4227 = vmatpush1.bf16.msra.mxu1 %v5497_v35  ;;  %v5581_v34 = vld [vmem:[%s6317_s25 + $0x448] ss:$16 sps:$4 sm:$0xff]   ;;  %v5586_v35 = vld [vmem:[%s6317_s25 + $0x464] ss:$16 sps:$4 sm:$0xff]  }
  0x6b   : > { %3859 = vmatprep.subr.bf16.mxu0 %v5502_v36  ;;  %4228 = vmatprep.subr.bf16.mxu1 %v5505_v37  ;;  %v5589_v36 = vld [vmem:[%s6317_s25 + $0x46c] ss:$16 sps:$4 sm:$0xff]   ;;  %v5584_v37 = vld [vmem:[%s6317_s25 + $0x460] ss:$16 sps:$4 sm:$0xff]  }
  0x6e   : > { %3860 = vmatpush1.bf16.msra.mxu0 %v5500_v38  ;;  %4229 = vmatpush1.bf16.msra.mxu1 %v5503_v39  ;;  %v5587_v38 = vld [vmem:[%s6317_s25 + $0x468] ss:$16 sps:$4 sm:$0xff]   ;;  %v5592_v39 = vld [vmem:[%s6317_s25 + $0x484] ss:$16 sps:$4 sm:$0xff]  }
  0x6f   : > { %3861 = vmatprep.subr.bf16.mxu0 %v5508_v40  ;;  %4230 = vmatprep.subr.bf16.mxu1 %v5511_v41  ;;  %v5595_v40 = vld [vmem:[%s6317_s25 + $0x48c] ss:$16 sps:$4 sm:$0xff]   ;;  %v5590_v41 = vld [vmem:[%s6317_s25 + $0x480] ss:$16 sps:$4 sm:$0xff]  }
  0x72   : > { %3862 = vmatpush1.bf16.msra.mxu0 %v5506_v42  ;;  %4231 = vmatpush1.bf16.msra.mxu1 %v5509_v43  ;;  %v5593_v42 = vld [vmem:[%s6317_s25 + $0x488] ss:$16 sps:$4 sm:$0xff]   ;;  %v5598_v43 = vld [vmem:[%s6317_s25 + $0x4a4] ss:$16 sps:$4 sm:$0xff]  }
  0x73   : > { %3863 = vmatprep.subr.bf16.mxu0 %v5514_v45  ;;  %4232 = vmatprep.subr.bf16.mxu1 %v5517_v46  ;;  %v5601_v45 = vld [vmem:[%s6317_s25 + $0x4ac] ss:$16 sps:$4 sm:$0xff]   ;;  %v5596_v46 = vld [vmem:[%s6317_s25 + $0x4a0] ss:$16 sps:$4 sm:$0xff]  }
  0x76   : > { %3864 = vmatpush1.bf16.msra.mxu0 %v5512_v47  ;;  %4233 = vmatpush1.bf16.msra.mxu1 %v5515_v48  ;;  %v5599_v47 = vld [vmem:[%s6317_s25 + $0x4a8] ss:$16 sps:$4 sm:$0xff]   ;;  %v5604_v48 = vld [vmem:[%s6317_s25 + $0x4c4] ss:$16 sps:$4 sm:$0xff]  }
  0x77   : > { %3865 = vmatprep.subr.bf16.mxu0 %v5520_v49  ;;  %4234 = vmatprep.subr.bf16.mxu1 %v5523_v51  ;;  %v5607_v49 = vld [vmem:[%s6317_s25 + $0x4cc] ss:$16 sps:$4 sm:$0xff]   ;;  %v5602_v51 = vld [vmem:[%s6317_s25 + $0x4c0] ss:$16 sps:$4 sm:$0xff]  }
  0x7a   : > { %3866 = vmatpush1.bf16.msra.mxu0 %v5518_v52  ;;  %4235 = vmatpush1.bf16.msra.mxu1 %v5521_v53  ;;  %v5605_v52 = vld [vmem:[%s6317_s25 + $0x4c8] ss:$16 sps:$4 sm:$0xff]   ;;  %v5610_v53 = vld [vmem:[%s6317_s25 + $0x4e4] ss:$16 sps:$4 sm:$0xff]  }
  0x7b   : > { %3867 = vmatprep.subr.bf16.mxu0 %v5526_v54  ;;  %4236 = vmatprep.subr.bf16.mxu1 %v5529_v55  ;;  %v5613_v54 = vld [vmem:[%s6317_s25 + $0x4ec] ss:$16 sps:$4 sm:$0xff]   ;;  %v5608_v55 = vld [vmem:[%s6317_s25 + $0x4e0] ss:$16 sps:$4 sm:$0xff]  }
  0x7e   : > { %3868 = vmatpush1.bf16.msra.mxu0 %v5524_v56  ;;  %4237 = vmatpush1.bf16.msra.mxu1 %v5527_v57  ;;  %v5611_v56 = vld [vmem:[%s6317_s25 + $0x4e8] ss:$16 sps:$4 sm:$0xff]   ;;  %v5616_v57 = vld [vmem:[%s6317_s25 + $0x504] ss:$16 sps:$4 sm:$0xff]  }
  0x7f   : > { %3869 = vmatprep.subr.bf16.mxu0 %v5532_v58  ;;  %4238 = vmatprep.subr.bf16.mxu1 %v5535_v59  ;;  %v5619_v58 = vld [vmem:[%s6317_s25 + $0x50c] ss:$16 sps:$4 sm:$0xff]   ;;  %v5614_v59 = vld [vmem:[%s6317_s25 + $0x500] ss:$16 sps:$4 sm:$0xff]  }
  0x82   : > { %3870 = vmatpush1.bf16.msra.mxu0 %v5530_v60  ;;  %4239 = vmatpush1.bf16.msra.mxu1 %v5533_v61  ;;  %v5617_v60 = vld [vmem:[%s6317_s25 + $0x508] ss:$16 sps:$4 sm:$0xff]   ;;  %v5622_v61 = vld [vmem:[%s6317_s25 + $0x524] ss:$16 sps:$4 sm:$0xff]  }
  0x83   : > { %3871 = vmatprep.subr.bf16.mxu0 %v5538_v62  ;;  %4240 = vmatprep.subr.bf16.mxu1 %v5541_v63  ;;  %v5625_v62 = vld [vmem:[%s6317_s25 + $0x52c] ss:$16 sps:$4 sm:$0xff]   ;;  %v5620_v63 = vld [vmem:[%s6317_s25 + $0x520] ss:$16 sps:$4 sm:$0xff]  }
  0x86   : > { %3872 = vmatpush1.bf16.msra.mxu0 %v5536_v0  ;;  %4241 = vmatpush1.bf16.msra.mxu1 %v5539_v1  ;;  %v5623_v0 = vld [vmem:[%s6317_s25 + $0x528] ss:$16 sps:$4 sm:$0xff]   ;;  %v5628_v1 = vld [vmem:[%s6317_s25 + $0x544] ss:$16 sps:$4 sm:$0xff]  }
  0x87   : > { %3873 = vmatprep.subr.bf16.mxu0 %v5544_v2  ;;  %4242 = vmatprep.subr.bf16.mxu1 %v5547_v3  ;;  %v5631_v2 = vld [vmem:[%s6317_s25 + $0x54c] ss:$16 sps:$4 sm:$0xff]   ;;  %v5626_v3 = vld [vmem:[%s6317_s25 + $0x540] ss:$16 sps:$4 sm:$0xff]  }
  0x8a   : > { %3874 = vmatpush1.bf16.msra.mxu0 %v5542_v4  ;;  %4243 = vmatpush1.bf16.msra.mxu1 %v5545_v5  ;;  %v5629_v4 = vld [vmem:[%s6317_s25 + $0x548] ss:$16 sps:$4 sm:$0xff]   ;;  %v5634_v5 = vld [vmem:[%s6317_s25 + $0x564] ss:$16 sps:$4 sm:$0xff]  }
  0x8b   : > { %3875 = vmatprep.subr.bf16.mxu0 %v5550_v6  ;;  %4244 = vmatprep.subr.bf16.mxu1 %v5553_v7  ;;  %v5637_v6 = vld [vmem:[%s6317_s25 + $0x56c] ss:$16 sps:$4 sm:$0xff]   ;;  %v5632_v7 = vld [vmem:[%s6317_s25 + $0x560] ss:$16 sps:$4 sm:$0xff]  }
  0x8e   : > { %3876 = vmatpush1.bf16.msra.mxu0 %v5548_v8  ;;  %4245 = vmatpush1.bf16.msra.mxu1 %v5551_v9  ;;  %v5635_v8 = vld [vmem:[%s6317_s25 + $0x568] ss:$16 sps:$4 sm:$0xff]   ;;  %v5640_v9 = vld [vmem:[%s6317_s25 + $0x584] ss:$16 sps:$4 sm:$0xff]  }
  0x8f   : > { %3877 = vmatprep.subr.bf16.mxu0 %v5556_v11  ;;  %4246 = vmatprep.subr.bf16.mxu1 %v5559_v12  ;;  %v5643_v11 = vld [vmem:[%s6317_s25 + $0x58c] ss:$16 sps:$4 sm:$0xff]   ;;  %v5638_v12 = vld [vmem:[%s6317_s25 + $0x580] ss:$16 sps:$4 sm:$0xff]  }
  0x92   : > { %3878 = vmatpush1.bf16.msra.mxu0 %v5554_v13  ;;  %4247 = vmatpush1.bf16.msra.mxu1 %v5557_v14  ;;  %v5641_v13 = vld [vmem:[%s6317_s25 + $0x588] ss:$16 sps:$4 sm:$0xff]   ;;  %v5646_v14 = vld [vmem:[%s6317_s25 + $0x5a4] ss:$16 sps:$4 sm:$0xff]  }
  0x93   : > { %3879 = vmatprep.subr.bf16.mxu0 %v5562_v15  ;;  %4248 = vmatprep.subr.bf16.mxu1 %v5565_v16  ;;  %v5649_v15 = vld [vmem:[%s6317_s25 + $0x5ac] ss:$16 sps:$4 sm:$0xff]   ;;  %v5644_v16 = vld [vmem:[%s6317_s25 + $0x5a0] ss:$16 sps:$4 sm:$0xff]  }
  0x96   : > { %3880 = vmatpush1.bf16.msra.mxu0 %v5560_v17  ;;  %4249 = vmatpush1.bf16.msra.mxu1 %v5563_v18  ;;  %v5647_v17 = vld [vmem:[%s6317_s25 + $0x5a8] ss:$16 sps:$4 sm:$0xff]   ;;  %v5652_v18 = vld [vmem:[%s6317_s25 + $0x5c4] ss:$16 sps:$4 sm:$0xff]  }
  0x97   : > { %3890 = vmatprep.subr.bf16.mxu0 %v5568_v19  ;;  %4259 = vmatprep.subr.bf16.mxu1 %v5571_v20  ;;  %v5655_v19 = vld [vmem:[%s6317_s25 + $0x5cc] ss:$16 sps:$4 sm:$0xff]   ;;  %v256_v20 = vcombine.high %v6467_v24, %v6467_v24  ;;  %v5656_v24 = vld [vmem:[%s6317_s25 + $0x5e0] ss:$16 sps:$4 sm:$0xff]  }
  0x99   : > { %3882 = vmatmul.mubr.bf16.vlgmr.msra.gmra.mrb[0].mxu0 %v335_v22  ;;  %4251 = vmatmul.mubr.bf16.vlgmr.msra.gmra.mrb[0].mxu1 %v335_v22  ;;  %v5653_v22 = vld [vmem:[%s6317_s25 + $0x5c8] ss:$16 sps:$4 sm:$0xff]  }
  0x9a   : > { %3891 = vmatpush1.bf16.msra.mxu0 %v5566_v21  ;;  %4260 = vmatpush1.bf16.msra.mxu1 %v5569_v23  ;;  %v5650_v21 = vld [vmem:[%s6317_s25 + $0x5c0] ss:$16 sps:$4 sm:$0xff]   ;;  %v5658_v23 = vld [vmem:[%s6317_s25 + $0x5e4] ss:$16 sps:$4 sm:$0xff]  }
  0x9b   : > { %3892 = vmatprep.subr.bf16.mxu0 %v5574_v25  ;;  %4261 = vmatprep.subr.bf16.mxu1 %v5577_v26  ;;  %v5661_v25 = vld [vmem:[%s6317_s25 + $0x5ec] ss:$16 sps:$4 sm:$0xff]   ;;  %v6536_v26 = vrot.slane %v256_v20, %v6367_v50  ;;  %v5737_v20 = vld [vmem:[%s6317_s25 + $0x788] ss:$16 sps:$4 sm:$0xff]  }
  0x9c   : > { %3922 = vmatprep.mubr.bf16.mxu0 %v338_v32  ;;  %4291 = vmatprep.mubr.bf16.mxu1 %v338_v32  ;;  %v5662_v32 = vld [vmem:[%s6317_s25 + $0x600] ss:$16 sps:$4 sm:$0xff]  }
  0x9e   : > { %3893 = vmatpush1.bf16.msra.mxu0 %v5572_v28  ;;  %4262 = vmatpush1.bf16.msra.mxu1 %v5575_v29  ;;  %v5664_v28 = vld [vmem:[%s6317_s25 + $0x604] ss:$16 sps:$4 sm:$0xff]   ;;  %v5667_v29 = vld [vmem:[%s6317_s25 + $0x60c] ss:$16 sps:$4 sm:$0xff]  }
  0x9f   : > { %3894 = vmatprep.subr.bf16.mxu0 %v5580_v30  ;;  %4263 = vmatprep.subr.bf16.mxu1 %v5583_v31  ;;  %v272_v30 = vcombine.high %v6536_v26, %v6536_v26  ;;  %v337_v31 = vpack.c.bf16 %v6473_v27, %v6473_v27  ;;  %v5668_v27 = vld [vmem:[%s6317_s25 + $0x620] ss:$16 sps:$4 sm:$0xff]  }
  0xa2   : > { %3895 = vmatpush1.bf16.msra.mxu0 %v5578_v33  ;;  %4264 = vmatpush1.bf16.msra.mxu1 %v5581_v34  ;;  %v5665_v33 = vld [vmem:[%s6317_s25 + $0x608] ss:$16 sps:$4 sm:$0xff]   ;;  %v5670_v34 = vld [vmem:[%s6317_s25 + $0x624] ss:$16 sps:$4 sm:$0xff]  }
  0xa3   : > { %3896 = vmatprep.subr.bf16.mxu0 %v5586_v35  ;;  %4265 = vmatprep.subr.bf16.mxu1 %v5589_v36  ;;  %v5673_v35 = vld [vmem:[%s6317_s25 + $0x62c] ss:$16 sps:$4 sm:$0xff]   ;;  %v340_v36 = vpack.c.bf16 %v272_v30, %v272_v30  ;;  %v5749_v30 = vld [vmem:[%s6317_s25 + $0x7c8] ss:$16 sps:$4 sm:$0xff]  }
  0xa6   : > { %3897 = vmatpush1.bf16.msra.mxu0 %v5584_v37  ;;  %4266 = vmatpush1.bf16.msra.mxu1 %v5587_v38  ;;  %v5671_v37 = vld [vmem:[%s6317_s25 + $0x628] ss:$16 sps:$4 sm:$0xff]   ;;  %v5676_v38 = vld [vmem:[%s6317_s25 + $0x644] ss:$16 sps:$4 sm:$0xff]  }
  0xa7   : > { %3898 = vmatprep.subr.bf16.mxu0 %v5592_v39  ;;  %4267 = vmatprep.subr.bf16.mxu1 %v5595_v40  ;;  %v5679_v39 = vld [vmem:[%s6317_s25 + $0x64c] ss:$16 sps:$4 sm:$0xff]   ;;  %v5674_v40 = vld [vmem:[%s6317_s25 + $0x640] ss:$16 sps:$4 sm:$0xff]  }
  0xaa   : > { %3899 = vmatpush1.bf16.msra.mxu0 %v5590_v41  ;;  %4268 = vmatpush1.bf16.msra.mxu1 %v5593_v42  ;;  %v5677_v41 = vld [vmem:[%s6317_s25 + $0x648] ss:$16 sps:$4 sm:$0xff]   ;;  %v5682_v42 = vld [vmem:[%s6317_s25 + $0x664] ss:$16 sps:$4 sm:$0xff]  }
  0xab   : > { %3900 = vmatprep.subr.bf16.mxu0 %v5598_v43  ;;  %4269 = vmatprep.subr.bf16.mxu1 %v5601_v45  ;;  %v5685_v43 = vld [vmem:[%s6317_s25 + $0x66c] ss:$16 sps:$4 sm:$0xff]   ;;  %v5680_v45 = vld [vmem:[%s6317_s25 + $0x660] ss:$16 sps:$4 sm:$0xff]  }
  0xae   : > { %3901 = vmatpush1.bf16.msra.mxu0 %v5596_v46  ;;  %4270 = vmatpush1.bf16.msra.mxu1 %v5599_v47  ;;  %v5683_v46 = vld [vmem:[%s6317_s25 + $0x668] ss:$16 sps:$4 sm:$0xff]   ;;  %v5688_v47 = vld [vmem:[%s6317_s25 + $0x684] ss:$16 sps:$4 sm:$0xff]  }
  0xaf   : > { %3902 = vmatprep.subr.bf16.mxu0 %v5604_v48  ;;  %4271 = vmatprep.subr.bf16.mxu1 %v5607_v49  ;;  %v5691_v48 = vld [vmem:[%s6317_s25 + $0x68c] ss:$16 sps:$4 sm:$0xff]   ;;  %v5686_v49 = vld [vmem:[%s6317_s25 + $0x680] ss:$16 sps:$4 sm:$0xff]  }
  0xb2   : > { %3903 = vmatpush1.bf16.msra.mxu0 %v5602_v51  ;;  %4272 = vmatpush1.bf16.msra.mxu1 %v5605_v52  ;;  %v5689_v51 = vld [vmem:[%s6317_s25 + $0x688] ss:$16 sps:$4 sm:$0xff]   ;;  %v5694_v52 = vld [vmem:[%s6317_s25 + $0x6a4] ss:$16 sps:$4 sm:$0xff]  }
  0xb3   : > { %3904 = vmatprep.subr.bf16.mxu0 %v5610_v53  ;;  %4273 = vmatprep.subr.bf16.mxu1 %v5613_v54  ;;  %v5697_v53 = vld [vmem:[%s6317_s25 + $0x6ac] ss:$16 sps:$4 sm:$0xff]   ;;  %v5692_v54 = vld [vmem:[%s6317_s25 + $0x6a0] ss:$16 sps:$4 sm:$0xff]  }
  0xb6   : > { %3905 = vmatpush1.bf16.msra.mxu0 %v5608_v55  ;;  %4274 = vmatpush1.bf16.msra.mxu1 %v5611_v56  ;;  %v5695_v55 = vld [vmem:[%s6317_s25 + $0x6a8] ss:$16 sps:$4 sm:$0xff]   ;;  %v5700_v56 = vld [vmem:[%s6317_s25 + $0x6c4] ss:$16 sps:$4 sm:$0xff]  }
  0xb7   : > { %3906 = vmatprep.subr.bf16.mxu0 %v5616_v57  ;;  %4275 = vmatprep.subr.bf16.mxu1 %v5619_v58  ;;  %v5703_v57 = vld [vmem:[%s6317_s25 + $0x6cc] ss:$16 sps:$4 sm:$0xff]   ;;  %v5698_v58 = vld [vmem:[%s6317_s25 + $0x6c0] ss:$16 sps:$4 sm:$0xff]  }
  0xba   : > { %3907 = vmatpush1.bf16.msra.mxu0 %v5614_v59  ;;  %4276 = vmatpush1.bf16.msra.mxu1 %v5617_v60  ;;  %v5701_v59 = vld [vmem:[%s6317_s25 + $0x6c8] ss:$16 sps:$4 sm:$0xff]   ;;  %v5706_v60 = vld [vmem:[%s6317_s25 + $0x6e4] ss:$16 sps:$4 sm:$0xff]  }
  0xbb   : > { %3908 = vmatprep.subr.bf16.mxu0 %v5622_v61  ;;  %4277 = vmatprep.subr.bf16.mxu1 %v5625_v62  ;;  %v5709_v61 = vld [vmem:[%s6317_s25 + $0x6ec] ss:$16 sps:$4 sm:$0xff]   ;;  %v5704_v62 = vld [vmem:[%s6317_s25 + $0x6e0] ss:$16 sps:$4 sm:$0xff]  }
  0xbe   : > { %3909 = vmatpush1.bf16.msra.mxu0 %v5620_v63  ;;  %4278 = vmatpush1.bf16.msra.mxu1 %v5623_v0  ;;  %v5707_v63 = vld [vmem:[%s6317_s25 + $0x6e8] ss:$16 sps:$4 sm:$0xff]   ;;  %v5712_v0 = vld [vmem:[%s6317_s25 + $0x704] ss:$16 sps:$4 sm:$0xff]  }
  0xbf   : > { %3910 = vmatprep.subr.bf16.mxu0 %v5628_v1  ;;  %4279 = vmatprep.subr.bf16.mxu1 %v5631_v2  ;;  %v5715_v1 = vld [vmem:[%s6317_s25 + $0x70c] ss:$16 sps:$4 sm:$0xff]   ;;  %v5710_v2 = vld [vmem:[%s6317_s25 + $0x700] ss:$16 sps:$4 sm:$0xff]  }
  0xc2   : > { %3911 = vmatpush1.bf16.msra.mxu0 %v5626_v3  ;;  %4280 = vmatpush1.bf16.msra.mxu1 %v5629_v4  ;;  %v5713_v3 = vld [vmem:[%s6317_s25 + $0x708] ss:$16 sps:$4 sm:$0xff]   ;;  %v5718_v4 = vld [vmem:[%s6317_s25 + $0x724] ss:$16 sps:$4 sm:$0xff]  }
  0xc3   : > { %3912 = vmatprep.subr.bf16.mxu0 %v5634_v5  ;;  %4281 = vmatprep.subr.bf16.mxu1 %v5637_v6  ;;  %v5721_v5 = vld [vmem:[%s6317_s25 + $0x72c] ss:$16 sps:$4 sm:$0xff]   ;;  %v5716_v6 = vld [vmem:[%s6317_s25 + $0x720] ss:$16 sps:$4 sm:$0xff]  }
  0xc6   : > { %3913 = vmatpush1.bf16.msra.mxu0 %v5632_v7  ;;  %4282 = vmatpush1.bf16.msra.mxu1 %v5635_v8  ;;  %v5719_v7 = vld [vmem:[%s6317_s25 + $0x728] ss:$16 sps:$4 sm:$0xff]   ;;  %v5724_v8 = vld [vmem:[%s6317_s25 + $0x744] ss:$16 sps:$4 sm:$0xff]  }
  0xc7   : > { %3914 = vmatprep.subr.bf16.mxu0 %v5640_v9  ;;  %4283 = vmatprep.subr.bf16.mxu1 %v5643_v11  ;;  %v5727_v9 = vld [vmem:[%s6317_s25 + $0x74c] ss:$16 sps:$4 sm:$0xff]   ;;  %v5722_v11 = vld [vmem:[%s6317_s25 + $0x740] ss:$16 sps:$4 sm:$0xff]  }
  0xca   : > { %3915 = vmatpush1.bf16.msra.mxu0 %v5638_v12  ;;  %4284 = vmatpush1.bf16.msra.mxu1 %v5641_v13  ;;  %v5725_v12 = vld [vmem:[%s6317_s25 + $0x748] ss:$16 sps:$4 sm:$0xff]   ;;  %v5730_v13 = vld [vmem:[%s6317_s25 + $0x764] ss:$16 sps:$4 sm:$0xff]  }
  0xcb   : > { %3916 = vmatprep.subr.bf16.mxu0 %v5646_v14  ;;  %4285 = vmatprep.subr.bf16.mxu1 %v5649_v15  ;;  %v5733_v14 = vld [vmem:[%s6317_s25 + $0x76c] ss:$16 sps:$4 sm:$0xff]   ;;  %v5728_v15 = vld [vmem:[%s6317_s25 + $0x760] ss:$16 sps:$4 sm:$0xff]  }
  0xce   : > { %3917 = vmatpush1.bf16.msra.mxu0 %v5644_v16  ;;  %4286 = vmatpush1.bf16.msra.mxu1 %v5647_v17  ;;  %v5731_v16 = vld [vmem:[%s6317_s25 + $0x768] ss:$16 sps:$4 sm:$0xff]   ;;  %v5736_v17 = vld [vmem:[%s6317_s25 + $0x784] ss:$16 sps:$4 sm:$0xff]  }
  0xcf   : > { %3918 = vmatprep.subr.bf16.mxu0 %v5652_v18  ;;  %4287 = vmatprep.subr.bf16.mxu1 %v5655_v19  ;;  %v5739_v18 = vld [vmem:[%s6317_s25 + $0x78c] ss:$16 sps:$4 sm:$0xff]   ;;  %v5734_v19 = vld [vmem:[%s6317_s25 + $0x780] ss:$16 sps:$4 sm:$0xff]  }
  0xd2   : > { %3919 = vmatpush1.bf16.msra.mxu0 %v5650_v21  ;;  %4288 = vmatpush1.bf16.msra.mxu1 %v5653_v22  ;;  %v5742_v21 = vld [vmem:[%s6317_s25 + $0x7a4] ss:$16 sps:$4 sm:$0xff]   ;;  %v5745_v22 = vld [vmem:[%s6317_s25 + $0x7ac] ss:$16 sps:$4 sm:$0xff]  }
  0xd3   : > { %3920 = vmatprep.subr.bf16.mxu0 %v5658_v23  ;;  %4289 = vmatprep.subr.bf16.mxu1 %v5661_v25  ;;  %v5740_v23 = vld [vmem:[%s6317_s25 + $0x7a0] ss:$16 sps:$4 sm:$0xff]   ;;  %v5743_v25 = vld [vmem:[%s6317_s25 + $0x7a8] ss:$16 sps:$4 sm:$0xff]  }
  0xd6   : > { %3921 = vmatpush1.bf16.msra.mxu0 %v5656_v24  ;;  %4290 = vmatpush1.bf16.msra.mxu1 %v5659_v10  ;;  %v5748_v24 = vld [vmem:[%s6317_s25 + $0x7c4] ss:$16 sps:$4 sm:$0xff]   ;;  %v5751_v10 = vld [vmem:[%s6317_s25 + $0x7cc] ss:$16 sps:$4 sm:$0xff]  }
  0xd7   : > { %3931 = vmatprep.subr.bf16.mxu0 %v5664_v28  ;;  %4300 = vmatprep.subr.bf16.mxu1 %v5667_v29  ;;  %v5746_v28 = vld [vmem:[%s6317_s25 + $0x7c0] ss:$16 sps:$4 sm:$0xff]  }
  0xd8   : > { %v6604_v29 = vld [vmem:[%s6312_s21 + $0x10] sm:$0xff] }
  0xd9   : > { %3923 = vmatmul.mubr.bf16.vlgmr.msra.gmra.mrb[0].mxu0 %v337_v31  ;;  %4292 = vmatmul.mubr.bf16.vlgmr.msra.gmra.mrb[0].mxu1 %v337_v31  ;;  %v5754_v31 = vld [vmem:[%s6317_s25 + $0x7e4] ss:$16 sps:$4 sm:$0xff]  }
  0xda   : > { %3932 = vmatpush1.bf16.msra.mxu0 %v5662_v32  ;;  %4301 = vmatpush1.bf16.msra.mxu1 %v5665_v33  ;;  %v5757_v32 = vld [vmem:[%s6317_s25 + $0x7ec] ss:$16 sps:$4 sm:$0xff]   ;;  %v6611_v33 = vrot.slane %v6604_v29, %v6367_v50 }
  0xdb   : > { %3933 = vmatprep.subr.bf16.mxu0 %v5670_v34  ;;  %4302 = vmatprep.subr.bf16.mxu1 %v5673_v35  ;;  %v5752_v34 = vld [vmem:[%s6317_s25 + $0x7e0] ss:$16 sps:$4 sm:$0xff]   ;;  %v5755_v35 = vld [vmem:[%s6317_s25 + $0x7e8] ss:$16 sps:$4 sm:$0xff]  }
  0xdc   : > { %3963 = vmatprep.mubr.bf16.mxu0 %v340_v36  ;;  %4332 = vmatprep.mubr.bf16.mxu1 %v340_v36  ;;  %v5761_v36 = vld [vmem:[%s6317_s25 + $0x804] ss:$16 sps:$4 sm:$0xff]  }
  0xde   : > { %3934 = vmatpush1.bf16.msra.mxu0 %v5668_v27  ;;  %4303 = vmatpush1.bf16.msra.mxu1 %v5671_v37  ;;  %v5764_v27 = vld [vmem:[%s6317_s25 + $0x80c] ss:$16 sps:$4 sm:$0xff]   ;;  %v288_v37 = vcombine.high %v6611_v33, %v6611_v33 }
  0xdf   : > { %3935 = vmatprep.subr.bf16.mxu0 %v5676_v38  ;;  %4304 = vmatprep.subr.bf16.mxu1 %v5679_v39  ;;  %v5759_v38 = vld [vmem:[%s6317_s25 + $0x800] ss:$16 sps:$4 sm:$0xff]   ;;  %v339_v39 = vpack.c.bf16 %v6536_v26, %v6536_v26  ;;  %v5773_v26 = vld [vmem:[%s6317_s25 + $0x844] ss:$16 sps:$4 sm:$0xff]  }
  0xe2   : > { %3936 = vmatpush1.bf16.msra.mxu0 %v5674_v40  ;;  %4305 = vmatpush1.bf16.msra.mxu1 %v5677_v41  ;;  %v5762_v40 = vld [vmem:[%s6317_s25 + $0x808] ss:$16 sps:$4 sm:$0xff]   ;;  %v5767_v41 = vld [vmem:[%s6317_s25 + $0x824] ss:$16 sps:$4 sm:$0xff]  }
  0xe3   : > { %3937 = vmatprep.subr.bf16.mxu0 %v5682_v42  ;;  %4306 = vmatprep.subr.bf16.mxu1 %v5685_v43  ;;  %v5770_v42 = vld [vmem:[%s6317_s25 + $0x82c] ss:$16 sps:$4 sm:$0xff]   ;;  %v342_v43 = vpack.c.bf16 %v288_v37, %v288_v37  ;;  %v5843_v37 = vld [vmem:[%s6317_s25 + $0x9c0] ss:$16 sps:$4 sm:$0xff]  }
  0xe6   : > { %3938 = vmatpush1.bf16.msra.mxu0 %v5680_v45  ;;  %4307 = vmatpush1.bf16.msra.mxu1 %v5683_v46  ;;  %v5765_v45 = vld [vmem:[%s6317_s25 + $0x820] ss:$16 sps:$4 sm:$0xff]   ;;  %v5768_v46 = vld [vmem:[%s6317_s25 + $0x828] ss:$16 sps:$4 sm:$0xff]  }
  0xe7   : > { %3939 = vmatprep.subr.bf16.mxu0 %v5688_v47  ;;  %4308 = vmatprep.subr.bf16.mxu1 %v5691_v48  ;;  %v5776_v47 = vld [vmem:[%s6317_s25 + $0x84c] ss:$16 sps:$4 sm:$0xff]   ;;  %v5771_v48 = vld [vmem:[%s6317_s25 + $0x840] ss:$16 sps:$4 sm:$0xff]  }
  0xea   : > { %3940 = vmatpush1.bf16.msra.mxu0 %v5686_v49  ;;  %4309 = vmatpush1.bf16.msra.mxu1 %v5689_v51  ;;  %v5774_v49 = vld [vmem:[%s6317_s25 + $0x848] ss:$16 sps:$4 sm:$0xff]   ;;  %v5779_v51 = vld [vmem:[%s6317_s25 + $0x864] ss:$16 sps:$4 sm:$0xff]  }
  0xeb   : > { %3941 = vmatprep.subr.bf16.mxu0 %v5694_v52  ;;  %4310 = vmatprep.subr.bf16.mxu1 %v5697_v53  ;;  %v5782_v52 = vld [vmem:[%s6317_s25 + $0x86c] ss:$16 sps:$4 sm:$0xff]   ;;  %v5777_v53 = vld [vmem:[%s6317_s25 + $0x860] ss:$16 sps:$4 sm:$0xff]  }
  0xee   : > { %3942 = vmatpush1.bf16.msra.mxu0 %v5692_v54  ;;  %4311 = vmatpush1.bf16.msra.mxu1 %v5695_v55  ;;  %v5780_v54 = vld [vmem:[%s6317_s25 + $0x868] ss:$16 sps:$4 sm:$0xff]   ;;  %v5785_v55 = vld [vmem:[%s6317_s25 + $0x884] ss:$16 sps:$4 sm:$0xff]  }
  0xef   : > { %3943 = vmatprep.subr.bf16.mxu0 %v5700_v56  ;;  %4312 = vmatprep.subr.bf16.mxu1 %v5703_v57  ;;  %v5788_v56 = vld [vmem:[%s6317_s25 + $0x88c] ss:$16 sps:$4 sm:$0xff]   ;;  %v5783_v57 = vld [vmem:[%s6317_s25 + $0x880] ss:$16 sps:$4 sm:$0xff]  }
  0xf2   : > { %3944 = vmatpush1.bf16.msra.mxu0 %v5698_v58  ;;  %4313 = vmatpush1.bf16.msra.mxu1 %v5701_v59  ;;  %v5786_v58 = vld [vmem:[%s6317_s25 + $0x888] ss:$16 sps:$4 sm:$0xff]   ;;  %v5791_v59 = vld [vmem:[%s6317_s25 + $0x8a4] ss:$16 sps:$4 sm:$0xff]  }
  0xf3   : > { %3945 = vmatprep.subr.bf16.mxu0 %v5706_v60  ;;  %4314 = vmatprep.subr.bf16.mxu1 %v5709_v61  ;;  %v5794_v60 = vld [vmem:[%s6317_s25 + $0x8ac] ss:$16 sps:$4 sm:$0xff]   ;;  %v5789_v61 = vld [vmem:[%s6317_s25 + $0x8a0] ss:$16 sps:$4 sm:$0xff]  }
  0xf6   : > { %3946 = vmatpush1.bf16.msra.mxu0 %v5704_v62  ;;  %4315 = vmatpush1.bf16.msra.mxu1 %v5707_v63  ;;  %v5792_v62 = vld [vmem:[%s6317_s25 + $0x8a8] ss:$16 sps:$4 sm:$0xff]   ;;  %v5797_v63 = vld [vmem:[%s6317_s25 + $0x8c4] ss:$16 sps:$4 sm:$0xff]  }
  0xf7   : > { %3947 = vmatprep.subr.bf16.mxu0 %v5712_v0  ;;  %4316 = vmatprep.subr.bf16.mxu1 %v5715_v1  ;;  %v5800_v0 = vld [vmem:[%s6317_s25 + $0x8cc] ss:$16 sps:$4 sm:$0xff]   ;;  %v5795_v1 = vld [vmem:[%s6317_s25 + $0x8c0] ss:$16 sps:$4 sm:$0xff]  }
  0xfa   : > { %3948 = vmatpush1.bf16.msra.mxu0 %v5710_v2  ;;  %4317 = vmatpush1.bf16.msra.mxu1 %v5713_v3  ;;  %v5798_v2 = vld [vmem:[%s6317_s25 + $0x8c8] ss:$16 sps:$4 sm:$0xff]   ;;  %v5803_v3 = vld [vmem:[%s6317_s25 + $0x8e4] ss:$16 sps:$4 sm:$0xff]  }
  0xfb   : > { %3949 = vmatprep.subr.bf16.mxu0 %v5718_v4  ;;  %4318 = vmatprep.subr.bf16.mxu1 %v5721_v5  ;;  %v5806_v4 = vld [vmem:[%s6317_s25 + $0x8ec] ss:$16 sps:$4 sm:$0xff]   ;;  %v5801_v5 = vld [vmem:[%s6317_s25 + $0x8e0] ss:$16 sps:$4 sm:$0xff]  }
  0xfe   : > { %3950 = vmatpush1.bf16.msra.mxu0 %v5716_v6  ;;  %4319 = vmatpush1.bf16.msra.mxu1 %v5719_v7  ;;  %v5804_v6 = vld [vmem:[%s6317_s25 + $0x8e8] ss:$16 sps:$4 sm:$0xff]   ;;  %v5809_v7 = vld [vmem:[%s6317_s25 + $0x904] ss:$16 sps:$4 sm:$0xff]  }
  0xff   : > { %3951 = vmatprep.subr.bf16.mxu0 %v5724_v8  ;;  %4320 = vmatprep.subr.bf16.mxu1 %v5727_v9  ;;  %v5812_v8 = vld [vmem:[%s6317_s25 + $0x90c] ss:$16 sps:$4 sm:$0xff]   ;;  %v5807_v9 = vld [vmem:[%s6317_s25 + $0x900] ss:$16 sps:$4 sm:$0xff]  }
 0x102   : > { %3952 = vmatpush1.bf16.msra.mxu0 %v5722_v11  ;;  %4321 = vmatpush1.bf16.msra.mxu1 %v5725_v12  ;;  %v5810_v11 = vld [vmem:[%s6317_s25 + $0x908] ss:$16 sps:$4 sm:$0xff]   ;;  %v5815_v12 = vld [vmem:[%s6317_s25 + $0x924] ss:$16 sps:$4 sm:$0xff]  }
 0x103   : > { %3953 = vmatprep.subr.bf16.mxu0 %v5730_v13  ;;  %4322 = vmatprep.subr.bf16.mxu1 %v5733_v14  ;;  %v5818_v13 = vld [vmem:[%s6317_s25 + $0x92c] ss:$16 sps:$4 sm:$0xff]   ;;  %v5813_v14 = vld [vmem:[%s6317_s25 + $0x920] ss:$16 sps:$4 sm:$0xff]  }
 0x106   : > { %3954 = vmatpush1.bf16.msra.mxu0 %v5728_v15  ;;  %4323 = vmatpush1.bf16.msra.mxu1 %v5731_v16  ;;  %v5816_v15 = vld [vmem:[%s6317_s25 + $0x928] ss:$16 sps:$4 sm:$0xff]   ;;  %v5821_v16 = vld [vmem:[%s6317_s25 + $0x944] ss:$16 sps:$4 sm:$0xff]  }
 0x107   : > { %3955 = vmatprep.subr.bf16.mxu0 %v5736_v17  ;;  %4324 = vmatprep.subr.bf16.mxu1 %v5739_v18  ;;  %v5824_v17 = vld [vmem:[%s6317_s25 + $0x94c] ss:$16 sps:$4 sm:$0xff]   ;;  %v5819_v18 = vld [vmem:[%s6317_s25 + $0x940] ss:$16 sps:$4 sm:$0xff]  }
 0x10a   : > { %3956 = vmatpush1.bf16.msra.mxu0 %v5734_v19  ;;  %4325 = vmatpush1.bf16.msra.mxu1 %v5737_v20  ;;  %v5822_v19 = vld [vmem:[%s6317_s25 + $0x948] ss:$16 sps:$4 sm:$0xff]   ;;  %v5827_v20 = vld [vmem:[%s6317_s25 + $0x964] ss:$16 sps:$4 sm:$0xff]  }
 0x10b   : > { %3957 = vmatprep.subr.bf16.mxu0 %v5742_v21  ;;  %4326 = vmatprep.subr.bf16.mxu1 %v5745_v22  ;;  %v5830_v21 = vld [vmem:[%s6317_s25 + $0x96c] ss:$16 sps:$4 sm:$0xff]   ;;  %v5825_v22 = vld [vmem:[%s6317_s25 + $0x960] ss:$16 sps:$4 sm:$0xff]  }
 0x10e   : > { %3958 = vmatpush1.bf16.msra.mxu0 %v5740_v23  ;;  %4327 = vmatpush1.bf16.msra.mxu1 %v5743_v25  ;;  %v5828_v23 = vld [vmem:[%s6317_s25 + $0x968] ss:$16 sps:$4 sm:$0xff]   ;;  %v5833_v25 = vld [vmem:[%s6317_s25 + $0x984] ss:$16 sps:$4 sm:$0xff]  }
 0x10f   : > { %3959 = vmatprep.subr.bf16.mxu0 %v5748_v24  ;;  %4328 = vmatprep.subr.bf16.mxu1 %v5751_v10  ;;  %v5836_v24 = vld [vmem:[%s6317_s25 + $0x98c] ss:$16 sps:$4 sm:$0xff]   ;;  %v5831_v10 = vld [vmem:[%s6317_s25 + $0x980] ss:$16 sps:$4 sm:$0xff]  }
 0x112   : > { %3960 = vmatpush1.bf16.msra.mxu0 %v5746_v28  ;;  %4329 = vmatpush1.bf16.msra.mxu1 %v5749_v30  ;;  %v5834_v28 = vld [vmem:[%s6317_s25 + $0x988] ss:$16 sps:$4 sm:$0xff]   ;;  %v5839_v30 = vld [vmem:[%s6317_s25 + $0x9a4] ss:$16 sps:$4 sm:$0xff]  }
 0x113   : > { %3961 = vmatprep.subr.bf16.mxu0 %v5754_v31  ;;  %4330 = vmatprep.subr.bf16.mxu1 %v5757_v32  ;;  %v5842_v31 = vld [vmem:[%s6317_s25 + $0x9ac] ss:$16 sps:$4 sm:$0xff]   ;;  %v5837_v32 = vld [vmem:[%s6317_s25 + $0x9a0] ss:$16 sps:$4 sm:$0xff]  }
 0x116   : > { %3962 = vmatpush1.bf16.msra.mxu0 %v5752_v34  ;;  %4331 = vmatpush1.bf16.msra.mxu1 %v5755_v35  ;;  %v5840_v34 = vld [vmem:[%s6317_s25 + $0x9a8] ss:$16 sps:$4 sm:$0xff]   ;;  %v5845_v35 = vld [vmem:[%s6317_s25 + $0x9c4] ss:$16 sps:$4 sm:$0xff]  }
 0x117   : > { %3972 = vmatprep.subr.bf16.mxu0 %v5761_v36  ;;  %4341 = vmatprep.subr.bf16.mxu1 %v5764_v27  ;;  %v5848_v36 = vld [vmem:[%s6317_s25 + $0x9cc] ss:$16 sps:$4 sm:$0xff]   ;;  %v273_v27 = vcombine.high %v6604_v29, %v6604_v29  ;;  %v5849_v29 = vld [vmem:[%s6317_s25 + $0x9e0] ss:$16 sps:$4 sm:$0xff]  }
 0x119   : > { %3964 = vmatmul.mubr.bf16.vlgmr.msra.gmra.mrb[0].mxu0 %v339_v39  ;;  %4333 = vmatmul.mubr.bf16.vlgmr.msra.gmra.mrb[0].mxu1 %v339_v39  ;;  %v5851_v39 = vld [vmem:[%s6317_s25 + $0x9e4] ss:$16 sps:$4 sm:$0xff]  }
 0x11a   : > { %3973 = vmatpush1.bf16.msra.mxu0 %v5759_v38  ;;  %4342 = vmatpush1.bf16.msra.mxu1 %v5762_v40  ;;  %v5846_v38 = vld [vmem:[%s6317_s25 + $0x9c8] ss:$16 sps:$4 sm:$0xff]   ;;  %v5854_v40 = vld [vmem:[%s6317_s25 + $0x9ec] ss:$16 sps:$4 sm:$0xff]  }
 0x11b   : > { %3974 = vmatprep.subr.bf16.mxu0 %v5767_v41  ;;  %4343 = vmatprep.subr.bf16.mxu1 %v5770_v42  ;;  %v6684_v41 = vrot.slane %v273_v27, %v6367_v50  ;;  %v5852_v42 = vld [vmem:[%s6317_s25 + $0x9e8] ss:$16 sps:$4 sm:$0xff]  }
 0x11c   : > { %4004 = vmatprep.mubr.bf16.mxu0 %v342_v43  ;;  %4373 = vmatprep.mubr.bf16.mxu1 %v342_v43  ;;  %v5857_v43 = vld [vmem:[%s6317_s25 + $0xa04] ss:$16 sps:$4 sm:$0xff]   ;;  %v5930_v27 = vld [vmem:[%s6317_s25 + $0xb88] ss:$16 sps:$4 sm:$0xff]  }
 0x11e   : > { %3975 = vmatpush1.bf16.msra.mxu0 %v5765_v45  ;;  %4344 = vmatpush1.bf16.msra.mxu1 %v5768_v46  ;;  %v5860_v45 = vld [vmem:[%s6317_s25 + $0xa0c] ss:$16 sps:$4 sm:$0xff]   ;;  %v289_v46 = vcombine.high %v6684_v41, %v6684_v41 }
 0x11f   : > { %3976 = vmatprep.subr.bf16.mxu0 %v5773_v26  ;;  %4345 = vmatprep.subr.bf16.mxu1 %v5776_v47  ;;  %v341_v26 = vpack.c.bf16 %v6611_v33, %v6611_v33  ;;  %v5855_v47 = vld [vmem:[%s6317_s25 + $0xa00] ss:$16 sps:$4 sm:$0xff]  }
 0x120   : > { %v5861_v33 = vld [vmem:[%s6317_s25 + $0xa20] ss:$16 sps:$4 sm:$0xff]  }
 0x122   : > { %3977 = vmatpush1.bf16.msra.mxu0 %v5771_v48  ;;  %4346 = vmatpush1.bf16.msra.mxu1 %v5774_v49  ;;  %v5858_v48 = vld [vmem:[%s6317_s25 + $0xa08] ss:$16 sps:$4 sm:$0xff]   ;;  %v5863_v49 = vld [vmem:[%s6317_s25 + $0xa24] ss:$16 sps:$4 sm:$0xff]  }
 0x123   : > { %3978 = vmatprep.subr.bf16.mxu0 %v5779_v51  ;;  %4347 = vmatprep.subr.bf16.mxu1 %v5782_v52  ;;  %v5866_v51 = vld [vmem:[%s6317_s25 + $0xa2c] ss:$16 sps:$4 sm:$0xff]   ;;  %v344_v52 = vpack.c.bf16 %v289_v46, %v289_v46  ;;  %v5942_v46 = vld [vmem:[%s6317_s25 + $0xbc8] ss:$16 sps:$4 sm:$0xff]  }
 0x126   : > { %3979 = vmatpush1.bf16.msra.mxu0 %v5777_v53  ;;  %4348 = vmatpush1.bf16.msra.mxu1 %v5780_v54  ;;  %v5864_v53 = vld [vmem:[%s6317_s25 + $0xa28] ss:$16 sps:$4 sm:$0xff]   ;;  %v5869_v54 = vld [vmem:[%s6317_s25 + $0xa44] ss:$16 sps:$4 sm:$0xff]  }
 0x127   : > { %3980 = vmatprep.subr.bf16.mxu0 %v5785_v55  ;;  %4349 = vmatprep.subr.bf16.mxu1 %v5788_v56  ;;  %v5872_v55 = vld [vmem:[%s6317_s25 + $0xa4c] ss:$16 sps:$4 sm:$0xff]   ;;  %v5867_v56 = vld [vmem:[%s6317_s25 + $0xa40] ss:$16 sps:$4 sm:$0xff]  }
 0x12a   : > { %3981 = vmatpush1.bf16.msra.mxu0 %v5783_v57  ;;  %4350 = vmatpush1.bf16.msra.mxu1 %v5786_v58  ;;  %v5870_v57 = vld [vmem:[%s6317_s25 + $0xa48] ss:$16 sps:$4 sm:$0xff]   ;;  %v5875_v58 = vld [vmem:[%s6317_s25 + $0xa64] ss:$16 sps:$4 sm:$0xff]  }
 0x12b   : > { %3982 = vmatprep.subr.bf16.mxu0 %v5791_v59  ;;  %4351 = vmatprep.subr.bf16.mxu1 %v5794_v60  ;;  %v5878_v59 = vld [vmem:[%s6317_s25 + $0xa6c] ss:$16 sps:$4 sm:$0xff]   ;;  %v5873_v60 = vld [vmem:[%s6317_s25 + $0xa60] ss:$16 sps:$4 sm:$0xff]  }
 0x12e   : > { %3983 = vmatpush1.bf16.msra.mxu0 %v5789_v61  ;;  %4352 = vmatpush1.bf16.msra.mxu1 %v5792_v62  ;;  %v5876_v61 = vld [vmem:[%s6317_s25 + $0xa68] ss:$16 sps:$4 sm:$0xff]   ;;  %v5881_v62 = vld [vmem:[%s6317_s25 + $0xa84] ss:$16 sps:$4 sm:$0xff]  }
 0x12f   : > { %3984 = vmatprep.subr.bf16.mxu0 %v5797_v63  ;;  %4353 = vmatprep.subr.bf16.mxu1 %v5800_v0  ;;  %v5884_v63 = vld [vmem:[%s6317_s25 + $0xa8c] ss:$16 sps:$4 sm:$0xff]   ;;  %v5879_v0 = vld [vmem:[%s6317_s25 + $0xa80] ss:$16 sps:$4 sm:$0xff]  }
 0x132   : > { %3985 = vmatpush1.bf16.msra.mxu0 %v5795_v1  ;;  %4354 = vmatpush1.bf16.msra.mxu1 %v5798_v2  ;;  %v5882_v1 = vld [vmem:[%s6317_s25 + $0xa88] ss:$16 sps:$4 sm:$0xff]   ;;  %v5887_v2 = vld [vmem:[%s6317_s25 + $0xaa4] ss:$16 sps:$4 sm:$0xff]  }
 0x133   : > { %3986 = vmatprep.subr.bf16.mxu0 %v5803_v3  ;;  %4355 = vmatprep.subr.bf16.mxu1 %v5806_v4  ;;  %v5890_v3 = vld [vmem:[%s6317_s25 + $0xaac] ss:$16 sps:$4 sm:$0xff]   ;;  %v5885_v4 = vld [vmem:[%s6317_s25 + $0xaa0] ss:$16 sps:$4 sm:$0xff]  }
 0x136   : > { %3987 = vmatpush1.bf16.msra.mxu0 %v5801_v5  ;;  %4356 = vmatpush1.bf16.msra.mxu1 %v5804_v6  ;;  %v5888_v5 = vld [vmem:[%s6317_s25 + $0xaa8] ss:$16 sps:$4 sm:$0xff]   ;;  %v5893_v6 = vld [vmem:[%s6317_s25 + $0xac4] ss:$16 sps:$4 sm:$0xff]  }
 0x137   : > { %3988 = vmatprep.subr.bf16.mxu0 %v5809_v7  ;;  %4357 = vmatprep.subr.bf16.mxu1 %v5812_v8  ;;  %v5896_v7 = vld [vmem:[%s6317_s25 + $0xacc] ss:$16 sps:$4 sm:$0xff]   ;;  %v5891_v8 = vld [vmem:[%s6317_s25 + $0xac0] ss:$16 sps:$4 sm:$0xff]  }
 0x13a   : > { %3989 = vmatpush1.bf16.msra.mxu0 %v5807_v9  ;;  %4358 = vmatpush1.bf16.msra.mxu1 %v5810_v11  ;;  %v5894_v9 = vld [vmem:[%s6317_s25 + $0xac8] ss:$16 sps:$4 sm:$0xff]   ;;  %v5899_v11 = vld [vmem:[%s6317_s25 + $0xae4] ss:$16 sps:$4 sm:$0xff]  }
 0x13b   : > { %3990 = vmatprep.subr.bf16.mxu0 %v5815_v12  ;;  %4359 = vmatprep.subr.bf16.mxu1 %v5818_v13  ;;  %v5902_v12 = vld [vmem:[%s6317_s25 + $0xaec] ss:$16 sps:$4 sm:$0xff]   ;;  %v5897_v13 = vld [vmem:[%s6317_s25 + $0xae0] ss:$16 sps:$4 sm:$0xff]  }
 0x13e   : > { %3991 = vmatpush1.bf16.msra.mxu0 %v5813_v14  ;;  %4360 = vmatpush1.bf16.msra.mxu1 %v5816_v15  ;;  %v5900_v14 = vld [vmem:[%s6317_s25 + $0xae8] ss:$16 sps:$4 sm:$0xff]   ;;  %v5905_v15 = vld [vmem:[%s6317_s25 + $0xb04] ss:$16 sps:$4 sm:$0xff]  }
 0x13f   : > { %3992 = vmatprep.subr.bf16.mxu0 %v5821_v16  ;;  %4361 = vmatprep.subr.bf16.mxu1 %v5824_v17  ;;  %v5908_v16 = vld [vmem:[%s6317_s25 + $0xb0c] ss:$16 sps:$4 sm:$0xff]   ;;  %v5903_v17 = vld [vmem:[%s6317_s25 + $0xb00] ss:$16 sps:$4 sm:$0xff]  }
 0x142   : > { %3993 = vmatpush1.bf16.msra.mxu0 %v5819_v18  ;;  %4362 = vmatpush1.bf16.msra.mxu1 %v5822_v19  ;;  %v5906_v18 = vld [vmem:[%s6317_s25 + $0xb08] ss:$16 sps:$4 sm:$0xff]   ;;  %v5911_v19 = vld [vmem:[%s6317_s25 + $0xb24] ss:$16 sps:$4 sm:$0xff]  }
 0x143   : > { %3994 = vmatprep.subr.bf16.mxu0 %v5827_v20  ;;  %4363 = vmatprep.subr.bf16.mxu1 %v5830_v21  ;;  %v5914_v20 = vld [vmem:[%s6317_s25 + $0xb2c] ss:$16 sps:$4 sm:$0xff]   ;;  %v5909_v21 = vld [vmem:[%s6317_s25 + $0xb20] ss:$16 sps:$4 sm:$0xff]  }
 0x146   : > { %3995 = vmatpush1.bf16.msra.mxu0 %v5825_v22  ;;  %4364 = vmatpush1.bf16.msra.mxu1 %v5828_v23  ;;  %v5912_v22 = vld [vmem:[%s6317_s25 + $0xb28] ss:$16 sps:$4 sm:$0xff]   ;;  %v5917_v23 = vld [vmem:[%s6317_s25 + $0xb44] ss:$16 sps:$4 sm:$0xff]  }
 0x147   : > { %3996 = vmatprep.subr.bf16.mxu0 %v5833_v25  ;;  %4365 = vmatprep.subr.bf16.mxu1 %v5836_v24  ;;  %v5920_v25 = vld [vmem:[%s6317_s25 + $0xb4c] ss:$16 sps:$4 sm:$0xff]   ;;  %v5915_v24 = vld [vmem:[%s6317_s25 + $0xb40] ss:$16 sps:$4 sm:$0xff]  }
 0x14a   : > { %3997 = vmatpush1.bf16.msra.mxu0 %v5831_v10  ;;  %4366 = vmatpush1.bf16.msra.mxu1 %v5834_v28  ;;  %v5918_v10 = vld [vmem:[%s6317_s25 + $0xb48] ss:$16 sps:$4 sm:$0xff]   ;;  %v5923_v28 = vld [vmem:[%s6317_s25 + $0xb64] ss:$16 sps:$4 sm:$0xff]  }
 0x14b   : > { %3998 = vmatprep.subr.bf16.mxu0 %v5839_v30  ;;  %4367 = vmatprep.subr.bf16.mxu1 %v5842_v31  ;;  %v5926_v30 = vld [vmem:[%s6317_s25 + $0xb6c] ss:$16 sps:$4 sm:$0xff]   ;;  %v5921_v31 = vld [vmem:[%s6317_s25 + $0xb60] ss:$16 sps:$4 sm:$0xff]  }
 0x14e   : > { %3999 = vmatpush1.bf16.msra.mxu0 %v5837_v32  ;;  %4368 = vmatpush1.bf16.msra.mxu1 %v5840_v34  ;;  %v5924_v32 = vld [vmem:[%s6317_s25 + $0xb68] ss:$16 sps:$4 sm:$0xff]   ;;  %v5929_v34 = vld [vmem:[%s6317_s25 + $0xb84] ss:$16 sps:$4 sm:$0xff]  }
 0x14f   : > { %4000 = vmatprep.subr.bf16.mxu0 %v5845_v35  ;;  %4369 = vmatprep.subr.bf16.mxu1 %v5848_v36  ;;  %v5932_v35 = vld [vmem:[%s6317_s25 + $0xb8c] ss:$16 sps:$4 sm:$0xff]   ;;  %v5927_v36 = vld [vmem:[%s6317_s25 + $0xb80] ss:$16 sps:$4 sm:$0xff]  }
 0x152   : > { %4001 = vmatpush1.bf16.msra.mxu0 %v5843_v37  ;;  %4370 = vmatpush1.bf16.msra.mxu1 %v5846_v38  ;;  %v5935_v37 = vld [vmem:[%s6317_s25 + $0xba4] ss:$16 sps:$4 sm:$0xff]   ;;  %v5938_v38 = vld [vmem:[%s6317_s25 + $0xbac] ss:$16 sps:$4 sm:$0xff]  }
 0x153   : > { %4002 = vmatprep.subr.bf16.mxu0 %v5851_v39  ;;  %4371 = vmatprep.subr.bf16.mxu1 %v5854_v40  ;;  %v5933_v39 = vld [vmem:[%s6317_s25 + $0xba0] ss:$16 sps:$4 sm:$0xff]   ;;  %v5936_v40 = vld [vmem:[%s6317_s25 + $0xba8] ss:$16 sps:$4 sm:$0xff]  }
 0x156   : > { %4003 = vmatpush1.bf16.msra.mxu0 %v5849_v29  ;;  %4372 = vmatpush1.bf16.msra.mxu1 %v5852_v42  ;;  %v5941_v29 = vld [vmem:[%s6317_s25 + $0xbc4] ss:$16 sps:$4 sm:$0xff]   ;;  %v5944_v42 = vld [vmem:[%s6317_s25 + $0xbcc] ss:$16 sps:$4 sm:$0xff]  }
 0x157   : > { %4013 = vmatprep.subr.bf16.mxu0 %v5857_v43  ;;  %4382 = vmatprep.subr.bf16.mxu1 %v5860_v45  ;;  %v6751_v43 = vld [vmem:[%s6312_s21 + $0x18] sm:$0xff]  ;;  %v5939_v45 = vld [vmem:[%s6317_s25 + $0xbc0] ss:$16 sps:$4 sm:$0xff]  }
 0x159   : > { %4005 = vmatmul.mubr.bf16.vlgmr.msra.gmra.mrb[0].mxu0 %v341_v26  ;;  %4374 = vmatmul.mubr.bf16.vlgmr.msra.gmra.mrb[0].mxu1 %v341_v26  ;;  %v5947_v26 = vld [vmem:[%s6317_s25 + $0xbe4] ss:$16 sps:$4 sm:$0xff]  }
 0x15a   : > { %4014 = vmatpush1.bf16.msra.mxu0 %v5855_v47  ;;  %4383 = vmatpush1.bf16.msra.mxu1 %v5858_v48  ;;  %v5950_v47 = vld [vmem:[%s6317_s25 + $0xbec] ss:$16 sps:$4 sm:$0xff]   ;;  %v6759_v48 = vrot.slane %v6751_v43, %v6367_v50 }
 0x15b   : > { %4015 = vmatprep.subr.bf16.mxu0 %v5863_v49  ;;  %4384 = vmatprep.subr.bf16.mxu1 %v5866_v51  ;;  %v5945_v49 = vld [vmem:[%s6317_s25 + $0xbe0] ss:$16 sps:$4 sm:$0xff]   ;;  %v5948_v51 = vld [vmem:[%s6317_s25 + $0xbe8] ss:$16 sps:$4 sm:$0xff]  }
 0x15c   : > { %4045 = vmatprep.mubr.bf16.mxu0 %v344_v52  ;;  %4414 = vmatprep.mubr.bf16.mxu1 %v344_v52  ;;  %v5954_v52 = vld [vmem:[%s6317_s25 + $0xc04] ss:$16 sps:$4 sm:$0xff]  }
 0x15e   : > { %4016 = vmatpush1.bf16.msra.mxu0 %v5861_v33  ;;  %4385 = vmatpush1.bf16.msra.mxu1 %v5864_v53  ;;  %v5957_v33 = vld [vmem:[%s6317_s25 + $0xc0c] ss:$16 sps:$4 sm:$0xff]   ;;  %v305_v53 = vcombine.high %v6759_v48, %v6759_v48 }
 0x15f   : > { %4017 = vmatprep.subr.bf16.mxu0 %v5869_v54  ;;  %4386 = vmatprep.subr.bf16.mxu1 %v5872_v55  ;;  %v343_v54 = vpack.c.bf16 %v6684_v41, %v6684_v41  ;;  %v5952_v55 = vld [vmem:[%s6317_s25 + $0xc00] ss:$16 sps:$4 sm:$0xff]  }
 0x160   : > { %v5958_v41 = vld [vmem:[%s6317_s25 + $0xc20] ss:$16 sps:$4 sm:$0xff]  }
 0x162   : > { %4018 = vmatpush1.bf16.msra.mxu0 %v5867_v56  ;;  %4387 = vmatpush1.bf16.msra.mxu1 %v5870_v57  ;;  %v5955_v56 = vld [vmem:[%s6317_s25 + $0xc08] ss:$16 sps:$4 sm:$0xff]   ;;  %v5960_v57 = vld [vmem:[%s6317_s25 + $0xc24] ss:$16 sps:$4 sm:$0xff]  }
 0x163   : > { %4019 = vmatprep.subr.bf16.mxu0 %v5875_v58  ;;  %4388 = vmatprep.subr.bf16.mxu1 %v5878_v59  ;;  %v5963_v58 = vld [vmem:[%s6317_s25 + $0xc2c] ss:$16 sps:$4 sm:$0xff]   ;;  %v346_v59 = vpack.c.bf16 %v305_v53, %v305_v53  ;;  %v6036_v53 = vld [vmem:[%s6317_s25 + $0xdc0] ss:$16 sps:$4 sm:$0xff]  }
 0x166   : > { %4020 = vmatpush1.bf16.msra.mxu0 %v5873_v60  ;;  %4389 = vmatpush1.bf16.msra.mxu1 %v5876_v61  ;;  %v5961_v60 = vld [vmem:[%s6317_s25 + $0xc28] ss:$16 sps:$4 sm:$0xff]   ;;  %v5966_v61 = vld [vmem:[%s6317_s25 + $0xc44] ss:$16 sps:$4 sm:$0xff]  }
 0x167   : > { %4021 = vmatprep.subr.bf16.mxu0 %v5881_v62  ;;  %4390 = vmatprep.subr.bf16.mxu1 %v5884_v63  ;;  %v5969_v62 = vld [vmem:[%s6317_s25 + $0xc4c] ss:$16 sps:$4 sm:$0xff]   ;;  %v5964_v63 = vld [vmem:[%s6317_s25 + $0xc40] ss:$16 sps:$4 sm:$0xff]  }
 0x16a   : > { %4022 = vmatpush1.bf16.msra.mxu0 %v5879_v0  ;;  %4391 = vmatpush1.bf16.msra.mxu1 %v5882_v1  ;;  %v5967_v0 = vld [vmem:[%s6317_s25 + $0xc48] ss:$16 sps:$4 sm:$0xff]   ;;  %v5972_v1 = vld [vmem:[%s6317_s25 + $0xc64] ss:$16 sps:$4 sm:$0xff]  }
 0x16b   : > { %4023 = vmatprep.subr.bf16.mxu0 %v5887_v2  ;;  %4392 = vmatprep.subr.bf16.mxu1 %v5890_v3  ;;  %v5975_v2 = vld [vmem:[%s6317_s25 + $0xc6c] ss:$16 sps:$4 sm:$0xff]   ;;  %v5970_v3 = vld [vmem:[%s6317_s25 + $0xc60] ss:$16 sps:$4 sm:$0xff]  }
 0x16e   : > { %4024 = vmatpush1.bf16.msra.mxu0 %v5885_v4  ;;  %4393 = vmatpush1.bf16.msra.mxu1 %v5888_v5  ;;  %v5973_v4 = vld [vmem:[%s6317_s25 + $0xc68] ss:$16 sps:$4 sm:$0xff]   ;;  %v5978_v5 = vld [vmem:[%s6317_s25 + $0xc84] ss:$16 sps:$4 sm:$0xff]  }
 0x16f   : > { %4025 = vmatprep.subr.bf16.mxu0 %v5893_v6  ;;  %4394 = vmatprep.subr.bf16.mxu1 %v5896_v7  ;;  %v5981_v6 = vld [vmem:[%s6317_s25 + $0xc8c] ss:$16 sps:$4 sm:$0xff]   ;;  %v5976_v7 = vld [vmem:[%s6317_s25 + $0xc80] ss:$16 sps:$4 sm:$0xff]  }
 0x172   : > { %4026 = vmatpush1.bf16.msra.mxu0 %v5891_v8  ;;  %4395 = vmatpush1.bf16.msra.mxu1 %v5894_v9  ;;  %v5979_v8 = vld [vmem:[%s6317_s25 + $0xc88] ss:$16 sps:$4 sm:$0xff]   ;;  %v5984_v9 = vld [vmem:[%s6317_s25 + $0xca4] ss:$16 sps:$4 sm:$0xff]  }
 0x173   : > { %4027 = vmatprep.subr.bf16.mxu0 %v5899_v11  ;;  %4396 = vmatprep.subr.bf16.mxu1 %v5902_v12  ;;  %v5987_v11 = vld [vmem:[%s6317_s25 + $0xcac] ss:$16 sps:$4 sm:$0xff]   ;;  %v5982_v12 = vld [vmem:[%s6317_s25 + $0xca0] ss:$16 sps:$4 sm:$0xff]  }
 0x176   : > { %4028 = vmatpush1.bf16.msra.mxu0 %v5897_v13  ;;  %4397 = vmatpush1.bf16.msra.mxu1 %v5900_v14  ;;  %v5985_v13 = vld [vmem:[%s6317_s25 + $0xca8] ss:$16 sps:$4 sm:$0xff]   ;;  %v5990_v14 = vld [vmem:[%s6317_s25 + $0xcc4] ss:$16 sps:$4 sm:$0xff]  }
 0x177   : > { %4029 = vmatprep.subr.bf16.mxu0 %v5905_v15  ;;  %4398 = vmatprep.subr.bf16.mxu1 %v5908_v16  ;;  %v5993_v15 = vld [vmem:[%s6317_s25 + $0xccc] ss:$16 sps:$4 sm:$0xff]   ;;  %v5988_v16 = vld [vmem:[%s6317_s25 + $0xcc0] ss:$16 sps:$4 sm:$0xff]  }
 0x17a   : > { %4030 = vmatpush1.bf16.msra.mxu0 %v5903_v17  ;;  %4399 = vmatpush1.bf16.msra.mxu1 %v5906_v18  ;;  %v5991_v17 = vld [vmem:[%s6317_s25 + $0xcc8] ss:$16 sps:$4 sm:$0xff]   ;;  %v5996_v18 = vld [vmem:[%s6317_s25 + $0xce4] ss:$16 sps:$4 sm:$0xff]  }
 0x17b   : > { %4031 = vmatprep.subr.bf16.mxu0 %v5911_v19  ;;  %4400 = vmatprep.subr.bf16.mxu1 %v5914_v20  ;;  %v5999_v19 = vld [vmem:[%s6317_s25 + $0xcec] ss:$16 sps:$4 sm:$0xff]   ;;  %v5994_v20 = vld [vmem:[%s6317_s25 + $0xce0] ss:$16 sps:$4 sm:$0xff]  }
 0x17e   : > { %4032 = vmatpush1.bf16.msra.mxu0 %v5909_v21  ;;  %4401 = vmatpush1.bf16.msra.mxu1 %v5912_v22  ;;  %v5997_v21 = vld [vmem:[%s6317_s25 + $0xce8] ss:$16 sps:$4 sm:$0xff]   ;;  %v6002_v22 = vld [vmem:[%s6317_s25 + $0xd04] ss:$16 sps:$4 sm:$0xff]  }
 0x17f   : > { %4033 = vmatprep.subr.bf16.mxu0 %v5917_v23  ;;  %4402 = vmatprep.subr.bf16.mxu1 %v5920_v25  ;;  %v6005_v23 = vld [vmem:[%s6317_s25 + $0xd0c] ss:$16 sps:$4 sm:$0xff]   ;;  %v6000_v25 = vld [vmem:[%s6317_s25 + $0xd00] ss:$16 sps:$4 sm:$0xff]  }
 0x182   : > { %4034 = vmatpush1.bf16.msra.mxu0 %v5915_v24  ;;  %4403 = vmatpush1.bf16.msra.mxu1 %v5918_v10  ;;  %v6003_v24 = vld [vmem:[%s6317_s25 + $0xd08] ss:$16 sps:$4 sm:$0xff]   ;;  %v6008_v10 = vld [vmem:[%s6317_s25 + $0xd24] ss:$16 sps:$4 sm:$0xff]  }
 0x183   : > { %4035 = vmatprep.subr.bf16.mxu0 %v5923_v28  ;;  %4404 = vmatprep.subr.bf16.mxu1 %v5926_v30  ;;  %v6011_v28 = vld [vmem:[%s6317_s25 + $0xd2c] ss:$16 sps:$4 sm:$0xff]   ;;  %v6006_v30 = vld [vmem:[%s6317_s25 + $0xd20] ss:$16 sps:$4 sm:$0xff]  }
 0x186   : > { %4036 = vmatpush1.bf16.msra.mxu0 %v5921_v31  ;;  %4405 = vmatpush1.bf16.msra.mxu1 %v5924_v32  ;;  %v6009_v31 = vld [vmem:[%s6317_s25 + $0xd28] ss:$16 sps:$4 sm:$0xff]   ;;  %v6014_v32 = vld [vmem:[%s6317_s25 + $0xd44] ss:$16 sps:$4 sm:$0xff]  }
 0x187   : > { %4037 = vmatprep.subr.bf16.mxu0 %v5929_v34  ;;  %4406 = vmatprep.subr.bf16.mxu1 %v5932_v35  ;;  %v6017_v34 = vld [vmem:[%s6317_s25 + $0xd4c] ss:$16 sps:$4 sm:$0xff]   ;;  %v6012_v35 = vld [vmem:[%s6317_s25 + $0xd40] ss:$16 sps:$4 sm:$0xff]  }
 0x18a   : > { %4038 = vmatpush1.bf16.msra.mxu0 %v5927_v36  ;;  %4407 = vmatpush1.bf16.msra.mxu1 %v5930_v27  ;;  %v6015_v36 = vld [vmem:[%s6317_s25 + $0xd48] ss:$16 sps:$4 sm:$0xff]   ;;  %v6020_v27 = vld [vmem:[%s6317_s25 + $0xd64] ss:$16 sps:$4 sm:$0xff]  }
 0x18b   : > { %4039 = vmatprep.subr.bf16.mxu0 %v5935_v37  ;;  %4408 = vmatprep.subr.bf16.mxu1 %v5938_v38  ;;  %v6023_v37 = vld [vmem:[%s6317_s25 + $0xd6c] ss:$16 sps:$4 sm:$0xff]   ;;  %v6018_v38 = vld [vmem:[%s6317_s25 + $0xd60] ss:$16 sps:$4 sm:$0xff]  }
 0x18e   : > { %4040 = vmatpush1.bf16.msra.mxu0 %v5933_v39  ;;  %4409 = vmatpush1.bf16.msra.mxu1 %v5936_v40  ;;  %v6021_v39 = vld [vmem:[%s6317_s25 + $0xd68] ss:$16 sps:$4 sm:$0xff]   ;;  %v6026_v40 = vld [vmem:[%s6317_s25 + $0xd84] ss:$16 sps:$4 sm:$0xff]  }
 0x18f   : > { %4041 = vmatprep.subr.bf16.mxu0 %v5941_v29  ;;  %4410 = vmatprep.subr.bf16.mxu1 %v5944_v42  ;;  %v6029_v29 = vld [vmem:[%s6317_s25 + $0xd8c] ss:$16 sps:$4 sm:$0xff]   ;;  %v6024_v42 = vld [vmem:[%s6317_s25 + $0xd80] ss:$16 sps:$4 sm:$0xff]  }
 0x192   : > { %4042 = vmatpush1.bf16.msra.mxu0 %v5939_v45  ;;  %4411 = vmatpush1.bf16.msra.mxu1 %v5942_v46  ;;  %v6027_v45 = vld [vmem:[%s6317_s25 + $0xd88] ss:$16 sps:$4 sm:$0xff]   ;;  %v6032_v46 = vld [vmem:[%s6317_s25 + $0xda4] ss:$16 sps:$4 sm:$0xff]  }
 0x193   : > { %4043 = vmatprep.subr.bf16.mxu0 %v5947_v26  ;;  %4412 = vmatprep.subr.bf16.mxu1 %v5950_v47  ;;  %v6035_v26 = vld [vmem:[%s6317_s25 + $0xdac] ss:$16 sps:$4 sm:$0xff]   ;;  %v6030_v47 = vld [vmem:[%s6317_s25 + $0xda0] ss:$16 sps:$4 sm:$0xff]  }
 0x196   : > { %4044 = vmatpush1.bf16.msra.mxu0 %v5945_v49  ;;  %4413 = vmatpush1.bf16.msra.mxu1 %v5948_v51  ;;  %v6033_v49 = vld [vmem:[%s6317_s25 + $0xda8] ss:$16 sps:$4 sm:$0xff]   ;;  %v6038_v51 = vld [vmem:[%s6317_s25 + $0xdc4] ss:$16 sps:$4 sm:$0xff]  }
 0x197   : > { %4054 = vmatprep.subr.bf16.mxu0 %v5954_v52  ;;  %4423 = vmatprep.subr.bf16.mxu1 %v5957_v33  ;;  %v6041_v52 = vld [vmem:[%s6317_s25 + $0xdcc] ss:$16 sps:$4 sm:$0xff]   ;;  %v290_v33 = vcombine.high %v6751_v43, %v6751_v43  ;;  %v6042_v43 = vld [vmem:[%s6317_s25 + $0xde0] ss:$16 sps:$4 sm:$0xff]  }
 0x199   : > { %4046 = vmatmul.mubr.bf16.vlgmr.msra.gmra.mrb[0].mxu0 %v343_v54  ;;  %4415 = vmatmul.mubr.bf16.vlgmr.msra.gmra.mrb[0].mxu1 %v343_v54  ;;  %v6039_v54 = vld [vmem:[%s6317_s25 + $0xdc8] ss:$16 sps:$4 sm:$0xff]  }
 0x19a   : > { %4055 = vmatpush1.bf16.msra.mxu0 %v5952_v55  ;;  %4424 = vmatpush1.bf16.msra.mxu1 %v5955_v56  ;;  %v6044_v55 = vld [vmem:[%s6317_s25 + $0xde4] ss:$16 sps:$4 sm:$0xff]   ;;  %v6047_v56 = vld [vmem:[%s6317_s25 + $0xdec] ss:$16 sps:$4 sm:$0xff]  }
 0x19b   : > { %4056 = vmatprep.subr.bf16.mxu0 %v5960_v57  ;;  %4425 = vmatprep.subr.bf16.mxu1 %v5963_v58  ;;  %v6832_v57 = vrot.slane %v290_v33, %v6367_v50  ;;  %v6045_v58 = vld [vmem:[%s6317_s25 + $0xde8] ss:$16 sps:$4 sm:$0xff]  }
 0x19c   : > { %4086 = vmatprep.mubr.bf16.mxu0 %v346_v59  ;;  %4455 = vmatprep.mubr.bf16.mxu1 %v346_v59  ;;  %v6050_v59 = vld [vmem:[%s6317_s25 + $0xe04] ss:$16 sps:$4 sm:$0xff]   ;;  %v6123_v33 = vld [vmem:[%s6317_s25 + $0xf88] ss:$16 sps:$4 sm:$0xff]  }
 0x19e   : > { %4057 = vmatpush1.bf16.msra.mxu0 %v5958_v41  ;;  %4426 = vmatpush1.bf16.msra.mxu1 %v5961_v60  ;;  %v6053_v41 = vld [vmem:[%s6317_s25 + $0xe0c] ss:$16 sps:$4 sm:$0xff]   ;;  %v306_v60 = vcombine.high %v6832_v57, %v6832_v57 }
 0x19f   : > { %4058 = vmatprep.subr.bf16.mxu0 %v5966_v61  ;;  %4427 = vmatprep.subr.bf16.mxu1 %v5969_v62  ;;  %v345_v61 = vpack.c.bf16 %v6759_v48, %v6759_v48  ;;  %v6048_v62 = vld [vmem:[%s6317_s25 + $0xe00] ss:$16 sps:$4 sm:$0xff]  }
 0x1a0   : > { %v6054_v48 = vld [vmem:[%s6317_s25 + $0xe20] ss:$16 sps:$4 sm:$0xff]  }
 0x1a2   : > { %4059 = vmatpush1.bf16.msra.mxu0 %v5964_v63  ;;  %4428 = vmatpush1.bf16.msra.mxu1 %v5967_v0  ;;  %v6051_v63 = vld [vmem:[%s6317_s25 + $0xe08] ss:$16 sps:$4 sm:$0xff]   ;;  %v6056_v0 = vld [vmem:[%s6317_s25 + $0xe24] ss:$16 sps:$4 sm:$0xff]  }
 0x1a3   : > { %4060 = vmatprep.subr.bf16.mxu0 %v5972_v1  ;;  %4429 = vmatprep.subr.bf16.mxu1 %v5975_v2  ;;  %v6059_v1 = vld [vmem:[%s6317_s25 + $0xe2c] ss:$16 sps:$4 sm:$0xff]   ;;  %v348_v2 = vpack.c.bf16 %v306_v60, %v306_v60  ;;  %v6140_v60 = vld [vmem:[%s6317_s25 + $0xfe4] ss:$16 sps:$4 sm:$0xff]  }
 0x1a6   : > { %4061 = vmatpush1.bf16.msra.mxu0 %v5970_v3  ;;  %4430 = vmatpush1.bf16.msra.mxu1 %v5973_v4  ;;  %v6057_v3 = vld [vmem:[%s6317_s25 + $0xe28] ss:$16 sps:$4 sm:$0xff]   ;;  %v6062_v4 = vld [vmem:[%s6317_s25 + $0xe44] ss:$16 sps:$4 sm:$0xff]  }
 0x1a7   : > { %4062 = vmatprep.subr.bf16.mxu0 %v5978_v5  ;;  %4431 = vmatprep.subr.bf16.mxu1 %v5981_v6  ;;  %v6065_v5 = vld [vmem:[%s6317_s25 + $0xe4c] ss:$16 sps:$4 sm:$0xff]   ;;  %v6060_v6 = vld [vmem:[%s6317_s25 + $0xe40] ss:$16 sps:$4 sm:$0xff]  }
 0x1aa   : > { %4063 = vmatpush1.bf16.msra.mxu0 %v5976_v7  ;;  %4432 = vmatpush1.bf16.msra.mxu1 %v5979_v8  ;;  %v6063_v7 = vld [vmem:[%s6317_s25 + $0xe48] ss:$16 sps:$4 sm:$0xff]   ;;  %v6068_v8 = vld [vmem:[%s6317_s25 + $0xe64] ss:$16 sps:$4 sm:$0xff]  }
 0x1ab   : > { %4064 = vmatprep.subr.bf16.mxu0 %v5984_v9  ;;  %4433 = vmatprep.subr.bf16.mxu1 %v5987_v11  ;;  %v6071_v9 = vld [vmem:[%s6317_s25 + $0xe6c] ss:$16 sps:$4 sm:$0xff]   ;;  %v6066_v11 = vld [vmem:[%s6317_s25 + $0xe60] ss:$16 sps:$4 sm:$0xff]  }
 0x1ae   : > { %4065 = vmatpush1.bf16.msra.mxu0 %v5982_v12  ;;  %4434 = vmatpush1.bf16.msra.mxu1 %v5985_v13  ;;  %v6069_v12 = vld [vmem:[%s6317_s25 + $0xe68] ss:$16 sps:$4 sm:$0xff]   ;;  %v6074_v13 = vld [vmem:[%s6317_s25 + $0xe84] ss:$16 sps:$4 sm:$0xff]  }
 0x1af   : > { %4066 = vmatprep.subr.bf16.mxu0 %v5990_v14  ;;  %4435 = vmatprep.subr.bf16.mxu1 %v5993_v15  ;;  %v6077_v14 = vld [vmem:[%s6317_s25 + $0xe8c] ss:$16 sps:$4 sm:$0xff]   ;;  %v6072_v15 = vld [vmem:[%s6317_s25 + $0xe80] ss:$16 sps:$4 sm:$0xff]  }
 0x1b2   : > { %4067 = vmatpush1.bf16.msra.mxu0 %v5988_v16  ;;  %4436 = vmatpush1.bf16.msra.mxu1 %v5991_v17  ;;  %v6075_v16 = vld [vmem:[%s6317_s25 + $0xe88] ss:$16 sps:$4 sm:$0xff]   ;;  %v6080_v17 = vld [vmem:[%s6317_s25 + $0xea4] ss:$16 sps:$4 sm:$0xff]  }
 0x1b3   : > { %4068 = vmatprep.subr.bf16.mxu0 %v5996_v18  ;;  %4437 = vmatprep.subr.bf16.mxu1 %v5999_v19  ;;  %v6083_v18 = vld [vmem:[%s6317_s25 + $0xeac] ss:$16 sps:$4 sm:$0xff]   ;;  %v6078_v19 = vld [vmem:[%s6317_s25 + $0xea0] ss:$16 sps:$4 sm:$0xff]  }
 0x1b6   : > { %4069 = vmatpush1.bf16.msra.mxu0 %v5994_v20  ;;  %4438 = vmatpush1.bf16.msra.mxu1 %v5997_v21  ;;  %v6081_v20 = vld [vmem:[%s6317_s25 + $0xea8] ss:$16 sps:$4 sm:$0xff]   ;;  %v6086_v21 = vld [vmem:[%s6317_s25 + $0xec4] ss:$16 sps:$4 sm:$0xff]  }
 0x1b7   : > { %4070 = vmatprep.subr.bf16.mxu0 %v6002_v22  ;;  %4439 = vmatprep.subr.bf16.mxu1 %v6005_v23  ;;  %v6089_v22 = vld [vmem:[%s6317_s25 + $0xecc] ss:$16 sps:$4 sm:$0xff]   ;;  %v6084_v23 = vld [vmem:[%s6317_s25 + $0xec0] ss:$16 sps:$4 sm:$0xff]  }
 0x1ba   : > { %4071 = vmatpush1.bf16.msra.mxu0 %v6000_v25  ;;  %4440 = vmatpush1.bf16.msra.mxu1 %v6003_v24  ;;  %v6087_v25 = vld [vmem:[%s6317_s25 + $0xec8] ss:$16 sps:$4 sm:$0xff]   ;;  %v6092_v24 = vld [vmem:[%s6317_s25 + $0xee4] ss:$16 sps:$4 sm:$0xff]  }
 0x1bb   : > { %4072 = vmatprep.subr.bf16.mxu0 %v6008_v10  ;;  %4441 = vmatprep.subr.bf16.mxu1 %v6011_v28  ;;  %v6095_v10 = vld [vmem:[%s6317_s25 + $0xeec] ss:$16 sps:$4 sm:$0xff]   ;;  %v6090_v28 = vld [vmem:[%s6317_s25 + $0xee0] ss:$16 sps:$4 sm:$0xff]  }
 0x1be   : > { %4073 = vmatpush1.bf16.msra.mxu0 %v6006_v30  ;;  %4442 = vmatpush1.bf16.msra.mxu1 %v6009_v31  ;;  %v6093_v30 = vld [vmem:[%s6317_s25 + $0xee8] ss:$16 sps:$4 sm:$0xff]   ;;  %v6098_v31 = vld [vmem:[%s6317_s25 + $0xf04] ss:$16 sps:$4 sm:$0xff]  }
 0x1bf   : > { %4074 = vmatprep.subr.bf16.mxu0 %v6014_v32  ;;  %4443 = vmatprep.subr.bf16.mxu1 %v6017_v34  ;;  %v6101_v32 = vld [vmem:[%s6317_s25 + $0xf0c] ss:$16 sps:$4 sm:$0xff]   ;;  %v6096_v34 = vld [vmem:[%s6317_s25 + $0xf00] ss:$16 sps:$4 sm:$0xff]  }
 0x1c2   : > { %4075 = vmatpush1.bf16.msra.mxu0 %v6012_v35  ;;  %4444 = vmatpush1.bf16.msra.mxu1 %v6015_v36  ;;  %v6099_v35 = vld [vmem:[%s6317_s25 + $0xf08] ss:$16 sps:$4 sm:$0xff]   ;;  %v6104_v36 = vld [vmem:[%s6317_s25 + $0xf24] ss:$16 sps:$4 sm:$0xff]  }
 0x1c3   : > { %4076 = vmatprep.subr.bf16.mxu0 %v6020_v27  ;;  %4445 = vmatprep.subr.bf16.mxu1 %v6023_v37  ;;  %v6107_v27 = vld [vmem:[%s6317_s25 + $0xf2c] ss:$16 sps:$4 sm:$0xff]   ;;  %v6102_v37 = vld [vmem:[%s6317_s25 + $0xf20] ss:$16 sps:$4 sm:$0xff]  }
 0x1c6   : > { %4077 = vmatpush1.bf16.msra.mxu0 %v6018_v38  ;;  %4446 = vmatpush1.bf16.msra.mxu1 %v6021_v39  ;;  %v6105_v38 = vld [vmem:[%s6317_s25 + $0xf28] ss:$16 sps:$4 sm:$0xff]   ;;  %v6110_v39 = vld [vmem:[%s6317_s25 + $0xf44] ss:$16 sps:$4 sm:$0xff]  }
 0x1c7   : > { %4078 = vmatprep.subr.bf16.mxu0 %v6026_v40  ;;  %4447 = vmatprep.subr.bf16.mxu1 %v6029_v29  ;;  %v6113_v40 = vld [vmem:[%s6317_s25 + $0xf4c] ss:$16 sps:$4 sm:$0xff]   ;;  %v6108_v29 = vld [vmem:[%s6317_s25 + $0xf40] ss:$16 sps:$4 sm:$0xff]  }
 0x1ca   : > { %4079 = vmatpush1.bf16.msra.mxu0 %v6024_v42  ;;  %4448 = vmatpush1.bf16.msra.mxu1 %v6027_v45  ;;  %v6111_v42 = vld [vmem:[%s6317_s25 + $0xf48] ss:$16 sps:$4 sm:$0xff]   ;;  %v6116_v45 = vld [vmem:[%s6317_s25 + $0xf64] ss:$16 sps:$4 sm:$0xff]  }
 0x1cb   : > { %4080 = vmatprep.subr.bf16.mxu0 %v6032_v46  ;;  %4449 = vmatprep.subr.bf16.mxu1 %v6035_v26  ;;  %v6119_v46 = vld [vmem:[%s6317_s25 + $0xf6c] ss:$16 sps:$4 sm:$0xff]   ;;  %v6114_v26 = vld [vmem:[%s6317_s25 + $0xf60] ss:$16 sps:$4 sm:$0xff]  }
 0x1ce   : > { %4081 = vmatpush1.bf16.msra.mxu0 %v6030_v47  ;;  %4450 = vmatpush1.bf16.msra.mxu1 %v6033_v49  ;;  %v6117_v47 = vld [vmem:[%s6317_s25 + $0xf68] ss:$16 sps:$4 sm:$0xff]   ;;  %v6122_v49 = vld [vmem:[%s6317_s25 + $0xf84] ss:$16 sps:$4 sm:$0xff]  }
 0x1cf   : > { %4082 = vmatprep.subr.bf16.mxu0 %v6038_v51  ;;  %4451 = vmatprep.subr.bf16.mxu1 %v6041_v52  ;;  %v6125_v51 = vld [vmem:[%s6317_s25 + $0xf8c] ss:$16 sps:$4 sm:$0xff]   ;;  %v6120_v52 = vld [vmem:[%s6317_s25 + $0xf80] ss:$16 sps:$4 sm:$0xff]  }
 0x1d2   : > { %4083 = vmatpush1.bf16.msra.mxu0 %v6036_v53  ;;  %4452 = vmatpush1.bf16.msra.mxu1 %v6039_v54  ;;  %v6128_v53 = vld [vmem:[%s6317_s25 + $0xfa4] ss:$16 sps:$4 sm:$0xff]   ;;  %v6131_v54 = vld [vmem:[%s6317_s25 + $0xfac] ss:$16 sps:$4 sm:$0xff]  }
 0x1d3   : > { %4084 = vmatprep.subr.bf16.mxu0 %v6044_v55  ;;  %4453 = vmatprep.subr.bf16.mxu1 %v6047_v56  ;;  %v6126_v55 = vld [vmem:[%s6317_s25 + $0xfa0] ss:$16 sps:$4 sm:$0xff]   ;;  %v6129_v56 = vld [vmem:[%s6317_s25 + $0xfa8] ss:$16 sps:$4 sm:$0xff]  }
 0x1d6   : > { %4085 = vmatpush1.bf16.msra.mxu0 %v6042_v43  ;;  %4454 = vmatpush1.bf16.msra.mxu1 %v6045_v58  ;;  %v6134_v43 = vld [vmem:[%s6317_s25 + $0xfc4] ss:$16 sps:$4 sm:$0xff]   ;;  %v6137_v58 = vld [vmem:[%s6317_s25 + $0xfcc] ss:$16 sps:$4 sm:$0xff]  }
 0x1d7   : > { %4095 = vmatprep.subr.bf16.mxu0 %v6050_v59  ;;  %4464 = vmatprep.subr.bf16.mxu1 %v6053_v41  ;;  %v6132_v59 = vld [vmem:[%s6317_s25 + $0xfc0] ss:$16 sps:$4 sm:$0xff]   ;;  %v6135_v41 = vld [vmem:[%s6317_s25 + $0xfc8] ss:$16 sps:$4 sm:$0xff]  }
 0x1d9   : > { %4087 = vmatmul.mubr.bf16.vlgmr.msra.gmra.mrb[0].mxu0 %v345_v61  ;;  %4456 = vmatmul.mubr.bf16.vlgmr.msra.gmra.mrb[0].mxu1 %v345_v61  ;;  %v6143_v61 = vld [vmem:[%s6317_s25 + $0xfec] ss:$16 sps:$4 sm:$0xff]  }
 0x1da   : > { %4096 = vmatpush1.bf16.msra.mxu0 %v6048_v62  ;;  %4465 = vmatpush1.bf16.msra.mxu1 %v6051_v63  ;;  %v6903_v62 = vld.sshfl [vmem:[%s6312_s21 + $0x20] sm:$0x33 pattern:$0x76325410] }
 0x1db   : > { %4097 = vmatprep.subr.bf16.mxu0 %v6056_v0  ;;  %4466 = vmatprep.subr.bf16.mxu1 %v6059_v1  ;;  %v6138_v63 = vld [vmem:[%s6317_s25 + $0xfe0] ss:$16 sps:$4 sm:$0xff]   ;;  %v6141_v0 = vld [vmem:[%s6317_s25 + $0xfe8] ss:$16 sps:$4 sm:$0xff]   ;;  %v6147_v1 = vld [vmem:[%s6317_s25 + $0x1004] ss:$16 sps:$4 sm:$0xff]  }
 0x1dc   : > { %4127 = vmatprep.mubr.bf16.mxu0 %v348_v2  ;;  %4496 = vmatprep.mubr.bf16.mxu1 %v348_v2  ;;  %v6150_v2 = vld [vmem:[%s6317_s25 + $0x100c] ss:$16 sps:$4 sm:$0xff]  }
 0x1de   : > { %4098 = vmatpush1.bf16.msra.mxu0 %v6054_v48  ;;  %4467 = vmatpush1.bf16.msra.mxu1 %v6057_v3  ;;  %v314_v48 = vcombine.high %v6903_v62, %v6903_v62  ;;  %v347_v3 = vpack.c.bf16 %v6832_v57, %v6832_v57  ;;  %v6151_v57 = vld [vmem:[%s6317_s25 + $0x1020] ss:$16 sps:$4 sm:$0xff]  }
 0x1df   : > { %4099 = vmatprep.subr.bf16.mxu0 %v6062_v4  ;;  %4468 = vmatprep.subr.bf16.mxu1 %v6065_v5  ;;  %v6145_v4 = vld [vmem:[%s6317_s25 + $0x1000] ss:$16 sps:$4 sm:$0xff]   ;;  %v6148_v5 = vld [vmem:[%s6317_s25 + $0x1008] ss:$16 sps:$4 sm:$0xff]  }
 0x1e2   : > { %4100 = vmatpush1.bf16.msra.mxu0 %v6060_v6  ;;  %4469 = vmatpush1.bf16.msra.mxu1 %v6063_v7  ;;  %v6153_v6 = vld [vmem:[%s6317_s25 + $0x1024] ss:$16 sps:$4 sm:$0xff]   ;;  %v6156_v7 = vld [vmem:[%s6317_s25 + $0x102c] ss:$16 sps:$4 sm:$0xff]  }
 0x1e3   : > { %4101 = vmatprep.subr.bf16.mxu0 %v6068_v8  ;;  %4470 = vmatprep.subr.bf16.mxu1 %v6071_v9  ;;  %v350_v8 = vpack.c.bf16 %v314_v48, %v314_v48  ;;  %v6154_v9 = vld [vmem:[%s6317_s25 + $0x1028] ss:$16 sps:$4 sm:$0xff]   ;;  %v6237_v48 = vld [vmem:[%s6317_s25 + $0x11e4] ss:$16 sps:$4 sm:$0xff]  }
 0x1e6   : > { %4102 = vmatpush1.bf16.msra.mxu0 %v6066_v11  ;;  %4471 = vmatpush1.bf16.msra.mxu1 %v6069_v12  ;;  %v6159_v11 = vld [vmem:[%s6317_s25 + $0x1044] ss:$16 sps:$4 sm:$0xff]   ;;  %v6162_v12 = vld [vmem:[%s6317_s25 + $0x104c] ss:$16 sps:$4 sm:$0xff]  }
 0x1e7   : > { %4103 = vmatprep.subr.bf16.mxu0 %v6074_v13  ;;  %4472 = vmatprep.subr.bf16.mxu1 %v6077_v14  ;;  %v6157_v13 = vld [vmem:[%s6317_s25 + $0x1040] ss:$16 sps:$4 sm:$0xff]   ;;  %v6160_v14 = vld [vmem:[%s6317_s25 + $0x1048] ss:$16 sps:$4 sm:$0xff]  }
 0x1ea   : > { %4104 = vmatpush1.bf16.msra.mxu0 %v6072_v15  ;;  %4473 = vmatpush1.bf16.msra.mxu1 %v6075_v16  ;;  %v6165_v15 = vld [vmem:[%s6317_s25 + $0x1064] ss:$16 sps:$4 sm:$0xff]   ;;  %v6168_v16 = vld [vmem:[%s6317_s25 + $0x106c] ss:$16 sps:$4 sm:$0xff]  }
 0x1eb   : > { %4105 = vmatprep.subr.bf16.mxu0 %v6080_v17  ;;  %4474 = vmatprep.subr.bf16.mxu1 %v6083_v18  ;;  %v6163_v17 = vld [vmem:[%s6317_s25 + $0x1060] ss:$16 sps:$4 sm:$0xff]   ;;  %v6166_v18 = vld [vmem:[%s6317_s25 + $0x1068] ss:$16 sps:$4 sm:$0xff]  }
 0x1ee   : > { %4106 = vmatpush1.bf16.msra.mxu0 %v6078_v19  ;;  %4475 = vmatpush1.bf16.msra.mxu1 %v6081_v20  ;;  %v6171_v19 = vld [vmem:[%s6317_s25 + $0x1084] ss:$16 sps:$4 sm:$0xff]   ;;  %v6174_v20 = vld [vmem:[%s6317_s25 + $0x108c] ss:$16 sps:$4 sm:$0xff]  }
 0x1ef   : > { %4107 = vmatprep.subr.bf16.mxu0 %v6086_v21  ;;  %4476 = vmatprep.subr.bf16.mxu1 %v6089_v22  ;;  %v6169_v21 = vld [vmem:[%s6317_s25 + $0x1080] ss:$16 sps:$4 sm:$0xff]   ;;  %v6172_v22 = vld [vmem:[%s6317_s25 + $0x1088] ss:$16 sps:$4 sm:$0xff]  }
 0x1f2   : > { %4108 = vmatpush1.bf16.msra.mxu0 %v6084_v23  ;;  %4477 = vmatpush1.bf16.msra.mxu1 %v6087_v25  ;;  %v6177_v23 = vld [vmem:[%s6317_s25 + $0x10a4] ss:$16 sps:$4 sm:$0xff]   ;;  %v6180_v25 = vld [vmem:[%s6317_s25 + $0x10ac] ss:$16 sps:$4 sm:$0xff]  }
 0x1f3   : > { %4109 = vmatprep.subr.bf16.mxu0 %v6092_v24  ;;  %4478 = vmatprep.subr.bf16.mxu1 %v6095_v10  ;;  %v6175_v24 = vld [vmem:[%s6317_s25 + $0x10a0] ss:$16 sps:$4 sm:$0xff]   ;;  %v6178_v10 = vld [vmem:[%s6317_s25 + $0x10a8] ss:$16 sps:$4 sm:$0xff]  }
 0x1f6   : > { %4110 = vmatpush1.bf16.msra.mxu0 %v6090_v28  ;;  %4479 = vmatpush1.bf16.msra.mxu1 %v6093_v30  ;;  %v6183_v28 = vld [vmem:[%s6317_s25 + $0x10c4] ss:$16 sps:$4 sm:$0xff]   ;;  %v6186_v30 = vld [vmem:[%s6317_s25 + $0x10cc] ss:$16 sps:$4 sm:$0xff]  }
 0x1f7   : > { %4111 = vmatprep.subr.bf16.mxu0 %v6098_v31  ;;  %4480 = vmatprep.subr.bf16.mxu1 %v6101_v32  ;;  %v6181_v31 = vld [vmem:[%s6317_s25 + $0x10c0] ss:$16 sps:$4 sm:$0xff]   ;;  %v6184_v32 = vld [vmem:[%s6317_s25 + $0x10c8] ss:$16 sps:$4 sm:$0xff]  }
 0x1fa   : > { %4112 = vmatpush1.bf16.msra.mxu0 %v6096_v34  ;;  %4481 = vmatpush1.bf16.msra.mxu1 %v6099_v35  ;;  %v6189_v34 = vld [vmem:[%s6317_s25 + $0x10e4] ss:$16 sps:$4 sm:$0xff]   ;;  %v6192_v35 = vld [vmem:[%s6317_s25 + $0x10ec] ss:$16 sps:$4 sm:$0xff]  }
 0x1fb   : > { %4113 = vmatprep.subr.bf16.mxu0 %v6104_v36  ;;  %4482 = vmatprep.subr.bf16.mxu1 %v6107_v27  ;;  %v6187_v36 = vld [vmem:[%s6317_s25 + $0x10e0] ss:$16 sps:$4 sm:$0xff]   ;;  %v6190_v27 = vld [vmem:[%s6317_s25 + $0x10e8] ss:$16 sps:$4 sm:$0xff]  }
 0x1fe   : > { %4114 = vmatpush1.bf16.msra.mxu0 %v6102_v37  ;;  %4483 = vmatpush1.bf16.msra.mxu1 %v6105_v38  ;;  %v6195_v37 = vld [vmem:[%s6317_s25 + $0x1104] ss:$16 sps:$4 sm:$0xff]   ;;  %v6198_v38 = vld [vmem:[%s6317_s25 + $0x110c] ss:$16 sps:$4 sm:$0xff]  }
 0x1ff   : > { %4115 = vmatprep.subr.bf16.mxu0 %v6110_v39  ;;  %4484 = vmatprep.subr.bf16.mxu1 %v6113_v40  ;;  %v6193_v39 = vld [vmem:[%s6317_s25 + $0x1100] ss:$16 sps:$4 sm:$0xff]   ;;  %v6196_v40 = vld [vmem:[%s6317_s25 + $0x1108] ss:$16 sps:$4 sm:$0xff]  }
 0x202   : > { %4116 = vmatpush1.bf16.msra.mxu0 %v6108_v29  ;;  %4485 = vmatpush1.bf16.msra.mxu1 %v6111_v42  ;;  %v6201_v29 = vld [vmem:[%s6317_s25 + $0x1124] ss:$16 sps:$4 sm:$0xff]   ;;  %v6204_v42 = vld [vmem:[%s6317_s25 + $0x112c] ss:$16 sps:$4 sm:$0xff]  }
 0x203   : > { %4117 = vmatprep.subr.bf16.mxu0 %v6116_v45  ;;  %4486 = vmatprep.subr.bf16.mxu1 %v6119_v46  ;;  %v6199_v45 = vld [vmem:[%s6317_s25 + $0x1120] ss:$16 sps:$4 sm:$0xff]   ;;  %v6202_v46 = vld [vmem:[%s6317_s25 + $0x1128] ss:$16 sps:$4 sm:$0xff]  }
 0x206   : > { %4118 = vmatpush1.bf16.msra.mxu0 %v6114_v26  ;;  %4487 = vmatpush1.bf16.msra.mxu1 %v6117_v47  ;;  %v6207_v26 = vld [vmem:[%s6317_s25 + $0x1144] ss:$16 sps:$4 sm:$0xff]   ;;  %v6210_v47 = vld [vmem:[%s6317_s25 + $0x114c] ss:$16 sps:$4 sm:$0xff]  }
 0x207   : > { %4119 = vmatprep.subr.bf16.mxu0 %v6122_v49  ;;  %4488 = vmatprep.subr.bf16.mxu1 %v6125_v51  ;;  %v6205_v49 = vld [vmem:[%s6317_s25 + $0x1140] ss:$16 sps:$4 sm:$0xff]   ;;  %v6208_v51 = vld [vmem:[%s6317_s25 + $0x1148] ss:$16 sps:$4 sm:$0xff]  }
 0x20a   : > { %4120 = vmatpush1.bf16.msra.mxu0 %v6120_v52  ;;  %4489 = vmatpush1.bf16.msra.mxu1 %v6123_v33  ;;  %v6213_v52 = vld [vmem:[%s6317_s25 + $0x1164] ss:$16 sps:$4 sm:$0xff]   ;;  %v6216_v33 = vld [vmem:[%s6317_s25 + $0x116c] ss:$16 sps:$4 sm:$0xff]  }
 0x20b   : > { %4121 = vmatprep.subr.bf16.mxu0 %v6128_v53  ;;  %4490 = vmatprep.subr.bf16.mxu1 %v6131_v54  ;;  %v6211_v53 = vld [vmem:[%s6317_s25 + $0x1160] ss:$16 sps:$4 sm:$0xff]   ;;  %v6214_v54 = vld [vmem:[%s6317_s25 + $0x1168] ss:$16 sps:$4 sm:$0xff]  }
 0x20e   : > { %4122 = vmatpush1.bf16.msra.mxu0 %v6126_v55  ;;  %4491 = vmatpush1.bf16.msra.mxu1 %v6129_v56  ;;  %v6219_v55 = vld [vmem:[%s6317_s25 + $0x1184] ss:$16 sps:$4 sm:$0xff]   ;;  %v6222_v56 = vld [vmem:[%s6317_s25 + $0x118c] ss:$16 sps:$4 sm:$0xff]  }
 0x20f   : > { %4123 = vmatprep.subr.bf16.mxu0 %v6134_v43  ;;  %4492 = vmatprep.subr.bf16.mxu1 %v6137_v58  ;;  %v6217_v43 = vld [vmem:[%s6317_s25 + $0x1180] ss:$16 sps:$4 sm:$0xff]   ;;  %v6220_v58 = vld [vmem:[%s6317_s25 + $0x1188] ss:$16 sps:$4 sm:$0xff]  }
 0x212   : > { %4124 = vmatpush1.bf16.msra.mxu0 %v6132_v59  ;;  %4493 = vmatpush1.bf16.msra.mxu1 %v6135_v41  ;;  %v6225_v59 = vld [vmem:[%s6317_s25 + $0x11a4] ss:$16 sps:$4 sm:$0xff]   ;;  %v6228_v41 = vld [vmem:[%s6317_s25 + $0x11ac] ss:$16 sps:$4 sm:$0xff]  }
 0x213   : > { %4125 = vmatprep.subr.bf16.mxu0 %v6140_v60  ;;  %4494 = vmatprep.subr.bf16.mxu1 %v6143_v61  ;;  %v6223_v60 = vld [vmem:[%s6317_s25 + $0x11a0] ss:$16 sps:$4 sm:$0xff]   ;;  %v6226_v61 = vld [vmem:[%s6317_s25 + $0x11a8] ss:$16 sps:$4 sm:$0xff]  }
 0x216   : > { %4126 = vmatpush1.bf16.msra.mxu0 %v6138_v63  ;;  %4495 = vmatpush1.bf16.msra.mxu1 %v6141_v0  ;;  %v6231_v63 = vld [vmem:[%s6317_s25 + $0x11c4] ss:$16 sps:$4 sm:$0xff]   ;;  %v6234_v0 = vld [vmem:[%s6317_s25 + $0x11cc] ss:$16 sps:$4 sm:$0xff]  }
 0x217   : > { %4136 = vmatprep.subr.bf16.mxu0 %v6147_v1  ;;  %4505 = vmatprep.subr.bf16.mxu1 %v6150_v2  ;;  %v6229_v1 = vld [vmem:[%s6317_s25 + $0x11c0] ss:$16 sps:$4 sm:$0xff]   ;;  %v6232_v2 = vld [vmem:[%s6317_s25 + $0x11c8] ss:$16 sps:$4 sm:$0xff]  }
 0x219   : > { %4128 = vmatmul.mubr.bf16.vlgmr.msra.gmra.mrb[0].mxu0 %v347_v3  ;;  %4497 = vmatmul.mubr.bf16.vlgmr.msra.gmra.mrb[0].mxu1 %v347_v3  ;;  %v6240_v3 = vld [vmem:[%s6317_s25 + $0x11ec] ss:$16 sps:$4 sm:$0xff]  }
 0x21a   : > { %4137 = vmatpush1.bf16.msra.mxu0 %v6145_v4  ;;  %4506 = vmatpush1.bf16.msra.mxu1 %v6148_v5  ;;  %v6235_v4 = vld [vmem:[%s6317_s25 + $0x11e0] ss:$16 sps:$4 sm:$0xff]   ;;  %v6238_v5 = vld [vmem:[%s6317_s25 + $0x11e8] ss:$16 sps:$4 sm:$0xff]  }
 0x21b   : > { %4138 = vmatprep.subr.bf16.mxu0 %v6153_v6  ;;  %4507 = vmatprep.subr.bf16.mxu1 %v6156_v7  ;;  %v349_v6 = vpack.c.bf16 %v6903_v62, %v6903_v62 }
 0x21c   : > { %4168 = vmatprep.mubr.bf16.mxu0 %v350_v8  ;;  %4537 = vmatprep.mubr.bf16.mxu1 %v350_v8 }
 0x21e   : > { %4139 = vmatpush1.bf16.msra.mxu0 %v6151_v57  ;;  %4508 = vmatpush1.bf16.msra.mxu1 %v6154_v9 }
 0x21f   : > { %4140 = vmatprep.subr.bf16.mxu0 %v6159_v11  ;;  %4509 = vmatprep.subr.bf16.mxu1 %v6162_v12 }
 0x222   : > { %4141 = vmatpush1.bf16.msra.mxu0 %v6157_v13  ;;  %4510 = vmatpush1.bf16.msra.mxu1 %v6160_v14 }
 0x223   : > { %4142 = vmatprep.subr.bf16.mxu0 %v6165_v15  ;;  %4511 = vmatprep.subr.bf16.mxu1 %v6168_v16 }
 0x226   : > { %4143 = vmatpush1.bf16.msra.mxu0 %v6163_v17  ;;  %4512 = vmatpush1.bf16.msra.mxu1 %v6166_v18 }
 0x227   : > { %4144 = vmatprep.subr.bf16.mxu0 %v6171_v19  ;;  %4513 = vmatprep.subr.bf16.mxu1 %v6174_v20  ;;  %v351_v19 = vld [vmem:[#allocation2] sm:$0xff] }
 0x22a   : > { %4145 = vmatpush1.bf16.msra.mxu0 %v6169_v21  ;;  %4514 = vmatpush1.bf16.msra.mxu1 %v6172_v22  ;;  %v4575_v21 = vld [vmem:[%s7003_s2] sm:$0xf] (!%p5278_p7)  ;;  %v4579_v22 = vsub.s32 (!%p5278_p7), 0, %v6359_v44 }
 0x22b   : > { %4146 = vmatprep.subr.bf16.mxu0 %v6177_v23  ;;  %4515 = vmatprep.subr.bf16.mxu1 %v6180_v25  ;;  %v4583_v23 = vsub.s32 (!%p5278_p7), 1, %v6359_v44  ;;  %v4587_v25 = vsub.s32 (!%p5278_p7), 2, %v6359_v44 }
 0x22e   : > { %4147 = vmatpush1.bf16.msra.mxu0 %v6175_v24  ;;  %4516 = vmatpush1.bf16.msra.mxu1 %v6178_v10  ;;  %v4591_v24 = vsub.s32 (!%p5278_p7), 3, %v6359_v44  ;;  %v4580_v10 = vrot.slane (!%p5278_p7), %v4575_v21, %v4579_v22 }
 0x22f   : > { %4148 = vmatprep.subr.bf16.mxu0 %v6183_v28  ;;  %4517 = vmatprep.subr.bf16.mxu1 %v6186_v30  ;;  %v4584_v28 = vrot.slane (!%p5278_p7), %v4575_v21, %v4583_v23  ;;  %v4588_v30 = vrot.slane (!%p5278_p7), %v4575_v21, %v4587_v25 }
 0x232   : > { %4149 = vmatpush1.bf16.msra.mxu0 %v6181_v31  ;;  %4518 = vmatpush1.bf16.msra.mxu1 %v6184_v32  ;;  %v4592_v31 = vrot.slane (!%p5278_p7), %v4575_v21, %v4591_v24  ;;  %v4593_v32 = vcombine.low (!%p5278_p7), %v4580_v10, %v4584_v28 }
 0x233   : > { %4150 = vmatprep.subr.bf16.mxu0 %v6189_v34  ;;  %4519 = vmatprep.subr.bf16.mxu1 %v6192_v35 }
 0x234   : > { %v4594_v34 = vcombine.low (!%p5278_p7), %v4588_v30, %v4592_v31  ;;  %v4601_v35 = vrot.slane (!%p5278_p7), %v4593_v32, %v6367_v50 }
 0x236   : > { %4151 = vmatpush1.bf16.msra.mxu0 %v6187_v36  ;;  %4520 = vmatpush1.bf16.msra.mxu1 %v6190_v27  ;;  %v4608_v36 = vrot.slane (!%p5278_p7), %v4594_v34, %v6367_v50 }
 0x237   : > { %4152 = vmatprep.subr.bf16.mxu0 %v6195_v37  ;;  %4521 = vmatprep.subr.bf16.mxu1 %v6198_v38 }
 0x238   : > { %v4609_v37 = vcombine.low (!%p5278_p7), %v4601_v35, %v4608_v36 }
 0x23a   : > { %4153 = vmatpush1.bf16.msra.mxu0 %v6193_v39  ;;  %4522 = vmatpush1.bf16.msra.mxu1 %v6196_v40 }
 0x23b   : > { %4154 = vmatprep.subr.bf16.mxu0 %v6201_v29  ;;  %4523 = vmatprep.subr.bf16.mxu1 %v6204_v42 }
 0x23e   : > { %4155 = vmatpush1.bf16.msra.mxu0 %v6199_v45  ;;  %4524 = vmatpush1.bf16.msra.mxu1 %v6202_v46 }
 0x23f   : > { %4156 = vmatprep.subr.bf16.mxu0 %v6207_v26  ;;  %4525 = vmatprep.subr.bf16.mxu1 %v6210_v47 }
 0x242   : > { %4157 = vmatpush1.bf16.msra.mxu0 %v6205_v49  ;;  %4526 = vmatpush1.bf16.msra.mxu1 %v6208_v51 }
 0x243   : > { %4158 = vmatprep.subr.bf16.mxu0 %v6213_v52  ;;  %4527 = vmatprep.subr.bf16.mxu1 %v6216_v33 }
 0x246   : > { %4159 = vmatpush1.bf16.msra.mxu0 %v6211_v53  ;;  %4528 = vmatpush1.bf16.msra.mxu1 %v6214_v54 }
 0x247   : > { %4160 = vmatprep.subr.bf16.mxu0 %v6219_v55  ;;  %4529 = vmatprep.subr.bf16.mxu1 %v6222_v56 }
 0x24a   : > { %4161 = vmatpush1.bf16.msra.mxu0 %v6217_v43  ;;  %4530 = vmatpush1.bf16.msra.mxu1 %v6220_v58 }
 0x24b   : > { %4162 = vmatprep.subr.bf16.mxu0 %v6225_v59  ;;  %4531 = vmatprep.subr.bf16.mxu1 %v6228_v41 }
 0x24e   : > { %4163 = vmatpush1.bf16.msra.mxu0 %v6223_v60  ;;  %4532 = vmatpush1.bf16.msra.mxu1 %v6226_v61 }
 0x24f   : > { %4164 = vmatprep.subr.bf16.mxu0 %v6231_v63  ;;  %4533 = vmatprep.subr.bf16.mxu1 %v6234_v0 }
 0x252   : > { %4165 = vmatpush1.bf16.msra.mxu0 %v6229_v1  ;;  %4534 = vmatpush1.bf16.msra.mxu1 %v6232_v2 }
 0x253   : > { %4166 = vmatprep.subr.bf16.mxu0 %v6237_v48  ;;  %4535 = vmatprep.subr.bf16.mxu1 %v6240_v3 }
 0x256   : > { %4167 = vmatpush1.bf16.msra.mxu0 %v6235_v4  ;;  %4536 = vmatpush1.bf16.msra.mxu1 %v6238_v5 }
 0x259   : > { %4169 = vmatmul.mubr.bf16.vlgmr.msra.gmra.mrb[0].mxu0 %v349_v6  ;;  %4538 = vmatmul.mubr.bf16.vlgmr.msra.gmra.mrb[0].mxu1 %v349_v6 }
 0x32c   : > { %v4170_v7 = vpop.f32.mrb[0].mxu0  ;;  %v4539_v8 = vpop.f32.mrb[0].mxu1 }
 0x32d   : > { %v4172_v57 = vpop.f32.mrb[1].mxu0  ;;  %v4541_v9 = vpop.f32.mrb[1].mxu1 }
 0x32e   : > { %v4550_v11 = vcombine.low %v4170_v7, %v4172_v57  ;;  %v4551_v12 = vcombine.low %v4539_v8, %v4541_v9  ;;  %v4174_v13 = vpop.f32.mrb[2].mxu0  ;;  %v4543_v14 = vpop.f32.mrb[2].mxu1 }
 0x32f   : > { %v4175_v15 = vpop.f32.mrb[3].mxu0  ;;  %v4544_v16 = vpop.f32.mrb[3].mxu1 }
 0x330   : > { %v4558_v17 = vrot.slane %v4550_v11, %v6367_v50  ;;  %v4565_v18 = vrot.slane %v4551_v12, %v6367_v50  ;;  %4573 = sbr.rel (%p5278_p7) target bundleno = 835 (0x343), region = 40 }
 0x332   : > { %v4566_v62 = vcombine.low %v4558_v17, %v4565_v18 }
 0x334   : > { %v4568_v20 = vadd.f32 %v4566_v62, %v351_v19 }
 0x336   : > { %4569 = vst [vmem:[#allocation2] sm:$0xff] %v4568_v20 }
 0x33d   : > { %v4574_v27 = vld [vmem:[#allocation2] sm:$0xff] }
 0x33e   : > { %v4611_v38 = vadd.f32 %v4609_v37, %v4574_v27 }
 0x340   : > { %v4612_v39 = vmax.f32 %v4611_v38, 0.0 }
 0x342   : > { %4613 = vst [vmem:[%s7004_s3] sm:$0xff] %v4612_v39 }
 0x343 PF: > { %s13_s14 = sadd.s32 1, %s6263_s14   ;;  %s7005_s12 = smov %s6259_s13 }
 0x344   : > { %p10_p8 = scmp.ge.s32.totalorder %s13_s14, 6   ;;  %s7006_s13 = smov %s7008_s15 }
 0x346   :  { %12 = sbr.rel (!%p10_p8) target bundleno = 2 (0x2), region = 73 }

</bundles_post_ra>
